<compile_context>
chip_gen: v7x
topology: tpu7x:2x2x1
jax: 0.10.0
libtpu: 0.0.40
codegen_flags: <defaults>
</compile_context>

<pallas_src>
import jax
import jax.numpy as jnp
from jax.experimental import pallas as pl
from jax.experimental.pallas import tpu as pltpu


_VMEM_LIMIT_BYTES = 32 * 1024 * 1024   # safe default on v5e / v6e / v7x


# --------------------------- tile-size selection ---------------------------

def _round_up(x, m):
    return ((x + m - 1) // m) * m


def _pick_m_tile(m, pref=256):
    """Rows per grid step. Multiple of 16 (bf16 sublane packing); callers pad
    M up to a multiple of the returned tile."""
    if m >= pref:
        return pref
    return max(16, _round_up(m, 16))


def _pick_lane_tile(dim, pref=512):
    """Largest power-of-two multiple of 128 (<= pref) that divides `dim`,
    else the full dim (full-dim blocks are always legal)."""
    t = pref
    while t >= 128:
        if dim % t == 0:
            return t
        t //= 2
    return dim


def _weights_fit_vmem(h, i, itemsize, budget=_VMEM_LIMIT_BYTES):
    """Can Wg + Wu + Wd live VMEM-resident (with double-buffer pessimism and
    headroom for activations / intermediates)?"""
    w_bytes = 3 * h * i * itemsize
    return 2 * w_bytes <= 0.6 * budget


# ------------------------------ Pallas kernels ------------------------------

def _mlp_resident_kernel(x_ref, wg_ref, wu_ref, wd_ref, o_ref):
    """Fully fused MLP for one M-tile; weights are whole-array VMEM-resident."""
    x = x_ref[...]                                                   # (tm, H)
    g = jnp.dot(x, wg_ref[...], preferred_element_type=jnp.float32)  # (tm, I)
    u = jnp.dot(x, wu_ref[...], preferred_element_type=jnp.float32)  # (tm, I)
    h = (g * jax.nn.sigmoid(g)) * u                                   # SiLU*up, f32
    o_ref[...] = jnp.dot(h.astype(wd_ref.dtype), wd_ref[...],
                         preferred_element_type=jnp.float32).astype(o_ref.dtype)


def _mlp_tiled_kernel(x_ref, wg_ref, wu_ref, wd_ref, o_ref,
                      g_acc, u_acc, o_acc):
    """Fused MLP with tiled reductions: k tiles H (gate/up K), j tiles I
    (down-projection K).  The intermediate h never leaves VMEM."""
    j = pl.program_id(1)               # I-tile index (output accumulation)
    k = pl.program_id(2)               # H-tile index (gate/up accumulation)
    nj = pl.num_programs(1)
    nk = pl.num_programs(2)

    @pl.when((j == 0) & (k == 0))
    def _():
        o_acc[...] = jnp.zeros_like(o_acc)

    @pl.when(k == 0)
    def _():
        g_acc[...] = jnp.zeros_like(g_acc)
        u_acc[...] = jnp.zeros_like(u_acc)

    x = x_ref[...]                     # bf16 tile, read once, feeds both dots
    g_acc[...] += jnp.dot(x, wg_ref[...], preferred_element_type=jnp.float32)
    u_acc[...] += jnp.dot(x, wu_ref[...], preferred_element_type=jnp.float32)

    @pl.when(k == nk - 1)
    def _():
        g = g_acc[...]
        h = (g * jax.nn.sigmoid(g)) * u_acc[...]
        o_acc[...] += jnp.dot(h.astype(wd_ref.dtype), wd_ref[...],
                              preferred_element_type=jnp.float32)

    @pl.when((j == nj - 1) & (k == nk - 1))
    def _():
        o_ref[...] = o_acc[...].astype(o_ref.dtype)


# ------------------------------ pallas_call glue -----------------------------

def _mlp_resident(x2, wg, wu, wd, *, out_dtype, tm):
    M, H = x2.shape
    I = wg.shape[1]
    return pl.pallas_call(
        _mlp_resident_kernel,
        out_shape=jax.ShapeDtypeStruct((M, H), out_dtype),
        grid_spec=pltpu.PrefetchScalarGridSpec(
            num_scalar_prefetch=0,
            grid=(M // tm,),
            in_specs=[
                pl.BlockSpec((tm, H), lambda i: (i, 0)),   # x tile
                pl.BlockSpec((H, I), lambda i: (0, 0)),    # Wg (VMEM-resident)
                pl.BlockSpec((H, I), lambda i: (0, 0)),    # Wu (VMEM-resident)
                pl.BlockSpec((I, H), lambda i: (0, 0)),    # Wd (VMEM-resident)
            ],
            out_specs=pl.BlockSpec((tm, H), lambda i: (i, 0)),
        ),
        compiler_params=pltpu.CompilerParams(
            dimension_semantics=("parallel",),
            vmem_limit_bytes=_VMEM_LIMIT_BYTES,
        ),
    )(x2, wg, wu, wd)


def _mlp_tiled(x2, wg, wu, wd, *, out_dtype, tm):
    M, H = x2.shape
    I = wg.shape[1]
    tk = _pick_lane_tile(H, pref=512)   # K tile over H (capped for v7x VMEM)
    ti = _pick_lane_tile(I, pref=512)   # reduction tile over I
    return pl.pallas_call(
        _mlp_tiled_kernel,
        out_shape=jax.ShapeDtypeStruct((M, H), out_dtype),
        grid_spec=pltpu.PrefetchScalarGridSpec(
            num_scalar_prefetch=0,
            grid=(M // tm, I // ti, H // tk),
            in_specs=[
                pl.BlockSpec((tm, tk), lambda i, j, k: (i, k)),   # x
                pl.BlockSpec((tk, ti), lambda i, j, k: (k, j)),   # Wg
                pl.BlockSpec((tk, ti), lambda i, j, k: (k, j)),   # Wu
                pl.BlockSpec((ti, H), lambda i, j, k: (j, 0)),    # Wd
            ],
            out_specs=pl.BlockSpec((tm, H), lambda i, j, k: (i, 0)),
            scratch_shapes=[
                pltpu.VMEM((tm, ti), jnp.float32),   # gate accumulator
                pltpu.VMEM((tm, ti), jnp.float32),   # up accumulator
                pltpu.VMEM((tm, H), jnp.float32),    # output accumulator
            ],
        ),
        compiler_params=pltpu.CompilerParams(
            dimension_semantics=("parallel", "arbitrary", "arbitrary"),
            vmem_limit_bytes=_VMEM_LIMIT_BYTES,
        ),
    )(x2, wg, wu, wd)


def llama_mlp(x, wg, wu, wd, *, mode="auto"):
    """LlamaMLP forward:  down_proj( SiLU(x @ Wg) * (x @ Wu) ).

    x        : [..., H]  activations (any float dtype)
    wg, wu   : [H, I]    (= torch gate_proj.weight.T / up_proj.weight.T),
                         ideally pre-cast to bf16 once at load time
    wd       : [I, H]    (= torch down_proj.weight.T), ideally bf16
    mode     : "auto" | "resident" | "tiled"
    """
    H, I = wg.shape
    assert wu.shape == (H, I) and wd.shape == (I, H)
    orig_shape = x.shape
    out_dtype = x.dtype

    compute_dtype = wg.dtype            # weights define the MXU operand dtype
    x2 = x.reshape(-1, H).astype(compute_dtype)   # cheap activation cast
    M = x2.shape[0]

    tm = _pick_m_tile(M)
    M_pad = _round_up(M, tm)
    if M_pad != M:                      # pad awkward batch sizes with zero rows
        x2 = jnp.pad(x2, ((0, M_pad - M), (0, 0)))

    if mode == "auto":
        fits = _weights_fit_vmem(H, I, jnp.dtype(compute_dtype).itemsize)
        mode = "resident" if fits else "tiled"

    if mode == "resident":
        out = _mlp_resident(x2, wg, wu, wd, out_dtype=out_dtype, tm=tm)
    else:
        out = _mlp_tiled(x2, wg, wu, wd, out_dtype=out_dtype, tm=tm)

    if M_pad != M:
        out = out[:M]
    return out.reshape(orig_shape)


# --------------------------------- test drive --------------------------------

def _ref_mlp(x, wg, wu, wd):
    """Pure-JAX reference with the same bf16-operand / f32-accumulate recipe."""
    H = wg.shape[0]
    xb = x.reshape(-1, H).astype(wg.dtype)
    g = jnp.dot(xb, wg, preferred_element_type=jnp.float32)
    u = jnp.dot(xb, wu, preferred_element_type=jnp.float32)
    h = ((g * jax.nn.sigmoid(g)) * u).astype(wd.dtype)
    o = jnp.dot(h, wd, preferred_element_type=jnp.float32)
    return o.astype(x.dtype).reshape(x.shape)


if __name__ == "__main__":
    HIDDEN = 576
    INTER = 1536
    B, S = 2, 8

    key = jax.random.PRNGKey(0)
    kx, kg, ku, kd = jax.random.split(key, 4)
    std = 0.02

    x = jax.random.normal(kx, (B, S, HIDDEN), jnp.float32)
    wg = std * jax.random.normal(kg, (HIDDEN, INTER), jnp.float32)
    wu = std * jax.random.normal(ku, (HIDDEN, INTER), jnp.float32)
    wd = std * jax.random.normal(kd, (INTER, HIDDEN), jnp.float32)

    # Pre-cast weights to bf16 ONCE ("parameter load time") — not per call.
    wg_b = wg.astype(jnp.bfloat16)
    wu_b = wu.astype(jnp.bfloat16)
    wd_b = wd.astype(jnp.bfloat16)

    ref = jax.block_until_ready(_ref_mlp(x, wg_b, wu_b, wd_b))

    # Primary (auto -> VMEM-resident weights) fused kernel.
    out = jax.block_until_ready(llama_mlp(x, wg_b, wu_b, wd_b))
    assert out.shape == (B, S, HIDDEN)
    assert bool(jnp.all(jnp.isfinite(out)))
    assert bool(jnp.allclose(out, ref, atol=1e-2, rtol=1e-2)), (
        float(jnp.max(jnp.abs(out - ref))))

    # Also exercise the tiled fallback path (used when weights exceed VMEM).
    out_t = jax.block_until_ready(llama_mlp(x, wg_b, wu_b, wd_b, mode="tiled"))
    assert bool(jnp.allclose(out_t, ref, atol=1e-2, rtol=1e-2)), (
        float(jnp.max(jnp.abs(out_t - ref))))

    print("KERNEL_OK")
</pallas_src>

<mosaic_0001>
module attributes {stable_mosaic.version = 11 : i64} {
  func.func @_mlp_resident_kernel(%arg0: i32, %arg1: memref<16x576xbf16, #tpu.memory_space<vmem>>, %arg2: memref<576x1536xbf16, #tpu.memory_space<vmem>>, %arg3: memref<576x1536xbf16, #tpu.memory_space<vmem>>, %arg4: memref<1536x576xbf16, #tpu.memory_space<vmem>>, %arg5: memref<16x576xf32, #tpu.memory_space<vmem>>) attributes {dimension_semantics = [#tpu.dimension_semantics<parallel>], iteration_bounds = array<i64: 1>, scalar_prefetch = 0 : i64, scratch_operands = 0 : i64, tpu.core_type = #tpu.core_type<tc>, window_params = [{transform_indices = @transform_0, window_bounds = array<i64: 16, 576>}, {pipeline_mode = #tpu.pipeline_mode<synchronous>, transform_indices = @transform_1, window_bounds = array<i64: 576, 1536>}, {pipeline_mode = #tpu.pipeline_mode<synchronous>, transform_indices = @transform_2, window_bounds = array<i64: 576, 1536>}, {pipeline_mode = #tpu.pipeline_mode<synchronous>, transform_indices = @transform_3, window_bounds = array<i64: 1536, 576>}, {transform_indices = @transform_4, window_bounds = array<i64: 16, 576>}]} {
    %c0 = arith.constant 0 : index
    %c0_0 = arith.constant 0 : index
    %0 = vector.load %arg1[%c0, %c0_0] : memref<16x576xbf16, #tpu.memory_space<vmem>>, vector<16x576xbf16>
    %c0_1 = arith.constant 0 : index
    %c0_2 = arith.constant 0 : index
    %1 = vector.load %arg2[%c0_1, %c0_2] : memref<576x1536xbf16, #tpu.memory_space<vmem>>, vector<576x1536xbf16>
    %cst = arith.constant dense<0.000000e+00> : vector<16x1536xf32>
    %2 = tpu.matmul %0, %1, %cst {dimension_numbers = #tpu.dot_dimension_numbers<[1], [0], [0], [1], [0, 0, 1, 1], [], []>} : vector<16x576xbf16>, vector<576x1536xbf16>, vector<16x1536xf32> -> vector<16x1536xf32>
    %c0_3 = arith.constant 0 : index
    %c0_4 = arith.constant 0 : index
    %3 = vector.load %arg3[%c0_3, %c0_4] : memref<576x1536xbf16, #tpu.memory_space<vmem>>, vector<576x1536xbf16>
    %cst_5 = arith.constant dense<0.000000e+00> : vector<16x1536xf32>
    %4 = tpu.matmul %0, %3, %cst_5 {dimension_numbers = #tpu.dot_dimension_numbers<[1], [0], [0], [1], [0, 0, 1, 1], [], []>} : vector<16x576xbf16>, vector<576x1536xbf16>, vector<16x1536xf32> -> vector<16x1536xf32>
    %5 = arith.negf %2 : vector<16x1536xf32>
    %6 = math.exp %5 : vector<16x1536xf32>
    %cst_6 = arith.constant 1.000000e+00 : f32
    %7 = vector.broadcast %cst_6 : f32 to vector<16x1536xf32>
    %8 = arith.addf %7, %6 : vector<16x1536xf32>
    %9 = arith.divf %7, %8 : vector<16x1536xf32>
    %10 = arith.mulf %2, %9 : vector<16x1536xf32>
    %11 = arith.mulf %10, %4 : vector<16x1536xf32>
    %12 = arith.truncf %11 : vector<16x1536xf32> to vector<16x1536xbf16>
    %c0_7 = arith.constant 0 : index
    %c0_8 = arith.constant 0 : index
    %13 = vector.load %arg4[%c0_7, %c0_8] : memref<1536x576xbf16, #tpu.memory_space<vmem>>, vector<1536x576xbf16>
    %cst_9 = arith.constant dense<0.000000e+00> : vector<16x576xf32>
    %14 = tpu.matmul %12, %13, %cst_9 {dimension_numbers = #tpu.dot_dimension_numbers<[1], [0], [0], [1], [0, 0, 1, 1], [], []>} : vector<16x1536xbf16>, vector<1536x576xbf16>, vector<16x576xf32> -> vector<16x576xf32>
    %c0_10 = arith.constant 0 : index
    %c0_11 = arith.constant 0 : index
    %15 = vector.load %arg5[%c0_10, %c0_11] : memref<16x576xf32, #tpu.memory_space<vmem>>, vector<16x576xf32>
    tpu.vector_store %arg5[%c0_10, %c0_11], %14 {strides = array<i32>} : memref<16x576xf32, #tpu.memory_space<vmem>>, vector<16x576xf32>,
    return
  }
  func.func @transform_0(%arg0: i32) -> (i32, i32) {
    %c0_i32 = arith.constant 0 : i32
    %c0_i32_0 = arith.constant 0 : i32
    return %arg0, %c0_i32 : i32, i32
  }
  func.func @transform_1(%arg0: i32) -> (i32, i32) {
    %c0_i32 = arith.constant 0 : i32
    %c0_i32_0 = arith.constant 0 : i32
    %c0_i32_1 = arith.constant 0 : i32
    return %c0_i32, %c0_i32_0 : i32, i32
  }
  func.func @transform_2(%arg0: i32) -> (i32, i32) {
    %c0_i32 = arith.constant 0 : i32
    %c0_i32_0 = arith.constant 0 : i32
    %c0_i32_1 = arith.constant 0 : i32
    return %c0_i32, %c0_i32_0 : i32, i32
  }
  func.func @transform_3(%arg0: i32) -> (i32, i32) {
    %c0_i32 = arith.constant 0 : i32
    %c0_i32_0 = arith.constant 0 : i32
    %c0_i32_1 = arith.constant 0 : i32
    return %c0_i32, %c0_i32_0 : i32, i32
  }
  func.func @transform_4(%arg0: i32) -> (i32, i32) {
    %c0_i32 = arith.constant 0 : i32
    %c0_i32_0 = arith.constant 0 : i32
    return %arg0, %c0_i32 : i32, i32
  }
}

</mosaic_0001>

<bundles_post_ra>
// kernel: tpu_custom_call.1
= control target key start
LH: loop header
LB: loop body
LE: loop exit
PB: predicated region body
PF: predicated region fallthrough
CT: control target
= control target key end

     0   :  { %vm2642_vm0 = vcmask 523264   ;;  %s18985_s0 = inlined_call_operand.vmem [shape: bf16[16,576], index: 0, kind: input, shape index: {}]   ;;  %s18986_s1 = inlined_call_operand.vmem [shape: bf16[576,1536], index: 1, kind: input, shape index: {}]   ;;  %s18987_s2 = inlined_call_operand.vmem [shape: bf16[576,1536], index: 2, kind: input, shape index: {}]   ;;  %s18988_s3 = inlined_call_operand.vmem [shape: bf16[1536,576], index: 3, kind: input, shape index: {}]   ;;  %s18989_s4 = inlined_call_operand.hbm [shape: f32[16,576], index: 4, kind: output, shape index: {}]  }
   0x1   :  { %v12507_v0 = vld [vmem:[%s18986_s1 + $0x4] ss:$48 sps:$4 sm:$0xff]   ;;  %v12509_v1 = vld [vmem:[%s18986_s1 + $0xc] ss:$48 sps:$4 sm:$0xff]   ;;  %v12511_v2 = vld [vmem:[%s18986_s1] ss:$48 sps:$4 sm:$0xff]  }
   0x2   :  { %2646 = vmatprep.subr.bf16.mxu0 %v12507_v0  ;;  %v12512_v3 = vld [vmem:[%s18986_s1 + $0x8] ss:$48 sps:$4 sm:$0xff]   ;;  %2775 = vmatprep.subr.bf16.mxu1 %v12509_v1  ;;  %v12513_v4 = vld [vmem:[%s18986_s1 + $0x64] ss:$48 sps:$4 sm:$0xff]   ;;  %v12515_v5 = vld [vmem:[%s18986_s1 + $0x6c] ss:$48 sps:$4 sm:$0xff]  }
   0x3   :  { %2647 = vmatpush1.bf16.msra.mxu0 %v12511_v2  ;;  %2776 = vmatpush1.bf16.msra.mxu1 %v12512_v3  ;;  %v12517_v6 = vld [vmem:[%s18986_s1 + $0x60] ss:$48 sps:$4 sm:$0xff]   ;;  %v12518_v7 = vld [vmem:[%s18986_s1 + $0x68] ss:$48 sps:$4 sm:$0xff]   ;;  %v12519_v8 = vld [vmem:[%s18986_s1 + $0xc4] ss:$48 sps:$4 sm:$0xff]  }
   0x4   :  { %2648 = vmatprep.subr.bf16.mxu0 %v12513_v4  ;;  %2777 = vmatprep.subr.bf16.mxu1 %v12515_v5  ;;  %v12521_v9 = vld [vmem:[%s18986_s1 + $0xcc] ss:$48 sps:$4 sm:$0xff]   ;;  %v12523_v10 = vld [vmem:[%s18986_s1 + $0xc0] ss:$48 sps:$4 sm:$0xff]   ;;  %v12524_v11 = vld [vmem:[%s18986_s1 + $0xc8] ss:$48 sps:$4 sm:$0xff]  }
   0x5   :  { %v12525_v12 = vld [vmem:[%s18986_s1 + $0x124] ss:$48 sps:$4 sm:$0xff]   ;;  %v12527_v13 = vld [vmem:[%s18986_s1 + $0x12c] ss:$48 sps:$4 sm:$0xff]   ;;  %v12529_v14 = vld [vmem:[%s18986_s1 + $0x120] ss:$48 sps:$4 sm:$0xff]  }
   0x6   :  { %v12530_v15 = vld [vmem:[%s18986_s1 + $0x128] ss:$48 sps:$4 sm:$0xff]   ;;  %v12531_v16 = vld [vmem:[%s18986_s1 + $0x184] ss:$48 sps:$4 sm:$0xff]   ;;  %v12533_v17 = vld [vmem:[%s18986_s1 + $0x18c] ss:$48 sps:$4 sm:$0xff]  }
   0x7   :  { %2649 = vmatpush1.bf16.msra.mxu0 %v12517_v6  ;;  %2778 = vmatpush1.bf16.msra.mxu1 %v12518_v7  ;;  %v12535_v18 = vld [vmem:[%s18986_s1 + $0x180] ss:$48 sps:$4 sm:$0xff]   ;;  %v12536_v19 = vld [vmem:[%s18986_s1 + $0x188] ss:$48 sps:$4 sm:$0xff]   ;;  %v12537_v20 = vld [vmem:[%s18986_s1 + $0x1e4] ss:$48 sps:$4 sm:$0xff]  }
   0x8   :  { %2650 = vmatprep.subr.bf16.mxu0 %v12519_v8  ;;  %2779 = vmatprep.subr.bf16.mxu1 %v12521_v9  ;;  %v12539_v21 = vld [vmem:[%s18986_s1 + $0x1ec] ss:$48 sps:$4 sm:$0xff]   ;;  %v12541_v22 = vld [vmem:[%s18986_s1 + $0x1e0] ss:$48 sps:$4 sm:$0xff]   ;;  %v12542_v23 = vld [vmem:[%s18986_s1 + $0x1e8] ss:$48 sps:$4 sm:$0xff]  }
   0x9   :  { %v12543_v24 = vld [vmem:[%s18986_s1 + $0x244] ss:$48 sps:$4 sm:$0xff]   ;;  %v12545_v25 = vld [vmem:[%s18986_s1 + $0x24c] ss:$48 sps:$4 sm:$0xff]   ;;  %v12547_v26 = vld [vmem:[%s18986_s1 + $0x240] ss:$48 sps:$4 sm:$0xff]  }
   0xa   :  { %v12548_v27 = vld [vmem:[%s18986_s1 + $0x248] ss:$48 sps:$4 sm:$0xff]   ;;  %v12549_v28 = vld [vmem:[%s18986_s1 + $0x2a4] ss:$48 sps:$4 sm:$0xff]   ;;  %v12551_v29 = vld [vmem:[%s18986_s1 + $0x2ac] ss:$48 sps:$4 sm:$0xff]  }
   0xb   :  { %2651 = vmatpush1.bf16.msra.mxu0 %v12523_v10  ;;  %2780 = vmatpush1.bf16.msra.mxu1 %v12524_v11  ;;  %v12553_v30 = vld [vmem:[%s18986_s1 + $0x2a0] ss:$48 sps:$4 sm:$0xff]   ;;  %v12554_v31 = vld [vmem:[%s18986_s1 + $0x2a8] ss:$48 sps:$4 sm:$0xff]   ;;  %v12555_v32 = vld [vmem:[%s18986_s1 + $0x304] ss:$48 sps:$4 sm:$0xff]  }
   0xc   :  { %2652 = vmatprep.subr.bf16.mxu0 %v12525_v12  ;;  %2781 = vmatprep.subr.bf16.mxu1 %v12527_v13  ;;  %v12557_v33 = vld [vmem:[%s18986_s1 + $0x30c] ss:$48 sps:$4 sm:$0xff]   ;;  %v12559_v34 = vld [vmem:[%s18986_s1 + $0x300] ss:$48 sps:$4 sm:$0xff]   ;;  %v12560_v35 = vld [vmem:[%s18986_s1 + $0x308] ss:$48 sps:$4 sm:$0xff]  }
   0xd   :  { %v12561_v36 = vld [vmem:[%s18986_s1 + $0x364] ss:$48 sps:$4 sm:$0xff]   ;;  %v12563_v37 = vld [vmem:[%s18986_s1 + $0x36c] ss:$48 sps:$4 sm:$0xff]   ;;  %v12565_v38 = vld [vmem:[%s18986_s1 + $0x360] ss:$48 sps:$4 sm:$0xff]  }
   0xe   :  { %v12566_v39 = vld [vmem:[%s18986_s1 + $0x368] ss:$48 sps:$4 sm:$0xff]   ;;  %v12567_v40 = vld [vmem:[%s18986_s1 + $0x3c4] ss:$48 sps:$4 sm:$0xff]   ;;  %v12569_v41 = vld [vmem:[%s18986_s1 + $0x3cc] ss:$48 sps:$4 sm:$0xff]  }
   0xf   :  { %2653 = vmatpush1.bf16.msra.mxu0 %v12529_v14  ;;  %2782 = vmatpush1.bf16.msra.mxu1 %v12530_v15  ;;  %v12571_v42 = vld [vmem:[%s18986_s1 + $0x3c0] ss:$48 sps:$4 sm:$0xff]   ;;  %v12572_v43 = vld [vmem:[%s18986_s1 + $0x3c8] ss:$48 sps:$4 sm:$0xff]   ;;  %v12573_v44 = vld [vmem:[%s18986_s1 + $0x424] ss:$48 sps:$4 sm:$0xff]  }
  0x10   :  { %2654 = vmatprep.subr.bf16.mxu0 %v12531_v16  ;;  %2783 = vmatprep.subr.bf16.mxu1 %v12533_v17  ;;  %v12575_v45 = vld [vmem:[%s18986_s1 + $0x42c] ss:$48 sps:$4 sm:$0xff]   ;;  %v12577_v46 = vld [vmem:[%s18986_s1 + $0x420] ss:$48 sps:$4 sm:$0xff]   ;;  %v14798_v47 = vld [vmem:[%s18985_s0 + $0x4] ss:$20 sps:$4 sm:$0xff]  }
  0x11   :  { %v12578_v48 = vld [vmem:[%s18986_s1 + $0x428] ss:$48 sps:$4 sm:$0xff]   ;;  %v12579_v49 = vld [vmem:[%s18986_s1 + $0x484] ss:$48 sps:$4 sm:$0xff]   ;;  %v12581_v50 = vld [vmem:[%s18986_s1 + $0x48c] ss:$48 sps:$4 sm:$0xff]   ;;  %2678 = vmatprep.mubr.bf16.mxu0 %v14798_v47  ;;  %2807 = vmatprep.mubr.bf16.mxu1 %v14798_v47 }
  0x12   :  { %v12583_v51 = vld [vmem:[%s18986_s1 + $0x480] ss:$48 sps:$4 sm:$0xff]   ;;  %v12584_v52 = vld [vmem:[%s18986_s1 + $0x488] ss:$48 sps:$4 sm:$0xff]   ;;  %v12585_v53 = vld [vmem:[%s18986_s1 + $0x4e4] ss:$48 sps:$4 sm:$0xff]  }
  0x13   :  { %2655 = vmatpush1.bf16.msra.mxu0 %v12535_v18  ;;  %2784 = vmatpush1.bf16.msra.mxu1 %v12536_v19  ;;  %v12587_v54 = vld [vmem:[%s18986_s1 + $0x4ec] ss:$48 sps:$4 sm:$0xff]   ;;  %v12589_v55 = vld [vmem:[%s18986_s1 + $0x4e0] ss:$48 sps:$4 sm:$0xff]   ;;  %v12590_v56 = vld [vmem:[%s18986_s1 + $0x4e8] ss:$48 sps:$4 sm:$0xff]  }
  0x14   :  { %2656 = vmatprep.subr.bf16.mxu0 %v12537_v20  ;;  %2785 = vmatprep.subr.bf16.mxu1 %v12539_v21  ;;  %v12591_v57 = vld [vmem:[%s18986_s1 + $0x544] ss:$48 sps:$4 sm:$0xff]   ;;  %v12593_v58 = vld [vmem:[%s18986_s1 + $0x54c] ss:$48 sps:$4 sm:$0xff]   ;;  %v12595_v59 = vld [vmem:[%s18986_s1 + $0x540] ss:$48 sps:$4 sm:$0xff]  }
  0x15   :  { %v12596_v60 = vld [vmem:[%s18986_s1 + $0x548] ss:$48 sps:$4 sm:$0xff]   ;;  %v12597_v61 = vld [vmem:[%s18986_s1 + $0x5a4] ss:$48 sps:$4 sm:$0xff]   ;;  %v12599_v62 = vld [vmem:[%s18986_s1 + $0x5ac] ss:$48 sps:$4 sm:$0xff]  }
  0x16   :  { %v12601_v63 = vld [vmem:[%s18986_s1 + $0x5a0] ss:$48 sps:$4 sm:$0xff]   ;;  %v12602_v0 = vld [vmem:[%s18986_s1 + $0x5a8] ss:$48 sps:$4 sm:$0xff]   ;;  %v12607_v1 = vld [vmem:[%s18986_s1 + $0x604] ss:$48 sps:$4 sm:$0xff]  }
  0x17   :  { %2657 = vmatpush1.bf16.msra.mxu0 %v12541_v22  ;;  %2786 = vmatpush1.bf16.msra.mxu1 %v12542_v23  ;;  %v12610_v2 = vld [vmem:[%s18986_s1 + $0x60c] ss:$48 sps:$4 sm:$0xff]   ;;  %v12605_v3 = vld [vmem:[%s18986_s1 + $0x600] ss:$48 sps:$4 sm:$0xff]   ;;  %v12608_v4 = vld [vmem:[%s18986_s1 + $0x608] ss:$48 sps:$4 sm:$0xff]  }
  0x18   :  { %2658 = vmatprep.subr.bf16.mxu0 %v12543_v24  ;;  %2787 = vmatprep.subr.bf16.mxu1 %v12545_v25  ;;  %v12611_v5 = vld [vmem:[%s18985_s0] ss:$20 sps:$4 sm:$0xff]   ;;  %v12617_v7 = vld [vmem:[%s18986_s1 + $0x66c] ss:$48 sps:$4 sm:$0xff]   ;;  %v12615_v9 = vld [vmem:[%s18986_s1 + $0x668] ss:$48 sps:$4 sm:$0xff]  }
  0x19   :  { %v12614_v6 = vld [vmem:[%s18986_s1 + $0x664] ss:$48 sps:$4 sm:$0xff]   ;;  %v12612_v8 = vld [vmem:[%s18986_s1 + $0x660] ss:$48 sps:$4 sm:$0xff]   ;;  %v12623_v11 = vld [vmem:[%s18986_s1 + $0x6cc] ss:$48 sps:$4 sm:$0xff]  }
  0x1a   :  { %v12620_v10 = vld [vmem:[%s18986_s1 + $0x6c4] ss:$48 sps:$4 sm:$0xff]   ;;  %v12618_v12 = vld [vmem:[%s18986_s1 + $0x6c0] ss:$48 sps:$4 sm:$0xff]   ;;  %v12621_v13 = vld [vmem:[%s18986_s1 + $0x6c8] ss:$48 sps:$4 sm:$0xff]  }
  0x1b   :  { %2659 = vmatpush1.bf16.msra.mxu0 %v12547_v26  ;;  %2788 = vmatpush1.bf16.msra.mxu1 %v12548_v27  ;;  %v12626_v14 = vld [vmem:[%s18986_s1 + $0x724] ss:$48 sps:$4 sm:$0xff]   ;;  %v12629_v15 = vld [vmem:[%s18986_s1 + $0x72c] ss:$48 sps:$4 sm:$0xff]   ;;  %v12624_v16 = vld [vmem:[%s18986_s1 + $0x720] ss:$48 sps:$4 sm:$0xff]  }
  0x1c   :  { %2660 = vmatprep.subr.bf16.mxu0 %v12549_v28  ;;  %2789 = vmatprep.subr.bf16.mxu1 %v12551_v29  ;;  %v12627_v17 = vld [vmem:[%s18986_s1 + $0x728] ss:$48 sps:$4 sm:$0xff]   ;;  %v12632_v18 = vld [vmem:[%s18986_s1 + $0x784] ss:$48 sps:$4 sm:$0xff]   ;;  %v12635_v19 = vld [vmem:[%s18986_s1 + $0x78c] ss:$48 sps:$4 sm:$0xff]  }
  0x1d   :  { %v12630_v20 = vld [vmem:[%s18986_s1 + $0x780] ss:$48 sps:$4 sm:$0xff]   ;;  %v12633_v21 = vld [vmem:[%s18986_s1 + $0x788] ss:$48 sps:$4 sm:$0xff]   ;;  %v12638_v22 = vld [vmem:[%s18986_s1 + $0x7e4] ss:$48 sps:$4 sm:$0xff]  }
  0x1e   :  { %v12641_v23 = vld [vmem:[%s18986_s1 + $0x7ec] ss:$48 sps:$4 sm:$0xff]   ;;  %v12636_v24 = vld [vmem:[%s18986_s1 + $0x7e0] ss:$48 sps:$4 sm:$0xff]   ;;  %v12639_v25 = vld [vmem:[%s18986_s1 + $0x7e8] ss:$48 sps:$4 sm:$0xff]  }
  0x1f   :  { %2661 = vmatpush1.bf16.msra.mxu0 %v12553_v30  ;;  %2790 = vmatpush1.bf16.msra.mxu1 %v12554_v31  ;;  %v12644_v26 = vld [vmem:[%s18986_s1 + $0x844] ss:$48 sps:$4 sm:$0xff]   ;;  %v12647_v27 = vld [vmem:[%s18986_s1 + $0x84c] ss:$48 sps:$4 sm:$0xff]   ;;  %v12642_v28 = vld [vmem:[%s18986_s1 + $0x840] ss:$48 sps:$4 sm:$0xff]  }
  0x20   :  { %2662 = vmatprep.subr.bf16.mxu0 %v12555_v32  ;;  %2791 = vmatprep.subr.bf16.mxu1 %v12557_v33  ;;  %v14940_v29 = vld [vmem:[%s18985_s0 + $0xc] ss:$20 sps:$4 sm:$0xff]   ;;  %v12645_v30 = vld [vmem:[%s18986_s1 + $0x848] ss:$48 sps:$4 sm:$0xff]   ;;  %v12650_v31 = vld [vmem:[%s18986_s1 + $0x8a4] ss:$48 sps:$4 sm:$0xff]  }
  0x21   :  { %v12653_v32 = vld [vmem:[%s18986_s1 + $0x8ac] ss:$48 sps:$4 sm:$0xff]   ;;  %v12648_v33 = vld [vmem:[%s18986_s1 + $0x8a0] ss:$48 sps:$4 sm:$0xff]  }
  0x23   :  { %2663 = vmatpush1.bf16.msra.mxu0 %v12559_v34  ;;  %2792 = vmatpush1.bf16.msra.mxu1 %v12560_v35  ;;  %v12651_v34 = vld [vmem:[%s18986_s1 + $0x8a8] ss:$48 sps:$4 sm:$0xff]   ;;  %v12656_v35 = vld [vmem:[%s18986_s1 + $0x904] ss:$48 sps:$4 sm:$0xff]  }
  0x24   :  { %2664 = vmatprep.subr.bf16.mxu0 %v12561_v36  ;;  %2793 = vmatprep.subr.bf16.mxu1 %v12563_v37  ;;  %v12659_v36 = vld [vmem:[%s18986_s1 + $0x90c] ss:$48 sps:$4 sm:$0xff]   ;;  %v12654_v37 = vld [vmem:[%s18986_s1 + $0x900] ss:$48 sps:$4 sm:$0xff]  }
  0x27   :  { %2665 = vmatpush1.bf16.msra.mxu0 %v12565_v38  ;;  %2794 = vmatpush1.bf16.msra.mxu1 %v12566_v39  ;;  %v12657_v38 = vld [vmem:[%s18986_s1 + $0x908] ss:$48 sps:$4 sm:$0xff]   ;;  %v12662_v39 = vld [vmem:[%s18986_s1 + $0x964] ss:$48 sps:$4 sm:$0xff]  }
  0x28   :  { %2666 = vmatprep.subr.bf16.mxu0 %v12567_v40  ;;  %2795 = vmatprep.subr.bf16.mxu1 %v12569_v41  ;;  %v12665_v40 = vld [vmem:[%s18986_s1 + $0x96c] ss:$48 sps:$4 sm:$0xff]   ;;  %v12660_v41 = vld [vmem:[%s18986_s1 + $0x960] ss:$48 sps:$4 sm:$0xff]  }
  0x2b   :  { %2667 = vmatpush1.bf16.msra.mxu0 %v12571_v42  ;;  %2796 = vmatpush1.bf16.msra.mxu1 %v12572_v43  ;;  %v12663_v42 = vld [vmem:[%s18986_s1 + $0x968] ss:$48 sps:$4 sm:$0xff]   ;;  %v12668_v43 = vld [vmem:[%s18986_s1 + $0x9c4] ss:$48 sps:$4 sm:$0xff]  }
  0x2c   :  { %2668 = vmatprep.subr.bf16.mxu0 %v12573_v44  ;;  %2797 = vmatprep.subr.bf16.mxu1 %v12575_v45  ;;  %v12671_v44 = vld [vmem:[%s18986_s1 + $0x9cc] ss:$48 sps:$4 sm:$0xff]   ;;  %v12666_v45 = vld [vmem:[%s18986_s1 + $0x9c0] ss:$48 sps:$4 sm:$0xff]  }
  0x2f   :  { %2669 = vmatpush1.bf16.msra.mxu0 %v12577_v46  ;;  %2798 = vmatpush1.bf16.msra.mxu1 %v12578_v48  ;;  %v12669_v46 = vld [vmem:[%s18986_s1 + $0x9c8] ss:$48 sps:$4 sm:$0xff]   ;;  %v12674_v48 = vld [vmem:[%s18986_s1 + $0xa24] ss:$48 sps:$4 sm:$0xff]  }
  0x30   :  { %2670 = vmatprep.subr.bf16.mxu0 %v12579_v49  ;;  %2799 = vmatprep.subr.bf16.mxu1 %v12581_v50  ;;  %v12677_v49 = vld [vmem:[%s18986_s1 + $0xa2c] ss:$48 sps:$4 sm:$0xff]   ;;  %v12672_v50 = vld [vmem:[%s18986_s1 + $0xa20] ss:$48 sps:$4 sm:$0xff]  }
  0x33   :  { %2671 = vmatpush1.bf16.msra.mxu0 %v12583_v51  ;;  %2800 = vmatpush1.bf16.msra.mxu1 %v12584_v52  ;;  %v12675_v51 = vld [vmem:[%s18986_s1 + $0xa28] ss:$48 sps:$4 sm:$0xff]   ;;  %v12680_v52 = vld [vmem:[%s18986_s1 + $0xa84] ss:$48 sps:$4 sm:$0xff]  }
  0x34   :  { %2672 = vmatprep.subr.bf16.mxu0 %v12585_v53  ;;  %2801 = vmatprep.subr.bf16.mxu1 %v12587_v54  ;;  %v12683_v53 = vld [vmem:[%s18986_s1 + $0xa8c] ss:$48 sps:$4 sm:$0xff]   ;;  %v12678_v54 = vld [vmem:[%s18986_s1 + $0xa80] ss:$48 sps:$4 sm:$0xff]  }
  0x37   :  { %2673 = vmatpush1.bf16.msra.mxu0 %v12589_v55  ;;  %2802 = vmatpush1.bf16.msra.mxu1 %v12590_v56  ;;  %v12681_v55 = vld [vmem:[%s18986_s1 + $0xa88] ss:$48 sps:$4 sm:$0xff]   ;;  %v12686_v56 = vld [vmem:[%s18986_s1 + $0xae4] ss:$48 sps:$4 sm:$0xff]  }
  0x38   :  { %2674 = vmatprep.subr.bf16.mxu0 %v12591_v57  ;;  %2803 = vmatprep.subr.bf16.mxu1 %v12593_v58  ;;  %v12689_v57 = vld [vmem:[%s18986_s1 + $0xaec] ss:$48 sps:$4 sm:$0xff]   ;;  %v12684_v58 = vld [vmem:[%s18986_s1 + $0xae0] ss:$48 sps:$4 sm:$0xff]  }
  0x3b   :  { %2675 = vmatpush1.bf16.msra.mxu0 %v12595_v59  ;;  %2804 = vmatpush1.bf16.msra.mxu1 %v12596_v60  ;;  %v12687_v59 = vld [vmem:[%s18986_s1 + $0xae8] ss:$48 sps:$4 sm:$0xff]   ;;  %v12692_v60 = vld [vmem:[%s18986_s1 + $0xb44] ss:$48 sps:$4 sm:$0xff]  }
  0x3c   :  { %2676 = vmatprep.subr.bf16.mxu0 %v12597_v61  ;;  %2805 = vmatprep.subr.bf16.mxu1 %v12599_v62  ;;  %v12695_v61 = vld [vmem:[%s18986_s1 + $0xb4c] ss:$48 sps:$4 sm:$0xff]   ;;  %v12690_v62 = vld [vmem:[%s18986_s1 + $0xb40] ss:$48 sps:$4 sm:$0xff]  }
  0x3f   :  { %2677 = vmatpush1.bf16.msra.mxu0 %v12601_v63  ;;  %2806 = vmatpush1.bf16.msra.mxu1 %v12602_v0  ;;  %v12693_v63 = vld [vmem:[%s18986_s1 + $0xb48] ss:$48 sps:$4 sm:$0xff]   ;;  %v12698_v0 = vld [vmem:[%s18986_s1 + $0xba4] ss:$48 sps:$4 sm:$0xff]  }
  0x40   :  { %2689 = vmatprep.subr.bf16.mxu0 %v12607_v1  ;;  %2818 = vmatprep.subr.bf16.mxu1 %v12610_v2  ;;  %v12701_v1 = vld [vmem:[%s18986_s1 + $0xbac] ss:$48 sps:$4 sm:$0xff]   ;;  %v12696_v2 = vld [vmem:[%s18986_s1 + $0xba0] ss:$48 sps:$4 sm:$0xff]  }
  0x42   :  { %2679 = vmatmul.mubr.bf16.vlgmr.msra.gmra.mrb[0].mxu0 %v12611_v5  ;;  %2808 = vmatmul.mubr.bf16.vlgmr.msra.gmra.mrb[0].mxu1 %v12611_v5  ;;  %v12709_v5 = vld [vmem:[%s18986_s1 + $0xc0c] ss:$48 sps:$4 sm:$0xff]  }
  0x43   :  { %2690 = vmatpush1.bf16.msra.mxu0 %v12605_v3  ;;  %2819 = vmatpush1.bf16.msra.mxu1 %v12608_v4  ;;  %v12699_v3 = vld [vmem:[%s18986_s1 + $0xba8] ss:$48 sps:$4 sm:$0xff]   ;;  %v12706_v4 = vld [vmem:[%s18986_s1 + $0xc04] ss:$48 sps:$4 sm:$0xff]  }
  0x44   :  { %2691 = vmatprep.subr.bf16.mxu0 %v12614_v6  ;;  %2820 = vmatprep.subr.bf16.mxu1 %v12617_v7  ;;  %v12704_v6 = vld [vmem:[%s18986_s1 + $0xc00] ss:$48 sps:$4 sm:$0xff]   ;;  %v12710_v7 = vld [vmem:[%s18985_s0 + $0x8] ss:$20 sps:$4 sm:$0xff]  }
  0x45   :  { %2721 = vmatprep.mubr.bf16.mxu0 %v14940_v29  ;;  %2850 = vmatprep.mubr.bf16.mxu1 %v14940_v29 }
  0x47   :  { %2692 = vmatpush1.bf16.msra.mxu0 %v12612_v8  ;;  %2821 = vmatpush1.bf16.msra.mxu1 %v12615_v9  ;;  %v12707_v8 = vld [vmem:[%s18986_s1 + $0xc08] ss:$48 sps:$4 sm:$0xff]   ;;  %v12713_v9 = vld [vmem:[%s18986_s1 + $0xc64] ss:$48 sps:$4 sm:$0xff]  }
  0x48   :  { %2693 = vmatprep.subr.bf16.mxu0 %v12620_v10  ;;  %2822 = vmatprep.subr.bf16.mxu1 %v12623_v11  ;;  %v12716_v10 = vld [vmem:[%s18986_s1 + $0xc6c] ss:$48 sps:$4 sm:$0xff]   ;;  %v12711_v11 = vld [vmem:[%s18986_s1 + $0xc60] ss:$48 sps:$4 sm:$0xff]  }
  0x4b   :  { %2694 = vmatpush1.bf16.msra.mxu0 %v12618_v12  ;;  %2823 = vmatpush1.bf16.msra.mxu1 %v12621_v13  ;;  %v12714_v12 = vld [vmem:[%s18986_s1 + $0xc68] ss:$48 sps:$4 sm:$0xff]   ;;  %v12719_v13 = vld [vmem:[%s18986_s1 + $0xcc4] ss:$48 sps:$4 sm:$0xff]  }
  0x4c   :  { %2695 = vmatprep.subr.bf16.mxu0 %v12626_v14  ;;  %2824 = vmatprep.subr.bf16.mxu1 %v12629_v15  ;;  %v12722_v14 = vld [vmem:[%s18986_s1 + $0xccc] ss:$48 sps:$4 sm:$0xff]   ;;  %v14625_v15 = vmov 0  }
  0x4f   :  { %2696 = vmatpush1.bf16.msra.mxu0 %v12624_v16  ;;  %2825 = vmatpush1.bf16.msra.mxu1 %v12627_v17  ;;  %v12717_v16 = vld [vmem:[%s18986_s1 + $0xcc0] ss:$48 sps:$4 sm:$0xff]   ;;  %v12720_v17 = vld [vmem:[%s18986_s1 + $0xcc8] ss:$48 sps:$4 sm:$0xff]  }
  0x50   :  { %2697 = vmatprep.subr.bf16.mxu0 %v12632_v18  ;;  %2826 = vmatprep.subr.bf16.mxu1 %v12635_v19  ;;  %v12725_v18 = vld [vmem:[%s18986_s1 + $0xd24] ss:$48 sps:$4 sm:$0xff]   ;;  %v12728_v19 = vld [vmem:[%s18986_s1 + $0xd2c] ss:$48 sps:$4 sm:$0xff]  }
  0x53   :  { %2698 = vmatpush1.bf16.msra.mxu0 %v12630_v20  ;;  %2827 = vmatpush1.bf16.msra.mxu1 %v12633_v21  ;;  %v12723_v20 = vld [vmem:[%s18986_s1 + $0xd20] ss:$48 sps:$4 sm:$0xff]   ;;  %v12726_v21 = vld [vmem:[%s18986_s1 + $0xd28] ss:$48 sps:$4 sm:$0xff]  }
  0x54   :  { %2699 = vmatprep.subr.bf16.mxu0 %v12638_v22  ;;  %2828 = vmatprep.subr.bf16.mxu1 %v12641_v23  ;;  %v12732_v22 = vld [vmem:[%s18986_s1 + $0x14] ss:$48 sps:$4 sm:$0xff]   ;;  %v12735_v23 = vld [vmem:[%s18986_s1 + $0x1c] ss:$48 sps:$4 sm:$0xff]  }
  0x57   :  { %2700 = vmatpush1.bf16.msra.mxu0 %v12636_v24  ;;  %2829 = vmatpush1.bf16.msra.mxu1 %v12639_v25  ;;  %v12729_v24 = vld [vmem:[%s18985_s0 + $0x10] ss:$20 sps:$4 sm:$0xff]  }
  0x58   :  { %2701 = vmatprep.subr.bf16.mxu0 %v12644_v26  ;;  %2830 = vmatprep.subr.bf16.mxu1 %v12647_v27  ;;  %v12730_v25 = vld [vmem:[%s18986_s1 + $0x10] ss:$48 sps:$4 sm:$0xff]   ;;  %v12733_v26 = vld [vmem:[%s18986_s1 + $0x18] ss:$48 sps:$4 sm:$0xff]   ;;  %v12738_v27 = vld [vmem:[%s18986_s1 + $0x74] ss:$48 sps:$4 sm:$0xff]  }
  0x5b   :  { %2702 = vmatpush1.bf16.msra.mxu0 %v12642_v28  ;;  %2831 = vmatpush1.bf16.msra.mxu1 %v12645_v30  ;;  %v12741_v28 = vld [vmem:[%s18986_s1 + $0x7c] ss:$48 sps:$4 sm:$0xff]   ;;  %v12736_v30 = vld [vmem:[%s18986_s1 + $0x70] ss:$48 sps:$4 sm:$0xff]  }
  0x5c   :  { %2703 = vmatprep.subr.bf16.mxu0 %v12650_v31  ;;  %2832 = vmatprep.subr.bf16.mxu1 %v12653_v32  ;;  %v12739_v31 = vld [vmem:[%s18986_s1 + $0x78] ss:$48 sps:$4 sm:$0xff]   ;;  %v12744_v32 = vld [vmem:[%s18986_s1 + $0xd4] ss:$48 sps:$4 sm:$0xff]  }
  0x5f   :  { %2704 = vmatpush1.bf16.msra.mxu0 %v12648_v33  ;;  %2833 = vmatpush1.bf16.msra.mxu1 %v12651_v34  ;;  %v12747_v33 = vld [vmem:[%s18986_s1 + $0xdc] ss:$48 sps:$4 sm:$0xff]   ;;  %v12742_v34 = vld [vmem:[%s18986_s1 + $0xd0] ss:$48 sps:$4 sm:$0xff]  }
  0x60   :  { %2705 = vmatprep.subr.bf16.mxu0 %v12656_v35  ;;  %2834 = vmatprep.subr.bf16.mxu1 %v12659_v36  ;;  %v12745_v35 = vld [vmem:[%s18986_s1 + $0xd8] ss:$48 sps:$4 sm:$0xff]   ;;  %v12750_v36 = vld [vmem:[%s18986_s1 + $0x134] ss:$48 sps:$4 sm:$0xff]  }
  0x63   :  { %2706 = vmatpush1.bf16.msra.mxu0 %v12654_v37  ;;  %2835 = vmatpush1.bf16.msra.mxu1 %v12657_v38  ;;  %v12748_v37 = vld [vmem:[%s18986_s1 + $0x130] ss:$48 sps:$4 sm:$0xff]   ;;  %v12751_v38 = vld [vmem:[%s18986_s1 + $0x138] ss:$48 sps:$4 sm:$0xff]  }
  0x64   :  { %2707 = vmatprep.subr.bf16.mxu0 %v12662_v39  ;;  %2836 = vmatprep.subr.bf16.mxu1 %v12665_v40  ;;  %v12756_v39 = vld [vmem:[%s18986_s1 + $0x194] ss:$48 sps:$4 sm:$0xff]   ;;  %v12759_v40 = vld [vmem:[%s18986_s1 + $0x19c] ss:$48 sps:$4 sm:$0xff]  }
  0x67   :  { %2708 = vmatpush1.bf16.msra.mxu0 %v12660_v41  ;;  %2837 = vmatpush1.bf16.msra.mxu1 %v12663_v42  ;;  %v12754_v41 = vld [vmem:[%s18986_s1 + $0x190] ss:$48 sps:$4 sm:$0xff]   ;;  %v12757_v42 = vld [vmem:[%s18986_s1 + $0x198] ss:$48 sps:$4 sm:$0xff]  }
  0x68   :  { %2709 = vmatprep.subr.bf16.mxu0 %v12668_v43  ;;  %2838 = vmatprep.subr.bf16.mxu1 %v12671_v44  ;;  %v12762_v43 = vld [vmem:[%s18986_s1 + $0x1f4] ss:$48 sps:$4 sm:$0xff]   ;;  %v12765_v44 = vld [vmem:[%s18986_s1 + $0x1fc] ss:$48 sps:$4 sm:$0xff]  }
  0x6b   :  { %2710 = vmatpush1.bf16.msra.mxu0 %v12666_v45  ;;  %2839 = vmatpush1.bf16.msra.mxu1 %v12669_v46  ;;  %v12760_v45 = vld [vmem:[%s18986_s1 + $0x1f0] ss:$48 sps:$4 sm:$0xff]   ;;  %v12763_v46 = vld [vmem:[%s18986_s1 + $0x1f8] ss:$48 sps:$4 sm:$0xff]  }
  0x6c   :  { %2711 = vmatprep.subr.bf16.mxu0 %v12674_v48  ;;  %2840 = vmatprep.subr.bf16.mxu1 %v12677_v49  ;;  %v12768_v48 = vld [vmem:[%s18986_s1 + $0x254] ss:$48 sps:$4 sm:$0xff]   ;;  %v12771_v49 = vld [vmem:[%s18986_s1 + $0x25c] ss:$48 sps:$4 sm:$0xff]  }
  0x6f   :  { %2712 = vmatpush1.bf16.msra.mxu0 %v12672_v50  ;;  %2841 = vmatpush1.bf16.msra.mxu1 %v12675_v51  ;;  %v12766_v50 = vld [vmem:[%s18986_s1 + $0x250] ss:$48 sps:$4 sm:$0xff]   ;;  %v12769_v51 = vld [vmem:[%s18986_s1 + $0x258] ss:$48 sps:$4 sm:$0xff]  }
  0x70   :  { %2713 = vmatprep.subr.bf16.mxu0 %v12680_v52  ;;  %2842 = vmatprep.subr.bf16.mxu1 %v12683_v53  ;;  %v12774_v52 = vld [vmem:[%s18986_s1 + $0x2b4] ss:$48 sps:$4 sm:$0xff]   ;;  %v12777_v53 = vld [vmem:[%s18986_s1 + $0x2bc] ss:$48 sps:$4 sm:$0xff]  }
  0x73   :  { %2714 = vmatpush1.bf16.msra.mxu0 %v12678_v54  ;;  %2843 = vmatpush1.bf16.msra.mxu1 %v12681_v55  ;;  %v12772_v54 = vld [vmem:[%s18986_s1 + $0x2b0] ss:$48 sps:$4 sm:$0xff]   ;;  %v12775_v55 = vld [vmem:[%s18986_s1 + $0x2b8] ss:$48 sps:$4 sm:$0xff]  }
  0x74   :  { %2715 = vmatprep.subr.bf16.mxu0 %v12686_v56  ;;  %2844 = vmatprep.subr.bf16.mxu1 %v12689_v57  ;;  %v12780_v56 = vld [vmem:[%s18986_s1 + $0x314] ss:$48 sps:$4 sm:$0xff]   ;;  %v12783_v57 = vld [vmem:[%s18986_s1 + $0x31c] ss:$48 sps:$4 sm:$0xff]  }
  0x77   :  { %2716 = vmatpush1.bf16.msra.mxu0 %v12684_v58  ;;  %2845 = vmatpush1.bf16.msra.mxu1 %v12687_v59  ;;  %v12778_v58 = vld [vmem:[%s18986_s1 + $0x310] ss:$48 sps:$4 sm:$0xff]   ;;  %v12781_v59 = vld [vmem:[%s18986_s1 + $0x318] ss:$48 sps:$4 sm:$0xff]  }
  0x78   :  { %2717 = vmatprep.subr.bf16.mxu0 %v12692_v60  ;;  %2846 = vmatprep.subr.bf16.mxu1 %v12695_v61  ;;  %v12786_v60 = vld [vmem:[%s18986_s1 + $0x374] ss:$48 sps:$4 sm:$0xff]   ;;  %v12789_v61 = vld [vmem:[%s18986_s1 + $0x37c] ss:$48 sps:$4 sm:$0xff]  }
  0x7b   :  { %2718 = vmatpush1.bf16.msra.mxu0 %v12690_v62  ;;  %2847 = vmatpush1.bf16.msra.mxu1 %v12693_v63  ;;  %v12784_v62 = vld [vmem:[%s18986_s1 + $0x370] ss:$48 sps:$4 sm:$0xff]   ;;  %v12787_v63 = vld [vmem:[%s18986_s1 + $0x378] ss:$48 sps:$4 sm:$0xff]  }
  0x7c   :  { %2719 = vmatprep.subr.bf16.mxu0 %v12698_v0  ;;  %2848 = vmatprep.subr.bf16.mxu1 %v12701_v1  ;;  %v12792_v0 = vld [vmem:[%s18986_s1 + $0x3d4] ss:$48 sps:$4 sm:$0xff]   ;;  %v12795_v1 = vld [vmem:[%s18986_s1 + $0x3dc] ss:$48 sps:$4 sm:$0xff]  }
  0x7f   :  { %2720 = vmatpush1.bf16.msra.mxu0 %v12696_v2  ;;  %2849 = vmatpush1.bf16.msra.mxu1 %v12699_v3  ;;  %v12790_v2 = vld [vmem:[%s18986_s1 + $0x3d0] ss:$48 sps:$4 sm:$0xff]   ;;  %v12793_v3 = vld [vmem:[%s18986_s1 + $0x3d8] ss:$48 sps:$4 sm:$0xff]  }
  0x80   :  { %2732 = vmatprep.subr.bf16.mxu0 %v12706_v4  ;;  %2861 = vmatprep.subr.bf16.mxu1 %v12709_v5  ;;  %v12798_v4 = vld [vmem:[%s18986_s1 + $0x434] ss:$48 sps:$4 sm:$0xff]   ;;  %v12801_v5 = vld [vmem:[%s18986_s1 + $0x43c] ss:$48 sps:$4 sm:$0xff]  }
  0x82   :  { %2722 = vmatmul.mubr.bf16.vlgmr.msra.gmra.mrb[0].mxu0 %v12710_v7  ;;  %2851 = vmatmul.mubr.bf16.vlgmr.msra.gmra.mrb[0].mxu1 %v12710_v7  ;;  %v12799_v7 = vld [vmem:[%s18986_s1 + $0x438] ss:$48 sps:$4 sm:$0xff]  }
  0x83   :  { %2733 = vmatpush1.bf16.msra.mxu0 %v12704_v6  ;;  %2862 = vmatpush1.bf16.msra.mxu1 %v12707_v8  ;;  %v12796_v6 = vld [vmem:[%s18986_s1 + $0x430] ss:$48 sps:$4 sm:$0xff]   ;;  %v12804_v8 = vld [vmem:[%s18986_s1 + $0x494] ss:$48 sps:$4 sm:$0xff]  }
  0x84   :  { %2734 = vmatprep.subr.bf16.mxu0 %v12713_v9  ;;  %2863 = vmatprep.subr.bf16.mxu1 %v12716_v10  ;;  %v12807_v9 = vld [vmem:[%s18986_s1 + $0x49c] ss:$48 sps:$4 sm:$0xff]   ;;  %v12802_v10 = vld [vmem:[%s18986_s1 + $0x490] ss:$48 sps:$4 sm:$0xff]  }
  0x85   :  { %2764 = vmatprep.mubr.bf16.mxu0 %v14625_v15  ;;  %2893 = vmatprep.mubr.bf16.mxu1 %v14625_v15 }
  0x87   :  { %2735 = vmatpush1.bf16.msra.mxu0 %v12711_v11  ;;  %2864 = vmatpush1.bf16.msra.mxu1 %v12714_v12  ;;  %v12805_v11 = vld [vmem:[%s18986_s1 + $0x498] ss:$48 sps:$4 sm:$0xff]   ;;  %v12810_v12 = vld [vmem:[%s18986_s1 + $0x4f4] ss:$48 sps:$4 sm:$0xff]  }
  0x88   :  { %2736 = vmatprep.subr.bf16.mxu0 %v12719_v13  ;;  %2865 = vmatprep.subr.bf16.mxu1 %v12722_v14  ;;  %v12813_v13 = vld [vmem:[%s18986_s1 + $0x4fc] ss:$48 sps:$4 sm:$0xff]   ;;  %v12808_v14 = vld [vmem:[%s18986_s1 + $0x4f0] ss:$48 sps:$4 sm:$0xff]  }
  0x8b   :  { %2737 = vmatpush1.bf16.msra.mxu0 %v12717_v16  ;;  %2866 = vmatpush1.bf16.msra.mxu1 %v12720_v17  ;;  %v12811_v16 = vld [vmem:[%s18986_s1 + $0x4f8] ss:$48 sps:$4 sm:$0xff]   ;;  %v12816_v17 = vld [vmem:[%s18986_s1 + $0x554] ss:$48 sps:$4 sm:$0xff]  }
  0x8c   :  { %2738 = vmatprep.subr.bf16.mxu0 %v12725_v18  ;;  %2867 = vmatprep.subr.bf16.mxu1 %v12728_v19  ;;  %v12819_v18 = vld [vmem:[%s18986_s1 + $0x55c] ss:$48 sps:$4 sm:$0xff]   ;;  %v12814_v19 = vld [vmem:[%s18986_s1 + $0x550] ss:$48 sps:$4 sm:$0xff]  }
  0x8f   :  { %2739 = vmatpush1.bf16.msra.mxu0 %v12723_v20  ;;  %2868 = vmatpush1.bf16.msra.mxu1 %v12726_v21  ;;  %v12817_v20 = vld [vmem:[%s18986_s1 + $0x558] ss:$48 sps:$4 sm:$0xff]   ;;  %v12822_v21 = vld [vmem:[%s18986_s1 + $0x5b4] ss:$48 sps:$4 sm:$0xff]  }
  0x90   :  { %2904 = vmatprep.subr.bf16.mxu0 %v12732_v22  ;;  %3033 = vmatprep.subr.bf16.mxu1 %v12735_v23  ;;  %v12825_v22 = vld [vmem:[%s18986_s1 + $0x5bc] ss:$48 sps:$4 sm:$0xff]   ;;  %v12820_v23 = vld [vmem:[%s18986_s1 + $0x5b0] ss:$48 sps:$4 sm:$0xff]  }
  0x92   :  { %11287 = vmatmul.mubr.msk.bf16.vlgmr.msra.gmra.mrb[0].mxu0 %vm2642_vm0, %v12729_v24  ;;  %11288 = vmatmul.mubr.msk.bf16.vlgmr.msra.gmra.mrb[0].mxu1 %vm2642_vm0, %v12729_v24  ;;  %v12823_v24 = vld [vmem:[%s18986_s1 + $0x5b8] ss:$48 sps:$4 sm:$0xff]  }
  0x93   :  { %2905 = vmatpush1.bf16.msra.mxu0 %v12730_v25  ;;  %3034 = vmatpush1.bf16.msra.mxu1 %v12733_v26  ;;  %v12828_v25 = vld [vmem:[%s18986_s1 + $0x614] ss:$48 sps:$4 sm:$0xff]   ;;  %v12831_v26 = vld [vmem:[%s18986_s1 + $0x61c] ss:$48 sps:$4 sm:$0xff]  }
  0x94   :  { %2906 = vmatprep.subr.bf16.mxu0 %v12738_v27  ;;  %3035 = vmatprep.subr.bf16.mxu1 %v12741_v28  ;;  %v12826_v27 = vld [vmem:[%s18986_s1 + $0x610] ss:$48 sps:$4 sm:$0xff]   ;;  %v12829_v28 = vld [vmem:[%s18986_s1 + $0x618] ss:$48 sps:$4 sm:$0xff]  }
  0x95   :  { %2936 = vmatprep.mubr.bf16.mxu0 %v14798_v47  ;;  %3065 = vmatprep.mubr.bf16.mxu1 %v14798_v47  ;;  %v12753_v47 = vld [vmem:[%s18986_s1 + $0x13c] ss:$48 sps:$4 sm:$0xff]  }
  0x97   :  { %2907 = vmatpush1.bf16.msra.mxu0 %v12736_v30  ;;  %3036 = vmatpush1.bf16.msra.mxu1 %v12739_v31  ;;  %v12834_v30 = vld [vmem:[%s18986_s1 + $0x674] ss:$48 sps:$4 sm:$0xff]   ;;  %v12837_v31 = vld [vmem:[%s18986_s1 + $0x67c] ss:$48 sps:$4 sm:$0xff]  }
  0x98   :  { %2908 = vmatprep.subr.bf16.mxu0 %v12744_v32  ;;  %3037 = vmatprep.subr.bf16.mxu1 %v12747_v33  ;;  %v14578_v32 = vld [vmem:[%s18985_s0] ss:$20 sps:$4 sm:$0xff]  }
  0x99   :  { %v12832_v33 = vld [vmem:[%s18986_s1 + $0x670] ss:$48 sps:$4 sm:$0xff]  }
  0x9b   :  { %2909 = vmatpush1.bf16.msra.mxu0 %v12742_v34  ;;  %3038 = vmatpush1.bf16.msra.mxu1 %v12745_v35  ;;  %v12835_v34 = vld [vmem:[%s18986_s1 + $0x678] ss:$48 sps:$4 sm:$0xff]   ;;  %v12840_v35 = vld [vmem:[%s18986_s1 + $0x6d4] ss:$48 sps:$4 sm:$0xff]  }
  0x9c   :  { %2910 = vmatprep.subr.bf16.mxu0 %v12750_v36  ;;  %3039 = vmatprep.subr.bf16.mxu1 %v12753_v47  ;;  %v12843_v36 = vld [vmem:[%s18986_s1 + $0x6dc] ss:$48 sps:$4 sm:$0xff]   ;;  %v12838_v47 = vld [vmem:[%s18986_s1 + $0x6d0] ss:$48 sps:$4 sm:$0xff]  }
  0x9f   :  { %2911 = vmatpush1.bf16.msra.mxu0 %v12748_v37  ;;  %3040 = vmatpush1.bf16.msra.mxu1 %v12751_v38  ;;  %v12841_v37 = vld [vmem:[%s18986_s1 + $0x6d8] ss:$48 sps:$4 sm:$0xff]   ;;  %v12846_v38 = vld [vmem:[%s18986_s1 + $0x734] ss:$48 sps:$4 sm:$0xff]  }
  0xa0   :  { %2912 = vmatprep.subr.bf16.mxu0 %v12756_v39  ;;  %3041 = vmatprep.subr.bf16.mxu1 %v12759_v40  ;;  %v12844_v39 = vld [vmem:[%s18986_s1 + $0x730] ss:$48 sps:$4 sm:$0xff]   ;;  %v12847_v40 = vld [vmem:[%s18986_s1 + $0x738] ss:$48 sps:$4 sm:$0xff]  }
  0xa3   :  { %2913 = vmatpush1.bf16.msra.mxu0 %v12754_v41  ;;  %3042 = vmatpush1.bf16.msra.mxu1 %v12757_v42  ;;  %v12852_v41 = vld [vmem:[%s18986_s1 + $0x794] ss:$48 sps:$4 sm:$0xff]   ;;  %v12855_v42 = vld [vmem:[%s18986_s1 + $0x79c] ss:$48 sps:$4 sm:$0xff]  }
  0xa4   :  { %2914 = vmatprep.subr.bf16.mxu0 %v12762_v43  ;;  %3043 = vmatprep.subr.bf16.mxu1 %v12765_v44  ;;  %v12850_v43 = vld [vmem:[%s18986_s1 + $0x790] ss:$48 sps:$4 sm:$0xff]   ;;  %v12853_v44 = vld [vmem:[%s18986_s1 + $0x798] ss:$48 sps:$4 sm:$0xff]  }
  0xa7   :  { %2915 = vmatpush1.bf16.msra.mxu0 %v12760_v45  ;;  %3044 = vmatpush1.bf16.msra.mxu1 %v12763_v46  ;;  %v12858_v45 = vld [vmem:[%s18986_s1 + $0x7f4] ss:$48 sps:$4 sm:$0xff]   ;;  %v12861_v46 = vld [vmem:[%s18986_s1 + $0x7fc] ss:$48 sps:$4 sm:$0xff]  }
  0xa8   :  { %2916 = vmatprep.subr.bf16.mxu0 %v12768_v48  ;;  %3045 = vmatprep.subr.bf16.mxu1 %v12771_v49  ;;  %v12856_v48 = vld [vmem:[%s18986_s1 + $0x7f0] ss:$48 sps:$4 sm:$0xff]   ;;  %v12859_v49 = vld [vmem:[%s18986_s1 + $0x7f8] ss:$48 sps:$4 sm:$0xff]  }
  0xab   :  { %2917 = vmatpush1.bf16.msra.mxu0 %v12766_v50  ;;  %3046 = vmatpush1.bf16.msra.mxu1 %v12769_v51  ;;  %v12864_v50 = vld [vmem:[%s18986_s1 + $0x854] ss:$48 sps:$4 sm:$0xff]   ;;  %v12867_v51 = vld [vmem:[%s18986_s1 + $0x85c] ss:$48 sps:$4 sm:$0xff]  }
  0xac   :  { %2918 = vmatprep.subr.bf16.mxu0 %v12774_v52  ;;  %3047 = vmatprep.subr.bf16.mxu1 %v12777_v53  ;;  %v12862_v52 = vld [vmem:[%s18986_s1 + $0x850] ss:$48 sps:$4 sm:$0xff]   ;;  %v12865_v53 = vld [vmem:[%s18986_s1 + $0x858] ss:$48 sps:$4 sm:$0xff]  }
  0xaf   :  { %2919 = vmatpush1.bf16.msra.mxu0 %v12772_v54  ;;  %3048 = vmatpush1.bf16.msra.mxu1 %v12775_v55  ;;  %v12870_v54 = vld [vmem:[%s18986_s1 + $0x8b4] ss:$48 sps:$4 sm:$0xff]   ;;  %v12873_v55 = vld [vmem:[%s18986_s1 + $0x8bc] ss:$48 sps:$4 sm:$0xff]  }
  0xb0   :  { %2920 = vmatprep.subr.bf16.mxu0 %v12780_v56  ;;  %3049 = vmatprep.subr.bf16.mxu1 %v12783_v57  ;;  %v12868_v56 = vld [vmem:[%s18986_s1 + $0x8b0] ss:$48 sps:$4 sm:$0xff]   ;;  %v12871_v57 = vld [vmem:[%s18986_s1 + $0x8b8] ss:$48 sps:$4 sm:$0xff]  }
  0xb3   :  { %2921 = vmatpush1.bf16.msra.mxu0 %v12778_v58  ;;  %3050 = vmatpush1.bf16.msra.mxu1 %v12781_v59  ;;  %v12876_v58 = vld [vmem:[%s18986_s1 + $0x914] ss:$48 sps:$4 sm:$0xff]   ;;  %v12879_v59 = vld [vmem:[%s18986_s1 + $0x91c] ss:$48 sps:$4 sm:$0xff]  }
  0xb4   :  { %2922 = vmatprep.subr.bf16.mxu0 %v12786_v60  ;;  %3051 = vmatprep.subr.bf16.mxu1 %v12789_v61  ;;  %v12874_v60 = vld [vmem:[%s18986_s1 + $0x910] ss:$48 sps:$4 sm:$0xff]   ;;  %v12877_v61 = vld [vmem:[%s18986_s1 + $0x918] ss:$48 sps:$4 sm:$0xff]  }
  0xb7   :  { %2923 = vmatpush1.bf16.msra.mxu0 %v12784_v62  ;;  %3052 = vmatpush1.bf16.msra.mxu1 %v12787_v63  ;;  %v12882_v62 = vld [vmem:[%s18986_s1 + $0x974] ss:$48 sps:$4 sm:$0xff]   ;;  %v12885_v63 = vld [vmem:[%s18986_s1 + $0x97c] ss:$48 sps:$4 sm:$0xff]  }
  0xb8   :  { %2924 = vmatprep.subr.bf16.mxu0 %v12792_v0  ;;  %3053 = vmatprep.subr.bf16.mxu1 %v12795_v1  ;;  %v12880_v0 = vld [vmem:[%s18986_s1 + $0x970] ss:$48 sps:$4 sm:$0xff]   ;;  %v12883_v1 = vld [vmem:[%s18986_s1 + $0x978] ss:$48 sps:$4 sm:$0xff]  }
  0xbb   :  { %2925 = vmatpush1.bf16.msra.mxu0 %v12790_v2  ;;  %3054 = vmatpush1.bf16.msra.mxu1 %v12793_v3  ;;  %v12888_v2 = vld [vmem:[%s18986_s1 + $0x9d4] ss:$48 sps:$4 sm:$0xff]   ;;  %v12891_v3 = vld [vmem:[%s18986_s1 + $0x9dc] ss:$48 sps:$4 sm:$0xff]  }
  0xbc   :  { %2926 = vmatprep.subr.bf16.mxu0 %v12798_v4  ;;  %3055 = vmatprep.subr.bf16.mxu1 %v12801_v5  ;;  %v12886_v4 = vld [vmem:[%s18986_s1 + $0x9d0] ss:$48 sps:$4 sm:$0xff]   ;;  %v12889_v5 = vld [vmem:[%s18986_s1 + $0x9d8] ss:$48 sps:$4 sm:$0xff]  }
  0xbf   :  { %2927 = vmatpush1.bf16.msra.mxu0 %v12796_v6  ;;  %3056 = vmatpush1.bf16.msra.mxu1 %v12799_v7  ;;  %v12894_v6 = vld [vmem:[%s18986_s1 + $0xa34] ss:$48 sps:$4 sm:$0xff]   ;;  %v12897_v7 = vld [vmem:[%s18986_s1 + $0xa3c] ss:$48 sps:$4 sm:$0xff]  }
  0xc0   :  { %2928 = vmatprep.subr.bf16.mxu0 %v12804_v8  ;;  %3057 = vmatprep.subr.bf16.mxu1 %v12807_v9  ;;  %v12892_v8 = vld [vmem:[%s18986_s1 + $0xa30] ss:$48 sps:$4 sm:$0xff]   ;;  %v12895_v9 = vld [vmem:[%s18986_s1 + $0xa38] ss:$48 sps:$4 sm:$0xff]  }
  0xc3   :  { %2929 = vmatpush1.bf16.msra.mxu0 %v12802_v10  ;;  %3058 = vmatpush1.bf16.msra.mxu1 %v12805_v11  ;;  %v12900_v10 = vld [vmem:[%s18986_s1 + $0xa94] ss:$48 sps:$4 sm:$0xff]   ;;  %v12903_v11 = vld [vmem:[%s18986_s1 + $0xa9c] ss:$48 sps:$4 sm:$0xff]  }
  0xc4   :  { %2930 = vmatprep.subr.bf16.mxu0 %v12810_v12  ;;  %3059 = vmatprep.subr.bf16.mxu1 %v12813_v13  ;;  %v12898_v12 = vld [vmem:[%s18986_s1 + $0xa90] ss:$48 sps:$4 sm:$0xff]   ;;  %v12901_v13 = vld [vmem:[%s18986_s1 + $0xa98] ss:$48 sps:$4 sm:$0xff]  }
  0xc7   :  { %2931 = vmatpush1.bf16.msra.mxu0 %v12808_v14  ;;  %3060 = vmatpush1.bf16.msra.mxu1 %v12811_v16  ;;  %v12906_v14 = vld [vmem:[%s18986_s1 + $0xaf4] ss:$48 sps:$4 sm:$0xff]   ;;  %v12909_v16 = vld [vmem:[%s18986_s1 + $0xafc] ss:$48 sps:$4 sm:$0xff]  }
  0xc8   :  { %2932 = vmatprep.subr.bf16.mxu0 %v12816_v17  ;;  %3061 = vmatprep.subr.bf16.mxu1 %v12819_v18  ;;  %v12904_v17 = vld [vmem:[%s18986_s1 + $0xaf0] ss:$48 sps:$4 sm:$0xff]   ;;  %v12907_v18 = vld [vmem:[%s18986_s1 + $0xaf8] ss:$48 sps:$4 sm:$0xff]  }
  0xcb   :  { %2933 = vmatpush1.bf16.msra.mxu0 %v12814_v19  ;;  %3062 = vmatpush1.bf16.msra.mxu1 %v12817_v20  ;;  %v12912_v19 = vld [vmem:[%s18986_s1 + $0xb54] ss:$48 sps:$4 sm:$0xff]   ;;  %v12915_v20 = vld [vmem:[%s18986_s1 + $0xb5c] ss:$48 sps:$4 sm:$0xff]  }
  0xcc   :  { %2934 = vmatprep.subr.bf16.mxu0 %v12822_v21  ;;  %3063 = vmatprep.subr.bf16.mxu1 %v12825_v22  ;;  %v12910_v21 = vld [vmem:[%s18986_s1 + $0xb50] ss:$48 sps:$4 sm:$0xff]   ;;  %v12913_v22 = vld [vmem:[%s18986_s1 + $0xb58] ss:$48 sps:$4 sm:$0xff]  }
  0xcf   :  { %2935 = vmatpush1.bf16.msra.mxu0 %v12820_v23  ;;  %3064 = vmatpush1.bf16.msra.mxu1 %v12823_v24  ;;  %v12918_v23 = vld [vmem:[%s18986_s1 + $0xbb4] ss:$48 sps:$4 sm:$0xff]   ;;  %v12921_v24 = vld [vmem:[%s18986_s1 + $0xbbc] ss:$48 sps:$4 sm:$0xff]  }
  0xd0   :  { %2947 = vmatprep.subr.bf16.mxu0 %v12828_v25  ;;  %3076 = vmatprep.subr.bf16.mxu1 %v12831_v26  ;;  %v12916_v25 = vld [vmem:[%s18986_s1 + $0xbb0] ss:$48 sps:$4 sm:$0xff]   ;;  %v12919_v26 = vld [vmem:[%s18986_s1 + $0xbb8] ss:$48 sps:$4 sm:$0xff]  }
  0xd2   :  { %2937 = vmatmul.mubr.bf16.vlgmr.msra.gmra.mrb[4].mxu0 %v14578_v32  ;;  %3066 = vmatmul.mubr.bf16.vlgmr.msra.gmra.mrb[4].mxu1 %v14578_v32  ;;  %v12930_v32 = vld [vmem:[%s18986_s1 + $0xc74] ss:$48 sps:$4 sm:$0xff]  }
  0xd3   :  { %2948 = vmatpush1.bf16.msra.mxu0 %v12826_v27  ;;  %3077 = vmatpush1.bf16.msra.mxu1 %v12829_v28  ;;  %v12924_v27 = vld [vmem:[%s18986_s1 + $0xc14] ss:$48 sps:$4 sm:$0xff]   ;;  %v12927_v28 = vld [vmem:[%s18986_s1 + $0xc1c] ss:$48 sps:$4 sm:$0xff]  }
  0xd4   :  { %2949 = vmatprep.subr.bf16.mxu0 %v12834_v30  ;;  %3078 = vmatprep.subr.bf16.mxu1 %v12837_v31  ;;  %v12922_v30 = vld [vmem:[%s18986_s1 + $0xc10] ss:$48 sps:$4 sm:$0xff]   ;;  %v12925_v31 = vld [vmem:[%s18986_s1 + $0xc18] ss:$48 sps:$4 sm:$0xff]  }
  0xd5   :  { %2979 = vmatprep.mubr.bf16.mxu0 %v14940_v29  ;;  %3108 = vmatprep.mubr.bf16.mxu1 %v14940_v29  ;;  %v12849_v29 = vld [vmem:[%s18986_s1 + $0x73c] ss:$48 sps:$4 sm:$0xff]  }
  0xd7   :  { %2950 = vmatpush1.bf16.msra.mxu0 %v12832_v33  ;;  %3079 = vmatpush1.bf16.msra.mxu1 %v12835_v34  ;;  %v12933_v33 = vld [vmem:[%s18986_s1 + $0xc7c] ss:$48 sps:$4 sm:$0xff]  }
  0xd8   :  { %2951 = vmatprep.subr.bf16.mxu0 %v12840_v35  ;;  %3080 = vmatprep.subr.bf16.mxu1 %v12843_v36  ;;  %v14579_v34 = vld [vmem:[%s18985_s0 + $0x8] ss:$20 sps:$4 sm:$0xff]   ;;  %v12928_v35 = vld [vmem:[%s18986_s1 + $0xc70] ss:$48 sps:$4 sm:$0xff]  }
  0xd9   :  { %v12931_v36 = vld [vmem:[%s18986_s1 + $0xc78] ss:$48 sps:$4 sm:$0xff]  }
  0xdb   :  { %2952 = vmatpush1.bf16.msra.mxu0 %v12838_v47  ;;  %3081 = vmatpush1.bf16.msra.mxu1 %v12841_v37  ;;  %v12936_v47 = vld [vmem:[%s18986_s1 + $0xcd4] ss:$48 sps:$4 sm:$0xff]   ;;  %v12939_v37 = vld [vmem:[%s18986_s1 + $0xcdc] ss:$48 sps:$4 sm:$0xff]  }
  0xdc   :  { %2953 = vmatprep.subr.bf16.mxu0 %v12846_v38  ;;  %3082 = vmatprep.subr.bf16.mxu1 %v12849_v29  ;;  %v12934_v38 = vld [vmem:[%s18986_s1 + $0xcd0] ss:$48 sps:$4 sm:$0xff]   ;;  %v12937_v29 = vld [vmem:[%s18986_s1 + $0xcd8] ss:$48 sps:$4 sm:$0xff]  }
  0xdf   :  { %2954 = vmatpush1.bf16.msra.mxu0 %v12844_v39  ;;  %3083 = vmatpush1.bf16.msra.mxu1 %v12847_v40  ;;  %v12942_v39 = vld [vmem:[%s18986_s1 + $0xd34] ss:$48 sps:$4 sm:$0xff]   ;;  %v12945_v40 = vld [vmem:[%s18986_s1 + $0xd3c] ss:$48 sps:$4 sm:$0xff]  }
  0xe0   :  { %2955 = vmatprep.subr.bf16.mxu0 %v12852_v41  ;;  %3084 = vmatprep.subr.bf16.mxu1 %v12855_v42  ;;  %v12940_v41 = vld [vmem:[%s18986_s1 + $0xd30] ss:$48 sps:$4 sm:$0xff]   ;;  %v12943_v42 = vld [vmem:[%s18986_s1 + $0xd38] ss:$48 sps:$4 sm:$0xff]  }
  0xe3   :  { %2956 = vmatpush1.bf16.msra.mxu0 %v12850_v43  ;;  %3085 = vmatpush1.bf16.msra.mxu1 %v12853_v44  ;;  %v12948_v43 = vld [vmem:[%s18986_s1 + $0x24] ss:$48 sps:$4 sm:$0xff]   ;;  %v12951_v44 = vld [vmem:[%s18986_s1 + $0x2c] ss:$48 sps:$4 sm:$0xff]  }
  0xe4   :  { %2957 = vmatprep.subr.bf16.mxu0 %v12858_v45  ;;  %3086 = vmatprep.subr.bf16.mxu1 %v12861_v46  ;;  %v12946_v45 = vld [vmem:[%s18986_s1 + $0x20] ss:$48 sps:$4 sm:$0xff]   ;;  %v12949_v46 = vld [vmem:[%s18986_s1 + $0x28] ss:$48 sps:$4 sm:$0xff]  }
  0xe7   :  { %2958 = vmatpush1.bf16.msra.mxu0 %v12856_v48  ;;  %3087 = vmatpush1.bf16.msra.mxu1 %v12859_v49  ;;  %v12954_v48 = vld [vmem:[%s18986_s1 + $0x84] ss:$48 sps:$4 sm:$0xff]   ;;  %v12957_v49 = vld [vmem:[%s18986_s1 + $0x8c] ss:$48 sps:$4 sm:$0xff]  }
  0xe8   :  { %2959 = vmatprep.subr.bf16.mxu0 %v12864_v50  ;;  %3088 = vmatprep.subr.bf16.mxu1 %v12867_v51  ;;  %v14580_v50 = vld [vmem:[%s18985_s0 + $0x10] ss:$20 sps:$4 sm:$0xff]  }
  0xe9   :  { %v12952_v51 = vld [vmem:[%s18986_s1 + $0x80] ss:$48 sps:$4 sm:$0xff]  }
  0xeb   :  { %2960 = vmatpush1.bf16.msra.mxu0 %v12862_v52  ;;  %3089 = vmatpush1.bf16.msra.mxu1 %v12865_v53  ;;  %v12955_v52 = vld [vmem:[%s18986_s1 + $0x88] ss:$48 sps:$4 sm:$0xff]   ;;  %v12960_v53 = vld [vmem:[%s18986_s1 + $0xe4] ss:$48 sps:$4 sm:$0xff]  }
  0xec   :  { %2961 = vmatprep.subr.bf16.mxu0 %v12870_v54  ;;  %3090 = vmatprep.subr.bf16.mxu1 %v12873_v55  ;;  %v12963_v54 = vld [vmem:[%s18986_s1 + $0xec] ss:$48 sps:$4 sm:$0xff]   ;;  %v14581_v55 = vld [vmem:[%s18985_s0 + $0x4] ss:$20 sps:$4 sm:$0xff]  }
  0xef   :  { %2962 = vmatpush1.bf16.msra.mxu0 %v12868_v56  ;;  %3091 = vmatpush1.bf16.msra.mxu1 %v12871_v57  ;;  %v12958_v56 = vld [vmem:[%s18986_s1 + $0xe0] ss:$48 sps:$4 sm:$0xff]   ;;  %v12961_v57 = vld [vmem:[%s18986_s1 + $0xe8] ss:$48 sps:$4 sm:$0xff]  }
  0xf0   :  { %2963 = vmatprep.subr.bf16.mxu0 %v12876_v58  ;;  %3092 = vmatprep.subr.bf16.mxu1 %v12879_v59  ;;  %v12966_v58 = vld [vmem:[%s18986_s1 + $0x144] ss:$48 sps:$4 sm:$0xff]   ;;  %v12969_v59 = vld [vmem:[%s18986_s1 + $0x14c] ss:$48 sps:$4 sm:$0xff]  }
  0xf3   :  { %2964 = vmatpush1.bf16.msra.mxu0 %v12874_v60  ;;  %3093 = vmatpush1.bf16.msra.mxu1 %v12877_v61  ;;  %v12964_v60 = vld [vmem:[%s18986_s1 + $0x140] ss:$48 sps:$4 sm:$0xff]   ;;  %v12967_v61 = vld [vmem:[%s18986_s1 + $0x148] ss:$48 sps:$4 sm:$0xff]  }
  0xf4   :  { %2965 = vmatprep.subr.bf16.mxu0 %v12882_v62  ;;  %3094 = vmatprep.subr.bf16.mxu1 %v12885_v63  ;;  %v12972_v62 = vld [vmem:[%s18986_s1 + $0x1a4] ss:$48 sps:$4 sm:$0xff]   ;;  %v12975_v63 = vld [vmem:[%s18986_s1 + $0x1ac] ss:$48 sps:$4 sm:$0xff]  }
  0xf7   :  { %2966 = vmatpush1.bf16.msra.mxu0 %v12880_v0  ;;  %3095 = vmatpush1.bf16.msra.mxu1 %v12883_v1  ;;  %v12970_v0 = vld [vmem:[%s18986_s1 + $0x1a0] ss:$48 sps:$4 sm:$0xff]   ;;  %v12973_v1 = vld [vmem:[%s18986_s1 + $0x1a8] ss:$48 sps:$4 sm:$0xff]  }
  0xf8   :  { %2967 = vmatprep.subr.bf16.mxu0 %v12888_v2  ;;  %3096 = vmatprep.subr.bf16.mxu1 %v12891_v3  ;;  %v12978_v2 = vld [vmem:[%s18986_s1 + $0x204] ss:$48 sps:$4 sm:$0xff]   ;;  %v12981_v3 = vld [vmem:[%s18986_s1 + $0x20c] ss:$48 sps:$4 sm:$0xff]  }
  0xfb   :  { %2968 = vmatpush1.bf16.msra.mxu0 %v12886_v4  ;;  %3097 = vmatpush1.bf16.msra.mxu1 %v12889_v5  ;;  %v12976_v4 = vld [vmem:[%s18986_s1 + $0x200] ss:$48 sps:$4 sm:$0xff]   ;;  %v12979_v5 = vld [vmem:[%s18986_s1 + $0x208] ss:$48 sps:$4 sm:$0xff]  }
  0xfc   :  { %2969 = vmatprep.subr.bf16.mxu0 %v12894_v6  ;;  %3098 = vmatprep.subr.bf16.mxu1 %v12897_v7  ;;  %v12984_v6 = vld [vmem:[%s18986_s1 + $0x264] ss:$48 sps:$4 sm:$0xff]   ;;  %v12987_v7 = vld [vmem:[%s18986_s1 + $0x26c] ss:$48 sps:$4 sm:$0xff]  }
  0xff   :  { %2970 = vmatpush1.bf16.msra.mxu0 %v12892_v8  ;;  %3099 = vmatpush1.bf16.msra.mxu1 %v12895_v9  ;;  %v12982_v8 = vld [vmem:[%s18986_s1 + $0x260] ss:$48 sps:$4 sm:$0xff]   ;;  %v12985_v9 = vld [vmem:[%s18986_s1 + $0x268] ss:$48 sps:$4 sm:$0xff]  }
 0x100   :  { %2971 = vmatprep.subr.bf16.mxu0 %v12900_v10  ;;  %3100 = vmatprep.subr.bf16.mxu1 %v12903_v11  ;;  %v12990_v10 = vld [vmem:[%s18986_s1 + $0x2c4] ss:$48 sps:$4 sm:$0xff]   ;;  %v12993_v11 = vld [vmem:[%s18986_s1 + $0x2cc] ss:$48 sps:$4 sm:$0xff]  }
 0x103   :  { %2972 = vmatpush1.bf16.msra.mxu0 %v12898_v12  ;;  %3101 = vmatpush1.bf16.msra.mxu1 %v12901_v13  ;;  %v12988_v12 = vld [vmem:[%s18986_s1 + $0x2c0] ss:$48 sps:$4 sm:$0xff]   ;;  %v12991_v13 = vld [vmem:[%s18986_s1 + $0x2c8] ss:$48 sps:$4 sm:$0xff]  }
 0x104   :  { %2973 = vmatprep.subr.bf16.mxu0 %v12906_v14  ;;  %3102 = vmatprep.subr.bf16.mxu1 %v12909_v16  ;;  %v12996_v14 = vld [vmem:[%s18986_s1 + $0x324] ss:$48 sps:$4 sm:$0xff]   ;;  %v12999_v16 = vld [vmem:[%s18986_s1 + $0x32c] ss:$48 sps:$4 sm:$0xff]  }
 0x107   :  { %2974 = vmatpush1.bf16.msra.mxu0 %v12904_v17  ;;  %3103 = vmatpush1.bf16.msra.mxu1 %v12907_v18  ;;  %v12994_v17 = vld [vmem:[%s18986_s1 + $0x320] ss:$48 sps:$4 sm:$0xff]   ;;  %v12997_v18 = vld [vmem:[%s18986_s1 + $0x328] ss:$48 sps:$4 sm:$0xff]  }
 0x108   :  { %2975 = vmatprep.subr.bf16.mxu0 %v12912_v19  ;;  %3104 = vmatprep.subr.bf16.mxu1 %v12915_v20  ;;  %v13002_v19 = vld [vmem:[%s18986_s1 + $0x384] ss:$48 sps:$4 sm:$0xff]   ;;  %v13005_v20 = vld [vmem:[%s18986_s1 + $0x38c] ss:$48 sps:$4 sm:$0xff]  }
 0x10b   :  { %2976 = vmatpush1.bf16.msra.mxu0 %v12910_v21  ;;  %3105 = vmatpush1.bf16.msra.mxu1 %v12913_v22  ;;  %v13000_v21 = vld [vmem:[%s18986_s1 + $0x380] ss:$48 sps:$4 sm:$0xff]   ;;  %v13003_v22 = vld [vmem:[%s18986_s1 + $0x388] ss:$48 sps:$4 sm:$0xff]  }
 0x10c   :  { %2977 = vmatprep.subr.bf16.mxu0 %v12918_v23  ;;  %3106 = vmatprep.subr.bf16.mxu1 %v12921_v24  ;;  %v13008_v23 = vld [vmem:[%s18986_s1 + $0x3e4] ss:$48 sps:$4 sm:$0xff]   ;;  %v13011_v24 = vld [vmem:[%s18986_s1 + $0x3ec] ss:$48 sps:$4 sm:$0xff]  }
 0x10f   :  { %2978 = vmatpush1.bf16.msra.mxu0 %v12916_v25  ;;  %3107 = vmatpush1.bf16.msra.mxu1 %v12919_v26  ;;  %v13006_v25 = vld [vmem:[%s18986_s1 + $0x3e0] ss:$48 sps:$4 sm:$0xff]   ;;  %v13009_v26 = vld [vmem:[%s18986_s1 + $0x3e8] ss:$48 sps:$4 sm:$0xff]  }
 0x110   :  { %2990 = vmatprep.subr.bf16.mxu0 %v12924_v27  ;;  %3119 = vmatprep.subr.bf16.mxu1 %v12927_v28  ;;  %v13014_v27 = vld [vmem:[%s18986_s1 + $0x444] ss:$48 sps:$4 sm:$0xff]   ;;  %v13017_v28 = vld [vmem:[%s18986_s1 + $0x44c] ss:$48 sps:$4 sm:$0xff]  }
 0x112   :  { %2980 = vmatmul.mubr.bf16.vlgmr.msra.gmra.mrb[4].mxu0 %v14579_v34  ;;  %3109 = vmatmul.mubr.bf16.vlgmr.msra.gmra.mrb[4].mxu1 %v14579_v34  ;;  %v13018_v34 = vld [vmem:[%s18986_s1 + $0x4a0] ss:$48 sps:$4 sm:$0xff]  }
 0x113   :  { %2991 = vmatpush1.bf16.msra.mxu0 %v12922_v30  ;;  %3120 = vmatpush1.bf16.msra.mxu1 %v12925_v31  ;;  %v13012_v30 = vld [vmem:[%s18986_s1 + $0x440] ss:$48 sps:$4 sm:$0xff]   ;;  %v13015_v31 = vld [vmem:[%s18986_s1 + $0x448] ss:$48 sps:$4 sm:$0xff]  }
 0x114   :  { %2992 = vmatprep.subr.bf16.mxu0 %v12930_v32  ;;  %3121 = vmatprep.subr.bf16.mxu1 %v12933_v33  ;;  %v13020_v32 = vld [vmem:[%s18986_s1 + $0x4a4] ss:$48 sps:$4 sm:$0xff]   ;;  %v13023_v33 = vld [vmem:[%s18986_s1 + $0x4ac] ss:$48 sps:$4 sm:$0xff]  }
 0x115   :  { %3022 = vmatprep.mubr.bf16.mxu0 %v14625_v15  ;;  %3151 = vmatprep.mubr.bf16.mxu1 %v14625_v15 }
 0x117   :  { %2993 = vmatpush1.bf16.msra.mxu0 %v12928_v35  ;;  %3122 = vmatpush1.bf16.msra.mxu1 %v12931_v36  ;;  %v13021_v35 = vld [vmem:[%s18986_s1 + $0x4a8] ss:$48 sps:$4 sm:$0xff]   ;;  %v13026_v36 = vld [vmem:[%s18986_s1 + $0x504] ss:$48 sps:$4 sm:$0xff]  }
 0x118   :  { %2994 = vmatprep.subr.bf16.mxu0 %v12936_v47  ;;  %3123 = vmatprep.subr.bf16.mxu1 %v12939_v37  ;;  %v13029_v47 = vld [vmem:[%s18986_s1 + $0x50c] ss:$48 sps:$4 sm:$0xff]   ;;  %v13024_v37 = vld [vmem:[%s18986_s1 + $0x500] ss:$48 sps:$4 sm:$0xff]  }
 0x11b   :  { %2995 = vmatpush1.bf16.msra.mxu0 %v12934_v38  ;;  %3124 = vmatpush1.bf16.msra.mxu1 %v12937_v29  ;;  %v13027_v38 = vld [vmem:[%s18986_s1 + $0x508] ss:$48 sps:$4 sm:$0xff]   ;;  %v13032_v29 = vld [vmem:[%s18986_s1 + $0x564] ss:$48 sps:$4 sm:$0xff]  }
 0x11c   :  { %2996 = vmatprep.subr.bf16.mxu0 %v12942_v39  ;;  %3125 = vmatprep.subr.bf16.mxu1 %v12945_v40  ;;  %v13035_v39 = vld [vmem:[%s18986_s1 + $0x56c] ss:$48 sps:$4 sm:$0xff]   ;;  %v13030_v40 = vld [vmem:[%s18986_s1 + $0x560] ss:$48 sps:$4 sm:$0xff]  }
 0x11f   :  { %2997 = vmatpush1.bf16.msra.mxu0 %v12940_v41  ;;  %3126 = vmatpush1.bf16.msra.mxu1 %v12943_v42  ;;  %v13033_v41 = vld [vmem:[%s18986_s1 + $0x568] ss:$48 sps:$4 sm:$0xff]   ;;  %v13038_v42 = vld [vmem:[%s18986_s1 + $0x5c4] ss:$48 sps:$4 sm:$0xff]  }
 0x120   :  { %3162 = vmatprep.subr.bf16.mxu0 %v12948_v43  ;;  %3291 = vmatprep.subr.bf16.mxu1 %v12951_v44  ;;  %v13041_v43 = vld [vmem:[%s18986_s1 + $0x5cc] ss:$48 sps:$4 sm:$0xff]   ;;  %v13036_v44 = vld [vmem:[%s18986_s1 + $0x5c0] ss:$48 sps:$4 sm:$0xff]  }
 0x122   :  { %11289 = vmatmul.mubr.msk.bf16.vlgmr.msra.gmra.mrb[4].mxu0 %vm2642_vm0, %v14580_v50  ;;  %11290 = vmatmul.mubr.msk.bf16.vlgmr.msra.gmra.mrb[4].mxu1 %vm2642_vm0, %v14580_v50  ;;  %v13045_v50 = vld [vmem:[%s18986_s1 + $0x628] ss:$48 sps:$4 sm:$0xff]  }
 0x123   :  { %3163 = vmatpush1.bf16.msra.mxu0 %v12946_v45  ;;  %3292 = vmatpush1.bf16.msra.mxu1 %v12949_v46  ;;  %v13039_v45 = vld [vmem:[%s18986_s1 + $0x5c8] ss:$48 sps:$4 sm:$0xff]   ;;  %v13044_v46 = vld [vmem:[%s18986_s1 + $0x624] ss:$48 sps:$4 sm:$0xff]  }
 0x124   :  { %3164 = vmatprep.subr.bf16.mxu0 %v12954_v48  ;;  %3293 = vmatprep.subr.bf16.mxu1 %v12957_v49  ;;  %v13047_v48 = vld [vmem:[%s18986_s1 + $0x62c] ss:$48 sps:$4 sm:$0xff]   ;;  %v13042_v49 = vld [vmem:[%s18986_s1 + $0x620] ss:$48 sps:$4 sm:$0xff]  }
 0x125   :  { %3194 = vmatprep.mubr.bf16.mxu0 %v14581_v55  ;;  %3323 = vmatprep.mubr.bf16.mxu1 %v14581_v55  ;;  %v13051_v55 = vld [vmem:[%s18986_s1 + $0x688] ss:$48 sps:$4 sm:$0xff]  }
 0x127   :  { %3165 = vmatpush1.bf16.msra.mxu0 %v12952_v51  ;;  %3294 = vmatpush1.bf16.msra.mxu1 %v12955_v52  ;;  %v13050_v51 = vld [vmem:[%s18986_s1 + $0x684] ss:$48 sps:$4 sm:$0xff]   ;;  %v13053_v52 = vld [vmem:[%s18986_s1 + $0x68c] ss:$48 sps:$4 sm:$0xff]  }
 0x128   :  { %3166 = vmatprep.subr.bf16.mxu0 %v12960_v53  ;;  %3295 = vmatprep.subr.bf16.mxu1 %v12963_v54  ;;  %v14582_v53 = vld [vmem:[%s18985_s0] ss:$20 sps:$4 sm:$0xff]  }
 0x129   :  { %v13048_v54 = vld [vmem:[%s18986_s1 + $0x680] ss:$48 sps:$4 sm:$0xff]  }
 0x12b   :  { %3167 = vmatpush1.bf16.msra.mxu0 %v12958_v56  ;;  %3296 = vmatpush1.bf16.msra.mxu1 %v12961_v57  ;;  %v13056_v56 = vld [vmem:[%s18986_s1 + $0x6e4] ss:$48 sps:$4 sm:$0xff]   ;;  %v13059_v57 = vld [vmem:[%s18986_s1 + $0x6ec] ss:$48 sps:$4 sm:$0xff]  }
 0x12c   :  { %3168 = vmatprep.subr.bf16.mxu0 %v12966_v58  ;;  %3297 = vmatprep.subr.bf16.mxu1 %v12969_v59 }
 0x12f   :  { %3169 = vmatpush1.bf16.msra.mxu0 %v12964_v60  ;;  %3298 = vmatpush1.bf16.msra.mxu1 %v12967_v61  ;;  %v14583_v60 = vld [vmem:[%s18985_s0 + $0xc] ss:$20 sps:$4 sm:$0xff]  }
 0x130   :  { %3170 = vmatprep.subr.bf16.mxu0 %v12972_v62  ;;  %3299 = vmatprep.subr.bf16.mxu1 %v12975_v63 }
 0x133   :  { %3171 = vmatpush1.bf16.msra.mxu0 %v12970_v0  ;;  %3300 = vmatpush1.bf16.msra.mxu1 %v12973_v1  ;;  %v13054_v1 = vld [vmem:[%s18986_s1 + $0x6e0] ss:$48 sps:$4 sm:$0xff]  }
 0x134   :  { %3172 = vmatprep.subr.bf16.mxu0 %v12978_v2  ;;  %3301 = vmatprep.subr.bf16.mxu1 %v12981_v3  ;;  %v13057_v2 = vld [vmem:[%s18986_s1 + $0x6e8] ss:$48 sps:$4 sm:$0xff]  }
 0x137   :  { %3173 = vmatpush1.bf16.msra.mxu0 %v12976_v4  ;;  %3302 = vmatpush1.bf16.msra.mxu1 %v12979_v5  ;;  %v13062_v5 = vld [vmem:[%s18986_s1 + $0x744] ss:$48 sps:$4 sm:$0xff]  }
 0x138   :  { %3174 = vmatprep.subr.bf16.mxu0 %v12984_v6  ;;  %3303 = vmatprep.subr.bf16.mxu1 %v12987_v7  ;;  %v13065_v6 = vld [vmem:[%s18986_s1 + $0x74c] ss:$48 sps:$4 sm:$0xff]   ;;  %v13060_v7 = vld [vmem:[%s18986_s1 + $0x740] ss:$48 sps:$4 sm:$0xff]  }
 0x13b   :  { %3175 = vmatpush1.bf16.msra.mxu0 %v12982_v8  ;;  %3304 = vmatpush1.bf16.msra.mxu1 %v12985_v9  ;;  %v13063_v8 = vld [vmem:[%s18986_s1 + $0x748] ss:$48 sps:$4 sm:$0xff]   ;;  %v13068_v9 = vld [vmem:[%s18986_s1 + $0x7a4] ss:$48 sps:$4 sm:$0xff]  }
 0x13c   :  { %3176 = vmatprep.subr.bf16.mxu0 %v12990_v10  ;;  %3305 = vmatprep.subr.bf16.mxu1 %v12993_v11  ;;  %v13071_v10 = vld [vmem:[%s18986_s1 + $0x7ac] ss:$48 sps:$4 sm:$0xff]   ;;  %v13066_v11 = vld [vmem:[%s18986_s1 + $0x7a0] ss:$48 sps:$4 sm:$0xff]  }
 0x13f   :  { %3177 = vmatpush1.bf16.msra.mxu0 %v12988_v12  ;;  %3306 = vmatpush1.bf16.msra.mxu1 %v12991_v13  ;;  %v13069_v12 = vld [vmem:[%s18986_s1 + $0x7a8] ss:$48 sps:$4 sm:$0xff]   ;;  %v13074_v13 = vld [vmem:[%s18986_s1 + $0x804] ss:$48 sps:$4 sm:$0xff]  }
 0x140   :  { %3178 = vmatprep.subr.bf16.mxu0 %v12996_v14  ;;  %3307 = vmatprep.subr.bf16.mxu1 %v12999_v16  ;;  %v13077_v14 = vld [vmem:[%s18986_s1 + $0x80c] ss:$48 sps:$4 sm:$0xff]   ;;  %v13072_v16 = vld [vmem:[%s18986_s1 + $0x800] ss:$48 sps:$4 sm:$0xff]  }
 0x143   :  { %3179 = vmatpush1.bf16.msra.mxu0 %v12994_v17  ;;  %3308 = vmatpush1.bf16.msra.mxu1 %v12997_v18  ;;  %v13075_v17 = vld [vmem:[%s18986_s1 + $0x808] ss:$48 sps:$4 sm:$0xff]   ;;  %v13080_v18 = vld [vmem:[%s18986_s1 + $0x864] ss:$48 sps:$4 sm:$0xff]  }
 0x144   :  { %3180 = vmatprep.subr.bf16.mxu0 %v13002_v19  ;;  %3309 = vmatprep.subr.bf16.mxu1 %v13005_v20  ;;  %v13083_v19 = vld [vmem:[%s18986_s1 + $0x86c] ss:$48 sps:$4 sm:$0xff]   ;;  %v13078_v20 = vld [vmem:[%s18986_s1 + $0x860] ss:$48 sps:$4 sm:$0xff]  }
 0x147   :  { %3181 = vmatpush1.bf16.msra.mxu0 %v13000_v21  ;;  %3310 = vmatpush1.bf16.msra.mxu1 %v13003_v22  ;;  %v13081_v21 = vld [vmem:[%s18986_s1 + $0x868] ss:$48 sps:$4 sm:$0xff]   ;;  %v13086_v22 = vld [vmem:[%s18986_s1 + $0x8c4] ss:$48 sps:$4 sm:$0xff]  }
 0x148   :  { %3182 = vmatprep.subr.bf16.mxu0 %v13008_v23  ;;  %3311 = vmatprep.subr.bf16.mxu1 %v13011_v24  ;;  %v13089_v23 = vld [vmem:[%s18986_s1 + $0x8cc] ss:$48 sps:$4 sm:$0xff]   ;;  %v13084_v24 = vld [vmem:[%s18986_s1 + $0x8c0] ss:$48 sps:$4 sm:$0xff]  }
 0x14b   :  { %3183 = vmatpush1.bf16.msra.mxu0 %v13006_v25  ;;  %3312 = vmatpush1.bf16.msra.mxu1 %v13009_v26  ;;  %v13087_v25 = vld [vmem:[%s18986_s1 + $0x8c8] ss:$48 sps:$4 sm:$0xff]   ;;  %v13092_v26 = vld [vmem:[%s18986_s1 + $0x924] ss:$48 sps:$4 sm:$0xff]  }
 0x14c   :  { %3184 = vmatprep.subr.bf16.mxu0 %v13014_v27  ;;  %3313 = vmatprep.subr.bf16.mxu1 %v13017_v28  ;;  %v13095_v27 = vld [vmem:[%s18986_s1 + $0x92c] ss:$48 sps:$4 sm:$0xff]   ;;  %v13090_v28 = vld [vmem:[%s18986_s1 + $0x920] ss:$48 sps:$4 sm:$0xff]  }
 0x14f   :  { %3185 = vmatpush1.bf16.msra.mxu0 %v13012_v30  ;;  %3314 = vmatpush1.bf16.msra.mxu1 %v13015_v31  ;;  %v13093_v30 = vld [vmem:[%s18986_s1 + $0x928] ss:$48 sps:$4 sm:$0xff]   ;;  %v13098_v31 = vld [vmem:[%s18986_s1 + $0x984] ss:$48 sps:$4 sm:$0xff]  }
 0x150   :  { %3186 = vmatprep.subr.bf16.mxu0 %v13020_v32  ;;  %3315 = vmatprep.subr.bf16.mxu1 %v13023_v33  ;;  %v13101_v32 = vld [vmem:[%s18986_s1 + $0x98c] ss:$48 sps:$4 sm:$0xff]   ;;  %v13096_v33 = vld [vmem:[%s18986_s1 + $0x980] ss:$48 sps:$4 sm:$0xff]  }
 0x153   :  { %3187 = vmatpush1.bf16.msra.mxu0 %v13018_v34  ;;  %3316 = vmatpush1.bf16.msra.mxu1 %v13021_v35  ;;  %v13099_v34 = vld [vmem:[%s18986_s1 + $0x988] ss:$48 sps:$4 sm:$0xff]   ;;  %v13104_v35 = vld [vmem:[%s18986_s1 + $0x9e4] ss:$48 sps:$4 sm:$0xff]  }
 0x154   :  { %3188 = vmatprep.subr.bf16.mxu0 %v13026_v36  ;;  %3317 = vmatprep.subr.bf16.mxu1 %v13029_v47  ;;  %v13107_v36 = vld [vmem:[%s18986_s1 + $0x9ec] ss:$48 sps:$4 sm:$0xff]   ;;  %v13102_v47 = vld [vmem:[%s18986_s1 + $0x9e0] ss:$48 sps:$4 sm:$0xff]  }
 0x157   :  { %3189 = vmatpush1.bf16.msra.mxu0 %v13024_v37  ;;  %3318 = vmatpush1.bf16.msra.mxu1 %v13027_v38  ;;  %v13105_v37 = vld [vmem:[%s18986_s1 + $0x9e8] ss:$48 sps:$4 sm:$0xff]   ;;  %v13110_v38 = vld [vmem:[%s18986_s1 + $0xa44] ss:$48 sps:$4 sm:$0xff]  }
 0x158   :  { %3190 = vmatprep.subr.bf16.mxu0 %v13032_v29  ;;  %3319 = vmatprep.subr.bf16.mxu1 %v13035_v39  ;;  %v13113_v29 = vld [vmem:[%s18986_s1 + $0xa4c] ss:$48 sps:$4 sm:$0xff]   ;;  %v13108_v39 = vld [vmem:[%s18986_s1 + $0xa40] ss:$48 sps:$4 sm:$0xff]  }
 0x15b   :  { %3191 = vmatpush1.bf16.msra.mxu0 %v13030_v40  ;;  %3320 = vmatpush1.bf16.msra.mxu1 %v13033_v41  ;;  %v13111_v40 = vld [vmem:[%s18986_s1 + $0xa48] ss:$48 sps:$4 sm:$0xff]   ;;  %v13116_v41 = vld [vmem:[%s18986_s1 + $0xaa4] ss:$48 sps:$4 sm:$0xff]  }
 0x15c   :  { %3192 = vmatprep.subr.bf16.mxu0 %v13038_v42  ;;  %3321 = vmatprep.subr.bf16.mxu1 %v13041_v43  ;;  %v13119_v42 = vld [vmem:[%s18986_s1 + $0xaac] ss:$48 sps:$4 sm:$0xff]   ;;  %v13114_v43 = vld [vmem:[%s18986_s1 + $0xaa0] ss:$48 sps:$4 sm:$0xff]  }
 0x15f   :  { %3193 = vmatpush1.bf16.msra.mxu0 %v13036_v44  ;;  %3322 = vmatpush1.bf16.msra.mxu1 %v13039_v45  ;;  %v13117_v44 = vld [vmem:[%s18986_s1 + $0xaa8] ss:$48 sps:$4 sm:$0xff]   ;;  %v13122_v45 = vld [vmem:[%s18986_s1 + $0xb04] ss:$48 sps:$4 sm:$0xff]  }
 0x160   :  { %3205 = vmatprep.subr.bf16.mxu0 %v13044_v46  ;;  %3334 = vmatprep.subr.bf16.mxu1 %v13047_v48  ;;  %v13125_v46 = vld [vmem:[%s18986_s1 + $0xb0c] ss:$48 sps:$4 sm:$0xff]   ;;  %v13120_v48 = vld [vmem:[%s18986_s1 + $0xb00] ss:$48 sps:$4 sm:$0xff]  }
 0x162   :  { %3195 = vmatmul.mubr.bf16.vlgmr.msra.gmra.mrb[8].mxu0 %v14582_v53  ;;  %3324 = vmatmul.mubr.bf16.vlgmr.msra.gmra.mrb[8].mxu1 %v14582_v53  ;;  %v13129_v53 = vld [vmem:[%s18986_s1 + $0xb68] ss:$48 sps:$4 sm:$0xff]  }
 0x163   :  { %3206 = vmatpush1.bf16.msra.mxu0 %v13042_v49  ;;  %3335 = vmatpush1.bf16.msra.mxu1 %v13045_v50  ;;  %v13123_v49 = vld [vmem:[%s18986_s1 + $0xb08] ss:$48 sps:$4 sm:$0xff]   ;;  %v13128_v50 = vld [vmem:[%s18986_s1 + $0xb64] ss:$48 sps:$4 sm:$0xff]  }
 0x164   :  { %3207 = vmatprep.subr.bf16.mxu0 %v13050_v51  ;;  %3336 = vmatprep.subr.bf16.mxu1 %v13053_v52  ;;  %v13131_v51 = vld [vmem:[%s18986_s1 + $0xb6c] ss:$48 sps:$4 sm:$0xff]   ;;  %v13126_v52 = vld [vmem:[%s18986_s1 + $0xb60] ss:$48 sps:$4 sm:$0xff]  }
 0x165   :  { %v15790_v58 = vpop.f32.mrb[0].mxu0  ;;  %v15792_v59 = vpop.f32.mrb[0].mxu1  ;;  %3237 = vmatprep.mubr.bf16.mxu0 %v14583_v60  ;;  %3366 = vmatprep.mubr.bf16.mxu1 %v14583_v60  ;;  %v13140_v60 = vld [vmem:[%s18986_s1 + $0xc24] ss:$48 sps:$4 sm:$0xff]  }
 0x166   :  { %v15797_v61 = vpop.f32.mrb[1].mxu0  ;;  %v15799_v62 = vpop.f32.mrb[1].mxu1 }
 0x167   :  { %v15801_v63 = vpop.f32.mrb[2].mxu0  ;;  %v15803_v0 = vpop.f32.mrb[2].mxu1  ;;  %3208 = vmatpush1.bf16.msra.mxu0 %v13048_v54  ;;  %3337 = vmatpush1.bf16.msra.mxu1 %v13051_v55  ;;  %v13134_v54 = vld [vmem:[%s18986_s1 + $0xbc4] ss:$48 sps:$4 sm:$0xff]   ;;  %v13137_v55 = vld [vmem:[%s18986_s1 + $0xbcc] ss:$48 sps:$4 sm:$0xff]  }
 0x168   :  { %v15811_v3 = vpop.f32.mrb[3].mxu0  ;;  %v15813_v4 = vpop.f32.mrb[3].mxu1  ;;  %3209 = vmatprep.subr.bf16.mxu0 %v13056_v56  ;;  %3338 = vmatprep.subr.bf16.mxu1 %v13059_v57  ;;  %v13132_v56 = vld [vmem:[%s18986_s1 + $0xbc0] ss:$48 sps:$4 sm:$0xff]   ;;  %v13135_v57 = vld [vmem:[%s18986_s1 + $0xbc8] ss:$48 sps:$4 sm:$0xff]  }
 0x16b   :  { %3210 = vmatpush1.bf16.msra.mxu0 %v13054_v1  ;;  %3339 = vmatpush1.bf16.msra.mxu1 %v13057_v2  ;;  %v13143_v1 = vld [vmem:[%s18986_s1 + $0xc2c] ss:$48 sps:$4 sm:$0xff]   ;;  %v13138_v2 = vld [vmem:[%s18986_s1 + $0xc20] ss:$48 sps:$4 sm:$0xff]  }
 0x16c   :  { %3211 = vmatprep.subr.bf16.mxu0 %v13062_v5  ;;  %3340 = vmatprep.subr.bf16.mxu1 %v13065_v6  ;;  %v13141_v5 = vld [vmem:[%s18986_s1 + $0xc28] ss:$48 sps:$4 sm:$0xff]   ;;  %v13146_v6 = vld [vmem:[%s18986_s1 + $0xc84] ss:$48 sps:$4 sm:$0xff]  }
 0x16f   :  { %3212 = vmatpush1.bf16.msra.mxu0 %v13060_v7  ;;  %3341 = vmatpush1.bf16.msra.mxu1 %v13063_v8  ;;  %v13149_v7 = vld [vmem:[%s18986_s1 + $0xc8c] ss:$48 sps:$4 sm:$0xff]  }
 0x170   :  { %3213 = vmatprep.subr.bf16.mxu0 %v13068_v9  ;;  %3342 = vmatprep.subr.bf16.mxu1 %v13071_v10  ;;  %v14584_v8 = vld [vmem:[%s18985_s0 + $0x8] ss:$20 sps:$4 sm:$0xff]   ;;  %v13144_v9 = vld [vmem:[%s18986_s1 + $0xc80] ss:$48 sps:$4 sm:$0xff]  }
 0x171   :  { %v13147_v10 = vld [vmem:[%s18986_s1 + $0xc88] ss:$48 sps:$4 sm:$0xff]  }
 0x173   :  { %3214 = vmatpush1.bf16.msra.mxu0 %v13066_v11  ;;  %3343 = vmatpush1.bf16.msra.mxu1 %v13069_v12  ;;  %v13152_v11 = vld [vmem:[%s18986_s1 + $0xce4] ss:$48 sps:$4 sm:$0xff]   ;;  %v13155_v12 = vld [vmem:[%s18986_s1 + $0xcec] ss:$48 sps:$4 sm:$0xff]  }
 0x174   :  { %3215 = vmatprep.subr.bf16.mxu0 %v13074_v13  ;;  %3344 = vmatprep.subr.bf16.mxu1 %v13077_v14  ;;  %v13150_v13 = vld [vmem:[%s18986_s1 + $0xce0] ss:$48 sps:$4 sm:$0xff]   ;;  %v13153_v14 = vld [vmem:[%s18986_s1 + $0xce8] ss:$48 sps:$4 sm:$0xff]  }
 0x177   :  { %3216 = vmatpush1.bf16.msra.mxu0 %v13072_v16  ;;  %3345 = vmatpush1.bf16.msra.mxu1 %v13075_v17  ;;  %v13158_v16 = vld [vmem:[%s18986_s1 + $0xd44] ss:$48 sps:$4 sm:$0xff]   ;;  %v13161_v17 = vld [vmem:[%s18986_s1 + $0xd4c] ss:$48 sps:$4 sm:$0xff]  }
 0x178   :  { %3217 = vmatprep.subr.bf16.mxu0 %v13080_v18  ;;  %3346 = vmatprep.subr.bf16.mxu1 %v13083_v19  ;;  %v13156_v18 = vld [vmem:[%s18986_s1 + $0xd40] ss:$48 sps:$4 sm:$0xff]   ;;  %v13159_v19 = vld [vmem:[%s18986_s1 + $0xd48] ss:$48 sps:$4 sm:$0xff]  }
 0x17b   :  { %3218 = vmatpush1.bf16.msra.mxu0 %v13078_v20  ;;  %3347 = vmatpush1.bf16.msra.mxu1 %v13081_v21  ;;  %v13164_v20 = vld [vmem:[%s18987_s2 + $0x4] ss:$48 sps:$4 sm:$0xff]   ;;  %v13167_v21 = vld [vmem:[%s18987_s2 + $0xc] ss:$48 sps:$4 sm:$0xff]  }
 0x17c   :  { %3219 = vmatprep.subr.bf16.mxu0 %v13086_v22  ;;  %3348 = vmatprep.subr.bf16.mxu1 %v13089_v23  ;;  %v13162_v22 = vld [vmem:[%s18987_s2] ss:$48 sps:$4 sm:$0xff]   ;;  %v13165_v23 = vld [vmem:[%s18987_s2 + $0x8] ss:$48 sps:$4 sm:$0xff]  }
 0x17f   :  { %3220 = vmatpush1.bf16.msra.mxu0 %v13084_v24  ;;  %3349 = vmatpush1.bf16.msra.mxu1 %v13087_v25  ;;  %v13170_v24 = vld [vmem:[%s18987_s2 + $0x64] ss:$48 sps:$4 sm:$0xff]   ;;  %v13173_v25 = vld [vmem:[%s18987_s2 + $0x6c] ss:$48 sps:$4 sm:$0xff]  }
 0x180   :  { %3221 = vmatprep.subr.bf16.mxu0 %v13092_v26  ;;  %3350 = vmatprep.subr.bf16.mxu1 %v13095_v27  ;;  %v14585_v26 = vld [vmem:[%s18985_s0 + $0x10] ss:$20 sps:$4 sm:$0xff]  }
 0x181   :  { %v13168_v27 = vld [vmem:[%s18987_s2 + $0x60] ss:$48 sps:$4 sm:$0xff]  }
 0x183   :  { %3222 = vmatpush1.bf16.msra.mxu0 %v13090_v28  ;;  %3351 = vmatpush1.bf16.msra.mxu1 %v13093_v30  ;;  %v13171_v28 = vld [vmem:[%s18987_s2 + $0x68] ss:$48 sps:$4 sm:$0xff]   ;;  %v13176_v30 = vld [vmem:[%s18987_s2 + $0xc4] ss:$48 sps:$4 sm:$0xff]  }
 0x184   :  { %3223 = vmatprep.subr.bf16.mxu0 %v13098_v31  ;;  %3352 = vmatprep.subr.bf16.mxu1 %v13101_v32  ;;  %v13179_v31 = vld [vmem:[%s18987_s2 + $0xcc] ss:$48 sps:$4 sm:$0xff]   ;;  %v14586_v32 = vld [vmem:[%s18985_s0 + $0x4] ss:$20 sps:$4 sm:$0xff]  }
 0x187   :  { %3224 = vmatpush1.bf16.msra.mxu0 %v13096_v33  ;;  %3353 = vmatpush1.bf16.msra.mxu1 %v13099_v34  ;;  %v13174_v33 = vld [vmem:[%s18987_s2 + $0xc0] ss:$48 sps:$4 sm:$0xff]   ;;  %v13177_v34 = vld [vmem:[%s18987_s2 + $0xc8] ss:$48 sps:$4 sm:$0xff]  }
 0x188   :  { %3225 = vmatprep.subr.bf16.mxu0 %v13104_v35  ;;  %3354 = vmatprep.subr.bf16.mxu1 %v13107_v36  ;;  %v13182_v35 = vld [vmem:[%s18987_s2 + $0x124] ss:$48 sps:$4 sm:$0xff]   ;;  %v13185_v36 = vld [vmem:[%s18987_s2 + $0x12c] ss:$48 sps:$4 sm:$0xff]  }
 0x18b   :  { %3226 = vmatpush1.bf16.msra.mxu0 %v13102_v47  ;;  %3355 = vmatpush1.bf16.msra.mxu1 %v13105_v37  ;;  %v13180_v47 = vld [vmem:[%s18987_s2 + $0x120] ss:$48 sps:$4 sm:$0xff]   ;;  %v13183_v37 = vld [vmem:[%s18987_s2 + $0x128] ss:$48 sps:$4 sm:$0xff]  }
 0x18c   :  { %3227 = vmatprep.subr.bf16.mxu0 %v13110_v38  ;;  %3356 = vmatprep.subr.bf16.mxu1 %v13113_v29  ;;  %v13188_v38 = vld [vmem:[%s18987_s2 + $0x184] ss:$48 sps:$4 sm:$0xff]   ;;  %v13191_v29 = vld [vmem:[%s18987_s2 + $0x18c] ss:$48 sps:$4 sm:$0xff]  }
 0x18f   :  { %3228 = vmatpush1.bf16.msra.mxu0 %v13108_v39  ;;  %3357 = vmatpush1.bf16.msra.mxu1 %v13111_v40  ;;  %v13186_v39 = vld [vmem:[%s18987_s2 + $0x180] ss:$48 sps:$4 sm:$0xff]   ;;  %v13189_v40 = vld [vmem:[%s18987_s2 + $0x188] ss:$48 sps:$4 sm:$0xff]  }
 0x190   :  { %3229 = vmatprep.subr.bf16.mxu0 %v13116_v41  ;;  %3358 = vmatprep.subr.bf16.mxu1 %v13119_v42  ;;  %v13194_v41 = vld [vmem:[%s18987_s2 + $0x1e4] ss:$48 sps:$4 sm:$0xff]   ;;  %v13197_v42 = vld [vmem:[%s18987_s2 + $0x1ec] ss:$48 sps:$4 sm:$0xff]  }
 0x193   :  { %3230 = vmatpush1.bf16.msra.mxu0 %v13114_v43  ;;  %3359 = vmatpush1.bf16.msra.mxu1 %v13117_v44  ;;  %v13192_v43 = vld [vmem:[%s18987_s2 + $0x1e0] ss:$48 sps:$4 sm:$0xff]   ;;  %v13195_v44 = vld [vmem:[%s18987_s2 + $0x1e8] ss:$48 sps:$4 sm:$0xff]  }
 0x194   :  { %3231 = vmatprep.subr.bf16.mxu0 %v13122_v45  ;;  %3360 = vmatprep.subr.bf16.mxu1 %v13125_v46  ;;  %v13200_v45 = vld [vmem:[%s18987_s2 + $0x244] ss:$48 sps:$4 sm:$0xff]   ;;  %v13203_v46 = vld [vmem:[%s18987_s2 + $0x24c] ss:$48 sps:$4 sm:$0xff]  }
 0x197   :  { %3232 = vmatpush1.bf16.msra.mxu0 %v13120_v48  ;;  %3361 = vmatpush1.bf16.msra.mxu1 %v13123_v49  ;;  %v13198_v48 = vld [vmem:[%s18987_s2 + $0x240] ss:$48 sps:$4 sm:$0xff]   ;;  %v13201_v49 = vld [vmem:[%s18987_s2 + $0x248] ss:$48 sps:$4 sm:$0xff]  }
 0x198   :  { %3233 = vmatprep.subr.bf16.mxu0 %v13128_v50  ;;  %3362 = vmatprep.subr.bf16.mxu1 %v13131_v51  ;;  %v13206_v50 = vld [vmem:[%s18987_s2 + $0x2a4] ss:$48 sps:$4 sm:$0xff]   ;;  %v13209_v51 = vld [vmem:[%s18987_s2 + $0x2ac] ss:$48 sps:$4 sm:$0xff]  }
 0x19b   :  { %3234 = vmatpush1.bf16.msra.mxu0 %v13126_v52  ;;  %3363 = vmatpush1.bf16.msra.mxu1 %v13129_v53  ;;  %v13204_v52 = vld [vmem:[%s18987_s2 + $0x2a0] ss:$48 sps:$4 sm:$0xff]   ;;  %v13207_v53 = vld [vmem:[%s18987_s2 + $0x2a8] ss:$48 sps:$4 sm:$0xff]  }
 0x19c   :  { %3235 = vmatprep.subr.bf16.mxu0 %v13134_v54  ;;  %3364 = vmatprep.subr.bf16.mxu1 %v13137_v55  ;;  %v13212_v54 = vld [vmem:[%s18987_s2 + $0x304] ss:$48 sps:$4 sm:$0xff]   ;;  %v13215_v55 = vld [vmem:[%s18987_s2 + $0x30c] ss:$48 sps:$4 sm:$0xff]  }
 0x19f   :  { %3236 = vmatpush1.bf16.msra.mxu0 %v13132_v56  ;;  %3365 = vmatpush1.bf16.msra.mxu1 %v13135_v57  ;;  %v13210_v56 = vld [vmem:[%s18987_s2 + $0x300] ss:$48 sps:$4 sm:$0xff]   ;;  %v13213_v57 = vld [vmem:[%s18987_s2 + $0x308] ss:$48 sps:$4 sm:$0xff]  }
 0x1a0   :  { %3248 = vmatprep.subr.bf16.mxu0 %v13140_v60  ;;  %3377 = vmatprep.subr.bf16.mxu1 %v13143_v1  ;;  %v13218_v60 = vld [vmem:[%s18987_s2 + $0x364] ss:$48 sps:$4 sm:$0xff]   ;;  %v13221_v1 = vld [vmem:[%s18987_s2 + $0x36c] ss:$48 sps:$4 sm:$0xff]  }
 0x1a2   :  { %3238 = vmatmul.mubr.bf16.vlgmr.msra.gmra.mrb[8].mxu0 %v14584_v8  ;;  %3367 = vmatmul.mubr.bf16.vlgmr.msra.gmra.mrb[8].mxu1 %v14584_v8  ;;  %v13222_v8 = vld [vmem:[%s18987_s2 + $0x3c0] ss:$48 sps:$4 sm:$0xff]  }
 0x1a3   :  { %3249 = vmatpush1.bf16.msra.mxu0 %v13138_v2  ;;  %3378 = vmatpush1.bf16.msra.mxu1 %v13141_v5  ;;  %v13216_v2 = vld [vmem:[%s18987_s2 + $0x360] ss:$48 sps:$4 sm:$0xff]   ;;  %v13219_v5 = vld [vmem:[%s18987_s2 + $0x368] ss:$48 sps:$4 sm:$0xff]  }
 0x1a4   :  { %3250 = vmatprep.subr.bf16.mxu0 %v13146_v6  ;;  %3379 = vmatprep.subr.bf16.mxu1 %v13149_v7  ;;  %v13224_v6 = vld [vmem:[%s18987_s2 + $0x3c4] ss:$48 sps:$4 sm:$0xff]   ;;  %v13227_v7 = vld [vmem:[%s18987_s2 + $0x3cc] ss:$48 sps:$4 sm:$0xff]  }
 0x1a5   :  { %3280 = vmatprep.mubr.bf16.mxu0 %v14625_v15  ;;  %3409 = vmatprep.mubr.bf16.mxu1 %v14625_v15 }
 0x1a7   :  { %3251 = vmatpush1.bf16.msra.mxu0 %v13144_v9  ;;  %3380 = vmatpush1.bf16.msra.mxu1 %v13147_v10  ;;  %v13225_v9 = vld [vmem:[%s18987_s2 + $0x3c8] ss:$48 sps:$4 sm:$0xff]   ;;  %v13230_v10 = vld [vmem:[%s18987_s2 + $0x424] ss:$48 sps:$4 sm:$0xff]  }
 0x1a8   :  { %3252 = vmatprep.subr.bf16.mxu0 %v13152_v11  ;;  %3381 = vmatprep.subr.bf16.mxu1 %v13155_v12  ;;  %v13233_v11 = vld [vmem:[%s18987_s2 + $0x42c] ss:$48 sps:$4 sm:$0xff]   ;;  %v13228_v12 = vld [vmem:[%s18987_s2 + $0x420] ss:$48 sps:$4 sm:$0xff]  }
 0x1ab   :  { %3253 = vmatpush1.bf16.msra.mxu0 %v13150_v13  ;;  %3382 = vmatpush1.bf16.msra.mxu1 %v13153_v14  ;;  %v13231_v13 = vld [vmem:[%s18987_s2 + $0x428] ss:$48 sps:$4 sm:$0xff]   ;;  %v13236_v14 = vld [vmem:[%s18987_s2 + $0x484] ss:$48 sps:$4 sm:$0xff]  }
 0x1ac   :  { %3254 = vmatprep.subr.bf16.mxu0 %v13158_v16  ;;  %3383 = vmatprep.subr.bf16.mxu1 %v13161_v17  ;;  %v13239_v16 = vld [vmem:[%s18987_s2 + $0x48c] ss:$48 sps:$4 sm:$0xff]   ;;  %v13234_v17 = vld [vmem:[%s18987_s2 + $0x480] ss:$48 sps:$4 sm:$0xff]  }
 0x1af   :  { %3255 = vmatpush1.bf16.msra.mxu0 %v13156_v18  ;;  %3384 = vmatpush1.bf16.msra.mxu1 %v13159_v19  ;;  %v13237_v18 = vld [vmem:[%s18987_s2 + $0x488] ss:$48 sps:$4 sm:$0xff]   ;;  %v13242_v19 = vld [vmem:[%s18987_s2 + $0x4e4] ss:$48 sps:$4 sm:$0xff]  }
 0x1b0   :  { %6012 = vmatprep.subr.bf16.mxu0 %v13164_v20  ;;  %6141 = vmatprep.subr.bf16.mxu1 %v13167_v21  ;;  %v13245_v20 = vld [vmem:[%s18987_s2 + $0x4ec] ss:$48 sps:$4 sm:$0xff]   ;;  %v13240_v21 = vld [vmem:[%s18987_s2 + $0x4e0] ss:$48 sps:$4 sm:$0xff]  }
 0x1b2   :  { %11291 = vmatmul.mubr.msk.bf16.vlgmr.msra.gmra.mrb[8].mxu0 %vm2642_vm0, %v14585_v26  ;;  %11292 = vmatmul.mubr.msk.bf16.vlgmr.msra.gmra.mrb[8].mxu1 %vm2642_vm0, %v14585_v26  ;;  %v13249_v26 = vld [vmem:[%s18987_s2 + $0x548] ss:$48 sps:$4 sm:$0xff]  }
 0x1b3   :  { %6013 = vmatpush1.bf16.msra.mxu0 %v13162_v22  ;;  %6142 = vmatpush1.bf16.msra.mxu1 %v13165_v23  ;;  %v13243_v22 = vld [vmem:[%s18987_s2 + $0x4e8] ss:$48 sps:$4 sm:$0xff]   ;;  %v13248_v23 = vld [vmem:[%s18987_s2 + $0x544] ss:$48 sps:$4 sm:$0xff]  }
 0x1b4   :  { %6014 = vmatprep.subr.bf16.mxu0 %v13170_v24  ;;  %6143 = vmatprep.subr.bf16.mxu1 %v13173_v25  ;;  %v13251_v24 = vld [vmem:[%s18987_s2 + $0x54c] ss:$48 sps:$4 sm:$0xff]   ;;  %v13246_v25 = vld [vmem:[%s18987_s2 + $0x540] ss:$48 sps:$4 sm:$0xff]  }
 0x1b5   :  { %6044 = vmatprep.mubr.bf16.mxu0 %v14586_v32  ;;  %6173 = vmatprep.mubr.bf16.mxu1 %v14586_v32  ;;  %v13260_v32 = vld [vmem:[%s18987_s2 + $0x604] ss:$48 sps:$4 sm:$0xff]  }
 0x1b7   :  { %6015 = vmatpush1.bf16.msra.mxu0 %v13168_v27  ;;  %6144 = vmatpush1.bf16.msra.mxu1 %v13171_v28  ;;  %v13254_v27 = vld [vmem:[%s18987_s2 + $0x5a4] ss:$48 sps:$4 sm:$0xff]   ;;  %v13257_v28 = vld [vmem:[%s18987_s2 + $0x5ac] ss:$48 sps:$4 sm:$0xff]  }
 0x1b8   :  { %6016 = vmatprep.subr.bf16.mxu0 %v13176_v30  ;;  %6145 = vmatprep.subr.bf16.mxu1 %v13179_v31  ;;  %v13252_v30 = vld [vmem:[%s18987_s2 + $0x5a0] ss:$48 sps:$4 sm:$0xff]   ;;  %v13255_v31 = vld [vmem:[%s18987_s2 + $0x5a8] ss:$48 sps:$4 sm:$0xff]  }
 0x1bb   :  { %6017 = vmatpush1.bf16.msra.mxu0 %v13174_v33  ;;  %6146 = vmatpush1.bf16.msra.mxu1 %v13177_v34  ;;  %v13263_v33 = vld [vmem:[%s18987_s2 + $0x60c] ss:$48 sps:$4 sm:$0xff]   ;;  %v13258_v34 = vld [vmem:[%s18987_s2 + $0x600] ss:$48 sps:$4 sm:$0xff]  }
 0x1bc   :  { %6018 = vmatprep.subr.bf16.mxu0 %v13182_v35  ;;  %6147 = vmatprep.subr.bf16.mxu1 %v13185_v36  ;;  %v13261_v35 = vld [vmem:[%s18987_s2 + $0x608] ss:$48 sps:$4 sm:$0xff]   ;;  %v13266_v36 = vld [vmem:[%s18987_s2 + $0x664] ss:$48 sps:$4 sm:$0xff]  }
 0x1bf   :  { %6019 = vmatpush1.bf16.msra.mxu0 %v13180_v47  ;;  %6148 = vmatpush1.bf16.msra.mxu1 %v13183_v37  ;;  %v13269_v47 = vld [vmem:[%s18987_s2 + $0x66c] ss:$48 sps:$4 sm:$0xff]   ;;  %v14587_v37 = vld [vmem:[%s18985_s0] ss:$20 sps:$4 sm:$0xff]  }
 0x1c0   :  { %6020 = vmatprep.subr.bf16.mxu0 %v13188_v38  ;;  %6149 = vmatprep.subr.bf16.mxu1 %v13191_v29  ;;  %v13264_v38 = vld [vmem:[%s18987_s2 + $0x660] ss:$48 sps:$4 sm:$0xff]   ;;  %v13267_v29 = vld [vmem:[%s18987_s2 + $0x668] ss:$48 sps:$4 sm:$0xff]  }
 0x1c3   :  { %6021 = vmatpush1.bf16.msra.mxu0 %v13186_v39  ;;  %6150 = vmatpush1.bf16.msra.mxu1 %v13189_v40  ;;  %v13272_v39 = vld [vmem:[%s18987_s2 + $0x6c4] ss:$48 sps:$4 sm:$0xff]   ;;  %v13275_v40 = vld [vmem:[%s18987_s2 + $0x6cc] ss:$48 sps:$4 sm:$0xff]  }
 0x1c4   :  { %6022 = vmatprep.subr.bf16.mxu0 %v13194_v41  ;;  %6151 = vmatprep.subr.bf16.mxu1 %v13197_v42 }
 0x1c7   :  { %6023 = vmatpush1.bf16.msra.mxu0 %v13192_v43  ;;  %6152 = vmatpush1.bf16.msra.mxu1 %v13195_v44  ;;  %v14588_v43 = vld [vmem:[%s18985_s0 + $0xc] ss:$20 sps:$4 sm:$0xff]  }
 0x1c8   :  { %6024 = vmatprep.subr.bf16.mxu0 %v13200_v45  ;;  %6153 = vmatprep.subr.bf16.mxu1 %v13203_v46 }
 0x1cb   :  { %6025 = vmatpush1.bf16.msra.mxu0 %v13198_v48  ;;  %6154 = vmatpush1.bf16.msra.mxu1 %v13201_v49  ;;  %v13270_v49 = vld [vmem:[%s18987_s2 + $0x6c0] ss:$48 sps:$4 sm:$0xff]  }
 0x1cc   :  { %6026 = vmatprep.subr.bf16.mxu0 %v13206_v50  ;;  %6155 = vmatprep.subr.bf16.mxu1 %v13209_v51  ;;  %v13273_v50 = vld [vmem:[%s18987_s2 + $0x6c8] ss:$48 sps:$4 sm:$0xff]  }
 0x1cf   :  { %6027 = vmatpush1.bf16.msra.mxu0 %v13204_v52  ;;  %6156 = vmatpush1.bf16.msra.mxu1 %v13207_v53  ;;  %v13278_v53 = vld [vmem:[%s18987_s2 + $0x724] ss:$48 sps:$4 sm:$0xff]  }
 0x1d0   :  { %6028 = vmatprep.subr.bf16.mxu0 %v13212_v54  ;;  %6157 = vmatprep.subr.bf16.mxu1 %v13215_v55  ;;  %v13281_v54 = vld [vmem:[%s18987_s2 + $0x72c] ss:$48 sps:$4 sm:$0xff]   ;;  %v13276_v55 = vld [vmem:[%s18987_s2 + $0x720] ss:$48 sps:$4 sm:$0xff]  }
 0x1d3   :  { %6029 = vmatpush1.bf16.msra.mxu0 %v13210_v56  ;;  %6158 = vmatpush1.bf16.msra.mxu1 %v13213_v57  ;;  %v13279_v56 = vld [vmem:[%s18987_s2 + $0x728] ss:$48 sps:$4 sm:$0xff]   ;;  %v13284_v57 = vld [vmem:[%s18987_s2 + $0x784] ss:$48 sps:$4 sm:$0xff]  }
 0x1d4   :  { %6030 = vmatprep.subr.bf16.mxu0 %v13218_v60  ;;  %6159 = vmatprep.subr.bf16.mxu1 %v13221_v1  ;;  %v13287_v60 = vld [vmem:[%s18987_s2 + $0x78c] ss:$48 sps:$4 sm:$0xff]   ;;  %v13282_v1 = vld [vmem:[%s18987_s2 + $0x780] ss:$48 sps:$4 sm:$0xff]  }
 0x1d7   :  { %6031 = vmatpush1.bf16.msra.mxu0 %v13216_v2  ;;  %6160 = vmatpush1.bf16.msra.mxu1 %v13219_v5  ;;  %v13285_v2 = vld [vmem:[%s18987_s2 + $0x788] ss:$48 sps:$4 sm:$0xff]   ;;  %v13290_v5 = vld [vmem:[%s18987_s2 + $0x7e4] ss:$48 sps:$4 sm:$0xff]  }
 0x1d8   :  { %6032 = vmatprep.subr.bf16.mxu0 %v13224_v6  ;;  %6161 = vmatprep.subr.bf16.mxu1 %v13227_v7  ;;  %v13293_v6 = vld [vmem:[%s18987_s2 + $0x7ec] ss:$48 sps:$4 sm:$0xff]   ;;  %v13288_v7 = vld [vmem:[%s18987_s2 + $0x7e0] ss:$48 sps:$4 sm:$0xff]  }
 0x1db   :  { %6033 = vmatpush1.bf16.msra.mxu0 %v13222_v8  ;;  %6162 = vmatpush1.bf16.msra.mxu1 %v13225_v9  ;;  %v13291_v8 = vld [vmem:[%s18987_s2 + $0x7e8] ss:$48 sps:$4 sm:$0xff]   ;;  %v13296_v9 = vld [vmem:[%s18987_s2 + $0x844] ss:$48 sps:$4 sm:$0xff]  }
 0x1dc   :  { %6034 = vmatprep.subr.bf16.mxu0 %v13230_v10  ;;  %6163 = vmatprep.subr.bf16.mxu1 %v13233_v11  ;;  %v13299_v10 = vld [vmem:[%s18987_s2 + $0x84c] ss:$48 sps:$4 sm:$0xff]   ;;  %v13294_v11 = vld [vmem:[%s18987_s2 + $0x840] ss:$48 sps:$4 sm:$0xff]  }
 0x1df   :  { %6035 = vmatpush1.bf16.msra.mxu0 %v13228_v12  ;;  %6164 = vmatpush1.bf16.msra.mxu1 %v13231_v13  ;;  %v13297_v12 = vld [vmem:[%s18987_s2 + $0x848] ss:$48 sps:$4 sm:$0xff]   ;;  %v13302_v13 = vld [vmem:[%s18987_s2 + $0x8a4] ss:$48 sps:$4 sm:$0xff]  }
 0x1e0   :  { %6036 = vmatprep.subr.bf16.mxu0 %v13236_v14  ;;  %6165 = vmatprep.subr.bf16.mxu1 %v13239_v16  ;;  %v13305_v14 = vld [vmem:[%s18987_s2 + $0x8ac] ss:$48 sps:$4 sm:$0xff]   ;;  %v13300_v16 = vld [vmem:[%s18987_s2 + $0x8a0] ss:$48 sps:$4 sm:$0xff]  }
 0x1e3   :  { %6037 = vmatpush1.bf16.msra.mxu0 %v13234_v17  ;;  %6166 = vmatpush1.bf16.msra.mxu1 %v13237_v18  ;;  %v13303_v17 = vld [vmem:[%s18987_s2 + $0x8a8] ss:$48 sps:$4 sm:$0xff]   ;;  %v13308_v18 = vld [vmem:[%s18987_s2 + $0x904] ss:$48 sps:$4 sm:$0xff]  }
 0x1e4   :  { %6038 = vmatprep.subr.bf16.mxu0 %v13242_v19  ;;  %6167 = vmatprep.subr.bf16.mxu1 %v13245_v20  ;;  %v13311_v19 = vld [vmem:[%s18987_s2 + $0x90c] ss:$48 sps:$4 sm:$0xff]   ;;  %v13306_v20 = vld [vmem:[%s18987_s2 + $0x900] ss:$48 sps:$4 sm:$0xff]  }
 0x1e7   :  { %6039 = vmatpush1.bf16.msra.mxu0 %v13240_v21  ;;  %6168 = vmatpush1.bf16.msra.mxu1 %v13243_v22  ;;  %v13309_v21 = vld [vmem:[%s18987_s2 + $0x908] ss:$48 sps:$4 sm:$0xff]   ;;  %v13314_v22 = vld [vmem:[%s18987_s2 + $0x964] ss:$48 sps:$4 sm:$0xff]  }
 0x1e8   :  { %6040 = vmatprep.subr.bf16.mxu0 %v13248_v23  ;;  %6169 = vmatprep.subr.bf16.mxu1 %v13251_v24  ;;  %v13317_v23 = vld [vmem:[%s18987_s2 + $0x96c] ss:$48 sps:$4 sm:$0xff]   ;;  %v13312_v24 = vld [vmem:[%s18987_s2 + $0x960] ss:$48 sps:$4 sm:$0xff]  }
 0x1eb   :  { %6041 = vmatpush1.bf16.msra.mxu0 %v13246_v25  ;;  %6170 = vmatpush1.bf16.msra.mxu1 %v13249_v26  ;;  %v13315_v25 = vld [vmem:[%s18987_s2 + $0x968] ss:$48 sps:$4 sm:$0xff]   ;;  %v13320_v26 = vld [vmem:[%s18987_s2 + $0x9c4] ss:$48 sps:$4 sm:$0xff]  }
 0x1ec   :  { %6042 = vmatprep.subr.bf16.mxu0 %v13254_v27  ;;  %6171 = vmatprep.subr.bf16.mxu1 %v13257_v28  ;;  %v13323_v27 = vld [vmem:[%s18987_s2 + $0x9cc] ss:$48 sps:$4 sm:$0xff]   ;;  %v13318_v28 = vld [vmem:[%s18987_s2 + $0x9c0] ss:$48 sps:$4 sm:$0xff]  }
 0x1ef   :  { %6043 = vmatpush1.bf16.msra.mxu0 %v13252_v30  ;;  %6172 = vmatpush1.bf16.msra.mxu1 %v13255_v31  ;;  %v13321_v30 = vld [vmem:[%s18987_s2 + $0x9c8] ss:$48 sps:$4 sm:$0xff]   ;;  %v13326_v31 = vld [vmem:[%s18987_s2 + $0xa24] ss:$48 sps:$4 sm:$0xff]  }
 0x1f0   :  { %6055 = vmatprep.subr.bf16.mxu0 %v13260_v32  ;;  %6184 = vmatprep.subr.bf16.mxu1 %v13263_v33  ;;  %v13329_v32 = vld [vmem:[%s18987_s2 + $0xa2c] ss:$48 sps:$4 sm:$0xff]   ;;  %v13324_v33 = vld [vmem:[%s18987_s2 + $0xa20] ss:$48 sps:$4 sm:$0xff]  }
 0x1f2   :  { %6045 = vmatmul.mubr.bf16.vlgmr.msra.gmra.mrb[12].mxu0 %v14587_v37  ;;  %6174 = vmatmul.mubr.bf16.vlgmr.msra.gmra.mrb[12].mxu1 %v14587_v37  ;;  %v13333_v37 = vld [vmem:[%s18987_s2 + $0xa88] ss:$48 sps:$4 sm:$0xff]  }
 0x1f3   :  { %6056 = vmatpush1.bf16.msra.mxu0 %v13258_v34  ;;  %6185 = vmatpush1.bf16.msra.mxu1 %v13261_v35  ;;  %v13327_v34 = vld [vmem:[%s18987_s2 + $0xa28] ss:$48 sps:$4 sm:$0xff]   ;;  %v13332_v35 = vld [vmem:[%s18987_s2 + $0xa84] ss:$48 sps:$4 sm:$0xff]  }
 0x1f4   :  { %6057 = vmatprep.subr.bf16.mxu0 %v13266_v36  ;;  %6186 = vmatprep.subr.bf16.mxu1 %v13269_v47  ;;  %v13335_v36 = vld [vmem:[%s18987_s2 + $0xa8c] ss:$48 sps:$4 sm:$0xff]   ;;  %v13330_v47 = vld [vmem:[%s18987_s2 + $0xa80] ss:$48 sps:$4 sm:$0xff]  }
 0x1f5   :  { %v16257_v41 = vpop.f32.mrb[4].mxu0  ;;  %v16259_v42 = vpop.f32.mrb[4].mxu1  ;;  %6087 = vmatprep.mubr.bf16.mxu0 %v14588_v43  ;;  %6216 = vmatprep.mubr.bf16.mxu1 %v14588_v43  ;;  %v13344_v43 = vld [vmem:[%s18987_s2 + $0xb44] ss:$48 sps:$4 sm:$0xff]  }
 0x1f6   :  { %v16264_v44 = vpop.f32.mrb[5].mxu0  ;;  %v16266_v45 = vpop.f32.mrb[5].mxu1 }
 0x1f7   :  { %v16268_v46 = vpop.f32.mrb[6].mxu0  ;;  %v16270_v48 = vpop.f32.mrb[6].mxu1  ;;  %6058 = vmatpush1.bf16.msra.mxu0 %v13264_v38  ;;  %6187 = vmatpush1.bf16.msra.mxu1 %v13267_v29  ;;  %v13338_v38 = vld [vmem:[%s18987_s2 + $0xae4] ss:$48 sps:$4 sm:$0xff]   ;;  %v13341_v29 = vld [vmem:[%s18987_s2 + $0xaec] ss:$48 sps:$4 sm:$0xff]  }
 0x1f8   :  { %v16278_v51 = vpop.f32.mrb[7].mxu0  ;;  %v16280_v52 = vpop.f32.mrb[7].mxu1  ;;  %6059 = vmatprep.subr.bf16.mxu0 %v13272_v39  ;;  %6188 = vmatprep.subr.bf16.mxu1 %v13275_v40  ;;  %v13336_v39 = vld [vmem:[%s18987_s2 + $0xae0] ss:$48 sps:$4 sm:$0xff]   ;;  %v13339_v40 = vld [vmem:[%s18987_s2 + $0xae8] ss:$48 sps:$4 sm:$0xff]  }
 0x1fb   :  { %6060 = vmatpush1.bf16.msra.mxu0 %v13270_v49  ;;  %6189 = vmatpush1.bf16.msra.mxu1 %v13273_v50  ;;  %v13347_v49 = vld [vmem:[%s18987_s2 + $0xb4c] ss:$48 sps:$4 sm:$0xff]   ;;  %v13342_v50 = vld [vmem:[%s18987_s2 + $0xb40] ss:$48 sps:$4 sm:$0xff]  }
 0x1fc   :  { %6061 = vmatprep.subr.bf16.mxu0 %v13278_v53  ;;  %6190 = vmatprep.subr.bf16.mxu1 %v13281_v54  ;;  %v13345_v53 = vld [vmem:[%s18987_s2 + $0xb48] ss:$48 sps:$4 sm:$0xff]   ;;  %v13350_v54 = vld [vmem:[%s18987_s2 + $0xba4] ss:$48 sps:$4 sm:$0xff]  }
 0x1ff   :  { %6062 = vmatpush1.bf16.msra.mxu0 %v13276_v55  ;;  %6191 = vmatpush1.bf16.msra.mxu1 %v13279_v56  ;;  %v13353_v55 = vld [vmem:[%s18987_s2 + $0xbac] ss:$48 sps:$4 sm:$0xff]   ;;  %v13348_v56 = vld [vmem:[%s18987_s2 + $0xba0] ss:$48 sps:$4 sm:$0xff]  }
 0x200   :  { %6063 = vmatprep.subr.bf16.mxu0 %v13284_v57  ;;  %6192 = vmatprep.subr.bf16.mxu1 %v13287_v60  ;;  %v13351_v57 = vld [vmem:[%s18987_s2 + $0xba8] ss:$48 sps:$4 sm:$0xff]   ;;  %v13356_v60 = vld [vmem:[%s18987_s2 + $0xc04] ss:$48 sps:$4 sm:$0xff]  }
 0x203   :  { %6064 = vmatpush1.bf16.msra.mxu0 %v13282_v1  ;;  %6193 = vmatpush1.bf16.msra.mxu1 %v13285_v2  ;;  %v13359_v1 = vld [vmem:[%s18987_s2 + $0xc0c] ss:$48 sps:$4 sm:$0xff]   ;;  %v13354_v2 = vld [vmem:[%s18987_s2 + $0xc00] ss:$48 sps:$4 sm:$0xff]  }
 0x204   :  { %6065 = vmatprep.subr.bf16.mxu0 %v13290_v5  ;;  %6194 = vmatprep.subr.bf16.mxu1 %v13293_v6  ;;  %v13357_v5 = vld [vmem:[%s18987_s2 + $0xc08] ss:$48 sps:$4 sm:$0xff]   ;;  %v13362_v6 = vld [vmem:[%s18987_s2 + $0xc64] ss:$48 sps:$4 sm:$0xff]  }
 0x207   :  { %6066 = vmatpush1.bf16.msra.mxu0 %v13288_v7  ;;  %6195 = vmatpush1.bf16.msra.mxu1 %v13291_v8  ;;  %v13365_v7 = vld [vmem:[%s18987_s2 + $0xc6c] ss:$48 sps:$4 sm:$0xff]  }
 0x208   :  { %6067 = vmatprep.subr.bf16.mxu0 %v13296_v9  ;;  %6196 = vmatprep.subr.bf16.mxu1 %v13299_v10  ;;  %v14589_v8 = vld [vmem:[%s18985_s0 + $0x8] ss:$20 sps:$4 sm:$0xff]   ;;  %v13360_v9 = vld [vmem:[%s18987_s2 + $0xc60] ss:$48 sps:$4 sm:$0xff]  }
 0x209   :  { %v13363_v10 = vld [vmem:[%s18987_s2 + $0xc68] ss:$48 sps:$4 sm:$0xff]  }
 0x20b   :  { %6068 = vmatpush1.bf16.msra.mxu0 %v13294_v11  ;;  %6197 = vmatpush1.bf16.msra.mxu1 %v13297_v12  ;;  %v13368_v11 = vld [vmem:[%s18987_s2 + $0xcc4] ss:$48 sps:$4 sm:$0xff]   ;;  %v13371_v12 = vld [vmem:[%s18987_s2 + $0xccc] ss:$48 sps:$4 sm:$0xff]  }
 0x20c   :  { %6069 = vmatprep.subr.bf16.mxu0 %v13302_v13  ;;  %6198 = vmatprep.subr.bf16.mxu1 %v13305_v14  ;;  %v13366_v13 = vld [vmem:[%s18987_s2 + $0xcc0] ss:$48 sps:$4 sm:$0xff]   ;;  %v13369_v14 = vld [vmem:[%s18987_s2 + $0xcc8] ss:$48 sps:$4 sm:$0xff]  }
 0x20f   :  { %6070 = vmatpush1.bf16.msra.mxu0 %v13300_v16  ;;  %6199 = vmatpush1.bf16.msra.mxu1 %v13303_v17  ;;  %v13374_v16 = vld [vmem:[%s18987_s2 + $0xd24] ss:$48 sps:$4 sm:$0xff]   ;;  %v13377_v17 = vld [vmem:[%s18987_s2 + $0xd2c] ss:$48 sps:$4 sm:$0xff]  }
 0x210   :  { %6071 = vmatprep.subr.bf16.mxu0 %v13308_v18  ;;  %6200 = vmatprep.subr.bf16.mxu1 %v13311_v19  ;;  %v13372_v18 = vld [vmem:[%s18987_s2 + $0xd20] ss:$48 sps:$4 sm:$0xff]   ;;  %v13375_v19 = vld [vmem:[%s18987_s2 + $0xd28] ss:$48 sps:$4 sm:$0xff]  }
 0x213   :  { %6072 = vmatpush1.bf16.msra.mxu0 %v13306_v20  ;;  %6201 = vmatpush1.bf16.msra.mxu1 %v13309_v21  ;;  %v13380_v20 = vld [vmem:[%s18987_s2 + $0x14] ss:$48 sps:$4 sm:$0xff]   ;;  %v13383_v21 = vld [vmem:[%s18987_s2 + $0x1c] ss:$48 sps:$4 sm:$0xff]  }
 0x214   :  { %6073 = vmatprep.subr.bf16.mxu0 %v13314_v22  ;;  %6202 = vmatprep.subr.bf16.mxu1 %v13317_v23  ;;  %v13378_v22 = vld [vmem:[%s18987_s2 + $0x10] ss:$48 sps:$4 sm:$0xff]   ;;  %v13381_v23 = vld [vmem:[%s18987_s2 + $0x18] ss:$48 sps:$4 sm:$0xff]  }
 0x217   :  { %6074 = vmatpush1.bf16.msra.mxu0 %v13312_v24  ;;  %6203 = vmatpush1.bf16.msra.mxu1 %v13315_v25  ;;  %v13386_v24 = vld [vmem:[%s18987_s2 + $0x74] ss:$48 sps:$4 sm:$0xff]   ;;  %v13389_v25 = vld [vmem:[%s18987_s2 + $0x7c] ss:$48 sps:$4 sm:$0xff]  }
 0x218   :  { %6075 = vmatprep.subr.bf16.mxu0 %v13320_v26  ;;  %6204 = vmatprep.subr.bf16.mxu1 %v13323_v27  ;;  %v14590_v26 = vld [vmem:[%s18985_s0 + $0x10] ss:$20 sps:$4 sm:$0xff]  }
 0x219   :  { %v13384_v27 = vld [vmem:[%s18987_s2 + $0x70] ss:$48 sps:$4 sm:$0xff]  }
 0x21b   :  { %6076 = vmatpush1.bf16.msra.mxu0 %v13318_v28  ;;  %6205 = vmatpush1.bf16.msra.mxu1 %v13321_v30  ;;  %v13387_v28 = vld [vmem:[%s18987_s2 + $0x78] ss:$48 sps:$4 sm:$0xff]   ;;  %v13392_v30 = vld [vmem:[%s18987_s2 + $0xd4] ss:$48 sps:$4 sm:$0xff]  }
 0x21c   :  { %6077 = vmatprep.subr.bf16.mxu0 %v13326_v31  ;;  %6206 = vmatprep.subr.bf16.mxu1 %v13329_v32  ;;  %v13395_v31 = vld [vmem:[%s18987_s2 + $0xdc] ss:$48 sps:$4 sm:$0xff]   ;;  %v14591_v32 = vld [vmem:[%s18985_s0 + $0x4] ss:$20 sps:$4 sm:$0xff]  }
 0x21f   :  { %6078 = vmatpush1.bf16.msra.mxu0 %v13324_v33  ;;  %6207 = vmatpush1.bf16.msra.mxu1 %v13327_v34  ;;  %v13390_v33 = vld [vmem:[%s18987_s2 + $0xd0] ss:$48 sps:$4 sm:$0xff]   ;;  %v13393_v34 = vld [vmem:[%s18987_s2 + $0xd8] ss:$48 sps:$4 sm:$0xff]  }
 0x220   :  { %6079 = vmatprep.subr.bf16.mxu0 %v13332_v35  ;;  %6208 = vmatprep.subr.bf16.mxu1 %v13335_v36  ;;  %v13398_v35 = vld [vmem:[%s18987_s2 + $0x134] ss:$48 sps:$4 sm:$0xff]   ;;  %v13401_v36 = vld [vmem:[%s18987_s2 + $0x13c] ss:$48 sps:$4 sm:$0xff]  }
 0x223   :  { %6080 = vmatpush1.bf16.msra.mxu0 %v13330_v47  ;;  %6209 = vmatpush1.bf16.msra.mxu1 %v13333_v37  ;;  %v13396_v47 = vld [vmem:[%s18987_s2 + $0x130] ss:$48 sps:$4 sm:$0xff]   ;;  %v13399_v37 = vld [vmem:[%s18987_s2 + $0x138] ss:$48 sps:$4 sm:$0xff]  }
 0x224   :  { %6081 = vmatprep.subr.bf16.mxu0 %v13338_v38  ;;  %6210 = vmatprep.subr.bf16.mxu1 %v13341_v29  ;;  %v13404_v38 = vld [vmem:[%s18987_s2 + $0x194] ss:$48 sps:$4 sm:$0xff]   ;;  %v13407_v29 = vld [vmem:[%s18987_s2 + $0x19c] ss:$48 sps:$4 sm:$0xff]  }
 0x227   :  { %6082 = vmatpush1.bf16.msra.mxu0 %v13336_v39  ;;  %6211 = vmatpush1.bf16.msra.mxu1 %v13339_v40  ;;  %v13402_v39 = vld [vmem:[%s18987_s2 + $0x190] ss:$48 sps:$4 sm:$0xff]   ;;  %v13405_v40 = vld [vmem:[%s18987_s2 + $0x198] ss:$48 sps:$4 sm:$0xff]  }
 0x228   :  { %6083 = vmatprep.subr.bf16.mxu0 %v13344_v43  ;;  %6212 = vmatprep.subr.bf16.mxu1 %v13347_v49  ;;  %v13410_v43 = vld [vmem:[%s18987_s2 + $0x1f4] ss:$48 sps:$4 sm:$0xff]   ;;  %v13413_v49 = vld [vmem:[%s18987_s2 + $0x1fc] ss:$48 sps:$4 sm:$0xff]  }
 0x22b   :  { %6084 = vmatpush1.bf16.msra.mxu0 %v13342_v50  ;;  %6213 = vmatpush1.bf16.msra.mxu1 %v13345_v53  ;;  %v13408_v50 = vld [vmem:[%s18987_s2 + $0x1f0] ss:$48 sps:$4 sm:$0xff]   ;;  %v13411_v53 = vld [vmem:[%s18987_s2 + $0x1f8] ss:$48 sps:$4 sm:$0xff]  }
 0x22c   :  { %6085 = vmatprep.subr.bf16.mxu0 %v13350_v54  ;;  %6214 = vmatprep.subr.bf16.mxu1 %v13353_v55  ;;  %v13416_v54 = vld [vmem:[%s18987_s2 + $0x254] ss:$48 sps:$4 sm:$0xff]   ;;  %v13419_v55 = vld [vmem:[%s18987_s2 + $0x25c] ss:$48 sps:$4 sm:$0xff]  }
 0x22f   :  { %6086 = vmatpush1.bf16.msra.mxu0 %v13348_v56  ;;  %6215 = vmatpush1.bf16.msra.mxu1 %v13351_v57  ;;  %v13414_v56 = vld [vmem:[%s18987_s2 + $0x250] ss:$48 sps:$4 sm:$0xff]   ;;  %v13417_v57 = vld [vmem:[%s18987_s2 + $0x258] ss:$48 sps:$4 sm:$0xff]  }
 0x230   :  { %6098 = vmatprep.subr.bf16.mxu0 %v13356_v60  ;;  %6227 = vmatprep.subr.bf16.mxu1 %v13359_v1  ;;  %v13422_v60 = vld [vmem:[%s18987_s2 + $0x2b4] ss:$48 sps:$4 sm:$0xff]   ;;  %v13425_v1 = vld [vmem:[%s18987_s2 + $0x2bc] ss:$48 sps:$4 sm:$0xff]  }
 0x232   :  { %6088 = vmatmul.mubr.bf16.vlgmr.msra.gmra.mrb[12].mxu0 %v14589_v8  ;;  %6217 = vmatmul.mubr.bf16.vlgmr.msra.gmra.mrb[12].mxu1 %v14589_v8  ;;  %v13426_v8 = vld [vmem:[%s18987_s2 + $0x310] ss:$48 sps:$4 sm:$0xff]  }
 0x233   :  { %6099 = vmatpush1.bf16.msra.mxu0 %v13354_v2  ;;  %6228 = vmatpush1.bf16.msra.mxu1 %v13357_v5  ;;  %v13420_v2 = vld [vmem:[%s18987_s2 + $0x2b0] ss:$48 sps:$4 sm:$0xff]   ;;  %v13423_v5 = vld [vmem:[%s18987_s2 + $0x2b8] ss:$48 sps:$4 sm:$0xff]  }
 0x234   :  { %6100 = vmatprep.subr.bf16.mxu0 %v13362_v6  ;;  %6229 = vmatprep.subr.bf16.mxu1 %v13365_v7  ;;  %v13428_v6 = vld [vmem:[%s18987_s2 + $0x314] ss:$48 sps:$4 sm:$0xff]   ;;  %v13431_v7 = vld [vmem:[%s18987_s2 + $0x31c] ss:$48 sps:$4 sm:$0xff]  }
 0x235   :  { %6130 = vmatprep.mubr.bf16.mxu0 %v14625_v15  ;;  %6259 = vmatprep.mubr.bf16.mxu1 %v14625_v15 }
 0x237   :  { %6101 = vmatpush1.bf16.msra.mxu0 %v13360_v9  ;;  %6230 = vmatpush1.bf16.msra.mxu1 %v13363_v10  ;;  %v13429_v9 = vld [vmem:[%s18987_s2 + $0x318] ss:$48 sps:$4 sm:$0xff]   ;;  %v13434_v10 = vld [vmem:[%s18987_s2 + $0x374] ss:$48 sps:$4 sm:$0xff]  }
 0x238   :  { %6102 = vmatprep.subr.bf16.mxu0 %v13368_v11  ;;  %6231 = vmatprep.subr.bf16.mxu1 %v13371_v12  ;;  %v13437_v11 = vld [vmem:[%s18987_s2 + $0x37c] ss:$48 sps:$4 sm:$0xff]   ;;  %v13432_v12 = vld [vmem:[%s18987_s2 + $0x370] ss:$48 sps:$4 sm:$0xff]  }
 0x23b   :  { %6103 = vmatpush1.bf16.msra.mxu0 %v13366_v13  ;;  %6232 = vmatpush1.bf16.msra.mxu1 %v13369_v14  ;;  %v13435_v13 = vld [vmem:[%s18987_s2 + $0x378] ss:$48 sps:$4 sm:$0xff]   ;;  %v13440_v14 = vld [vmem:[%s18987_s2 + $0x3d4] ss:$48 sps:$4 sm:$0xff]  }
 0x23c   :  { %6104 = vmatprep.subr.bf16.mxu0 %v13374_v16  ;;  %6233 = vmatprep.subr.bf16.mxu1 %v13377_v17  ;;  %v13443_v16 = vld [vmem:[%s18987_s2 + $0x3dc] ss:$48 sps:$4 sm:$0xff]   ;;  %v13438_v17 = vld [vmem:[%s18987_s2 + $0x3d0] ss:$48 sps:$4 sm:$0xff]  }
 0x23f   :  { %6105 = vmatpush1.bf16.msra.mxu0 %v13372_v18  ;;  %6234 = vmatpush1.bf16.msra.mxu1 %v13375_v19  ;;  %v13441_v18 = vld [vmem:[%s18987_s2 + $0x3d8] ss:$48 sps:$4 sm:$0xff]   ;;  %v13446_v19 = vld [vmem:[%s18987_s2 + $0x434] ss:$48 sps:$4 sm:$0xff]  }
 0x240   :  { %6270 = vmatprep.subr.bf16.mxu0 %v13380_v20  ;;  %6399 = vmatprep.subr.bf16.mxu1 %v13383_v21  ;;  %v13449_v20 = vld [vmem:[%s18987_s2 + $0x43c] ss:$48 sps:$4 sm:$0xff]   ;;  %v13444_v21 = vld [vmem:[%s18987_s2 + $0x430] ss:$48 sps:$4 sm:$0xff]  }
 0x242   :  { %11725 = vmatmul.mubr.msk.bf16.vlgmr.msra.gmra.mrb[12].mxu0 %vm2642_vm0, %v14590_v26  ;;  %11726 = vmatmul.mubr.msk.bf16.vlgmr.msra.gmra.mrb[12].mxu1 %vm2642_vm0, %v14590_v26  ;;  %v13453_v26 = vld [vmem:[%s18987_s2 + $0x498] ss:$48 sps:$4 sm:$0xff]  }
 0x243   :  { %6271 = vmatpush1.bf16.msra.mxu0 %v13378_v22  ;;  %6400 = vmatpush1.bf16.msra.mxu1 %v13381_v23  ;;  %v13447_v22 = vld [vmem:[%s18987_s2 + $0x438] ss:$48 sps:$4 sm:$0xff]   ;;  %v13452_v23 = vld [vmem:[%s18987_s2 + $0x494] ss:$48 sps:$4 sm:$0xff]  }
 0x244   :  { %6272 = vmatprep.subr.bf16.mxu0 %v13386_v24  ;;  %6401 = vmatprep.subr.bf16.mxu1 %v13389_v25  ;;  %v13455_v24 = vld [vmem:[%s18987_s2 + $0x49c] ss:$48 sps:$4 sm:$0xff]   ;;  %v13450_v25 = vld [vmem:[%s18987_s2 + $0x490] ss:$48 sps:$4 sm:$0xff]  }
 0x245   :  { %6302 = vmatprep.mubr.bf16.mxu0 %v14591_v32  ;;  %6431 = vmatprep.mubr.bf16.mxu1 %v14591_v32  ;;  %v13464_v32 = vld [vmem:[%s18987_s2 + $0x554] ss:$48 sps:$4 sm:$0xff]  }
 0x247   :  { %6273 = vmatpush1.bf16.msra.mxu0 %v13384_v27  ;;  %6402 = vmatpush1.bf16.msra.mxu1 %v13387_v28  ;;  %v13458_v27 = vld [vmem:[%s18987_s2 + $0x4f4] ss:$48 sps:$4 sm:$0xff]   ;;  %v13461_v28 = vld [vmem:[%s18987_s2 + $0x4fc] ss:$48 sps:$4 sm:$0xff]  }
 0x248   :  { %6274 = vmatprep.subr.bf16.mxu0 %v13392_v30  ;;  %6403 = vmatprep.subr.bf16.mxu1 %v13395_v31  ;;  %v13456_v30 = vld [vmem:[%s18987_s2 + $0x4f0] ss:$48 sps:$4 sm:$0xff]   ;;  %v13459_v31 = vld [vmem:[%s18987_s2 + $0x4f8] ss:$48 sps:$4 sm:$0xff]  }
 0x24b   :  { %6275 = vmatpush1.bf16.msra.mxu0 %v13390_v33  ;;  %6404 = vmatpush1.bf16.msra.mxu1 %v13393_v34  ;;  %v13467_v33 = vld [vmem:[%s18987_s2 + $0x55c] ss:$48 sps:$4 sm:$0xff]   ;;  %v13462_v34 = vld [vmem:[%s18987_s2 + $0x550] ss:$48 sps:$4 sm:$0xff]  }
 0x24c   :  { %6276 = vmatprep.subr.bf16.mxu0 %v13398_v35  ;;  %6405 = vmatprep.subr.bf16.mxu1 %v13401_v36  ;;  %v13465_v35 = vld [vmem:[%s18987_s2 + $0x558] ss:$48 sps:$4 sm:$0xff]   ;;  %v13470_v36 = vld [vmem:[%s18987_s2 + $0x5b4] ss:$48 sps:$4 sm:$0xff]  }
 0x24f   :  { %6277 = vmatpush1.bf16.msra.mxu0 %v13396_v47  ;;  %6406 = vmatpush1.bf16.msra.mxu1 %v13399_v37  ;;  %v13473_v47 = vld [vmem:[%s18987_s2 + $0x5bc] ss:$48 sps:$4 sm:$0xff]   ;;  %v13468_v37 = vld [vmem:[%s18987_s2 + $0x5b0] ss:$48 sps:$4 sm:$0xff]  }
 0x250   :  { %6278 = vmatprep.subr.bf16.mxu0 %v13404_v38  ;;  %6407 = vmatprep.subr.bf16.mxu1 %v13407_v29  ;;  %v13471_v38 = vld [vmem:[%s18987_s2 + $0x5b8] ss:$48 sps:$4 sm:$0xff]   ;;  %v13476_v29 = vld [vmem:[%s18987_s2 + $0x614] ss:$48 sps:$4 sm:$0xff]  }
 0x253   :  { %6279 = vmatpush1.bf16.msra.mxu0 %v13402_v39  ;;  %6408 = vmatpush1.bf16.msra.mxu1 %v13405_v40  ;;  %v13479_v39 = vld [vmem:[%s18987_s2 + $0x61c] ss:$48 sps:$4 sm:$0xff]   ;;  %v13474_v40 = vld [vmem:[%s18987_s2 + $0x610] ss:$48 sps:$4 sm:$0xff]  }
 0x254   :  { %6280 = vmatprep.subr.bf16.mxu0 %v13410_v43  ;;  %6409 = vmatprep.subr.bf16.mxu1 %v13413_v49  ;;  %v13477_v43 = vld [vmem:[%s18987_s2 + $0x618] ss:$48 sps:$4 sm:$0xff]   ;;  %v13482_v49 = vld [vmem:[%s18987_s2 + $0x674] ss:$48 sps:$4 sm:$0xff]  }
 0x257   :  { %6281 = vmatpush1.bf16.msra.mxu0 %v13408_v50  ;;  %6410 = vmatpush1.bf16.msra.mxu1 %v13411_v53  ;;  %v13485_v50 = vld [vmem:[%s18987_s2 + $0x67c] ss:$48 sps:$4 sm:$0xff]   ;;  %v14592_v53 = vld [vmem:[%s18985_s0] ss:$20 sps:$4 sm:$0xff]  }
 0x258   :  { %6282 = vmatprep.subr.bf16.mxu0 %v13416_v54  ;;  %6411 = vmatprep.subr.bf16.mxu1 %v13419_v55  ;;  %v13480_v54 = vld [vmem:[%s18987_s2 + $0x670] ss:$48 sps:$4 sm:$0xff]   ;;  %v13483_v55 = vld [vmem:[%s18987_s2 + $0x678] ss:$48 sps:$4 sm:$0xff]  }
 0x25b   :  { %6283 = vmatpush1.bf16.msra.mxu0 %v13414_v56  ;;  %6412 = vmatpush1.bf16.msra.mxu1 %v13417_v57  ;;  %v13488_v56 = vld [vmem:[%s18987_s2 + $0x6d4] ss:$48 sps:$4 sm:$0xff]   ;;  %v13491_v57 = vld [vmem:[%s18987_s2 + $0x6dc] ss:$48 sps:$4 sm:$0xff]  }
 0x25c   :  { %6284 = vmatprep.subr.bf16.mxu0 %v13422_v60  ;;  %6413 = vmatprep.subr.bf16.mxu1 %v13425_v1 }
 0x25f   :  { %6285 = vmatpush1.bf16.msra.mxu0 %v13420_v2  ;;  %6414 = vmatpush1.bf16.msra.mxu1 %v13423_v5  ;;  %v14593_v2 = vld [vmem:[%s18985_s0 + $0xc] ss:$20 sps:$4 sm:$0xff]  }
 0x260   :  { %6286 = vmatprep.subr.bf16.mxu0 %v13428_v6  ;;  %6415 = vmatprep.subr.bf16.mxu1 %v13431_v7 }
 0x263   :  { %6287 = vmatpush1.bf16.msra.mxu0 %v13426_v8  ;;  %6416 = vmatpush1.bf16.msra.mxu1 %v13429_v9  ;;  %v13486_v9 = vld [vmem:[%s18987_s2 + $0x6d0] ss:$48 sps:$4 sm:$0xff]  }
 0x264   :  { %6288 = vmatprep.subr.bf16.mxu0 %v13434_v10  ;;  %6417 = vmatprep.subr.bf16.mxu1 %v13437_v11  ;;  %v13489_v10 = vld [vmem:[%s18987_s2 + $0x6d8] ss:$48 sps:$4 sm:$0xff]  }
 0x267   :  { %6289 = vmatpush1.bf16.msra.mxu0 %v13432_v12  ;;  %6418 = vmatpush1.bf16.msra.mxu1 %v13435_v13  ;;  %v13494_v13 = vld [vmem:[%s18987_s2 + $0x734] ss:$48 sps:$4 sm:$0xff]  }
 0x268   :  { %6290 = vmatprep.subr.bf16.mxu0 %v13440_v14  ;;  %6419 = vmatprep.subr.bf16.mxu1 %v13443_v16  ;;  %v13497_v14 = vld [vmem:[%s18987_s2 + $0x73c] ss:$48 sps:$4 sm:$0xff]   ;;  %v13492_v16 = vld [vmem:[%s18987_s2 + $0x730] ss:$48 sps:$4 sm:$0xff]  }
 0x26b   :  { %6291 = vmatpush1.bf16.msra.mxu0 %v13438_v17  ;;  %6420 = vmatpush1.bf16.msra.mxu1 %v13441_v18  ;;  %v13495_v17 = vld [vmem:[%s18987_s2 + $0x738] ss:$48 sps:$4 sm:$0xff]   ;;  %v13500_v18 = vld [vmem:[%s18987_s2 + $0x794] ss:$48 sps:$4 sm:$0xff]  }
 0x26c   :  { %6292 = vmatprep.subr.bf16.mxu0 %v13446_v19  ;;  %6421 = vmatprep.subr.bf16.mxu1 %v13449_v20  ;;  %v13503_v19 = vld [vmem:[%s18987_s2 + $0x79c] ss:$48 sps:$4 sm:$0xff]   ;;  %v13498_v20 = vld [vmem:[%s18987_s2 + $0x790] ss:$48 sps:$4 sm:$0xff]  }
 0x26f   :  { %6293 = vmatpush1.bf16.msra.mxu0 %v13444_v21  ;;  %6422 = vmatpush1.bf16.msra.mxu1 %v13447_v22  ;;  %v13501_v21 = vld [vmem:[%s18987_s2 + $0x798] ss:$48 sps:$4 sm:$0xff]   ;;  %v13506_v22 = vld [vmem:[%s18987_s2 + $0x7f4] ss:$48 sps:$4 sm:$0xff]  }
 0x270   :  { %6294 = vmatprep.subr.bf16.mxu0 %v13452_v23  ;;  %6423 = vmatprep.subr.bf16.mxu1 %v13455_v24  ;;  %v13509_v23 = vld [vmem:[%s18987_s2 + $0x7fc] ss:$48 sps:$4 sm:$0xff]   ;;  %v13504_v24 = vld [vmem:[%s18987_s2 + $0x7f0] ss:$48 sps:$4 sm:$0xff]  }
 0x273   :  { %6295 = vmatpush1.bf16.msra.mxu0 %v13450_v25  ;;  %6424 = vmatpush1.bf16.msra.mxu1 %v13453_v26  ;;  %v13507_v25 = vld [vmem:[%s18987_s2 + $0x7f8] ss:$48 sps:$4 sm:$0xff]   ;;  %v13512_v26 = vld [vmem:[%s18987_s2 + $0x854] ss:$48 sps:$4 sm:$0xff]  }
 0x274   :  { %6296 = vmatprep.subr.bf16.mxu0 %v13458_v27  ;;  %6425 = vmatprep.subr.bf16.mxu1 %v13461_v28  ;;  %v13515_v27 = vld [vmem:[%s18987_s2 + $0x85c] ss:$48 sps:$4 sm:$0xff]   ;;  %v13510_v28 = vld [vmem:[%s18987_s2 + $0x850] ss:$48 sps:$4 sm:$0xff]  }
 0x277   :  { %6297 = vmatpush1.bf16.msra.mxu0 %v13456_v30  ;;  %6426 = vmatpush1.bf16.msra.mxu1 %v13459_v31  ;;  %v13513_v30 = vld [vmem:[%s18987_s2 + $0x858] ss:$48 sps:$4 sm:$0xff]   ;;  %v13518_v31 = vld [vmem:[%s18987_s2 + $0x8b4] ss:$48 sps:$4 sm:$0xff]  }
 0x278   :  { %6298 = vmatprep.subr.bf16.mxu0 %v13464_v32  ;;  %6427 = vmatprep.subr.bf16.mxu1 %v13467_v33  ;;  %v13521_v32 = vld [vmem:[%s18987_s2 + $0x8bc] ss:$48 sps:$4 sm:$0xff]   ;;  %v13516_v33 = vld [vmem:[%s18987_s2 + $0x8b0] ss:$48 sps:$4 sm:$0xff]  }
 0x27b   :  { %6299 = vmatpush1.bf16.msra.mxu0 %v13462_v34  ;;  %6428 = vmatpush1.bf16.msra.mxu1 %v13465_v35  ;;  %v13519_v34 = vld [vmem:[%s18987_s2 + $0x8b8] ss:$48 sps:$4 sm:$0xff]   ;;  %v13524_v35 = vld [vmem:[%s18987_s2 + $0x914] ss:$48 sps:$4 sm:$0xff]  }
 0x27c   :  { %6300 = vmatprep.subr.bf16.mxu0 %v13470_v36  ;;  %6429 = vmatprep.subr.bf16.mxu1 %v13473_v47  ;;  %v13527_v36 = vld [vmem:[%s18987_s2 + $0x91c] ss:$48 sps:$4 sm:$0xff]   ;;  %v13522_v47 = vld [vmem:[%s18987_s2 + $0x910] ss:$48 sps:$4 sm:$0xff]  }
 0x27f   :  { %6301 = vmatpush1.bf16.msra.mxu0 %v13468_v37  ;;  %6430 = vmatpush1.bf16.msra.mxu1 %v13471_v38  ;;  %v13525_v37 = vld [vmem:[%s18987_s2 + $0x918] ss:$48 sps:$4 sm:$0xff]   ;;  %v13530_v38 = vld [vmem:[%s18987_s2 + $0x974] ss:$48 sps:$4 sm:$0xff]  }
 0x280   :  { %6313 = vmatprep.subr.bf16.mxu0 %v13476_v29  ;;  %6442 = vmatprep.subr.bf16.mxu1 %v13479_v39  ;;  %v13533_v29 = vld [vmem:[%s18987_s2 + $0x97c] ss:$48 sps:$4 sm:$0xff]   ;;  %v13528_v39 = vld [vmem:[%s18987_s2 + $0x970] ss:$48 sps:$4 sm:$0xff]  }
 0x282   :  { %6303 = vmatmul.mubr.bf16.vlgmr.msra.gmra.mrb[16].mxu0 %v14592_v53  ;;  %6432 = vmatmul.mubr.bf16.vlgmr.msra.gmra.mrb[16].mxu1 %v14592_v53  ;;  %v13537_v53 = vld [vmem:[%s18987_s2 + $0x9d8] ss:$48 sps:$4 sm:$0xff]  }
 0x283   :  { %6314 = vmatpush1.bf16.msra.mxu0 %v13474_v40  ;;  %6443 = vmatpush1.bf16.msra.mxu1 %v13477_v43  ;;  %v13531_v40 = vld [vmem:[%s18987_s2 + $0x978] ss:$48 sps:$4 sm:$0xff]   ;;  %v13536_v43 = vld [vmem:[%s18987_s2 + $0x9d4] ss:$48 sps:$4 sm:$0xff]  }
 0x284   :  { %6315 = vmatprep.subr.bf16.mxu0 %v13482_v49  ;;  %6444 = vmatprep.subr.bf16.mxu1 %v13485_v50  ;;  %v13539_v49 = vld [vmem:[%s18987_s2 + $0x9dc] ss:$48 sps:$4 sm:$0xff]   ;;  %v13534_v50 = vld [vmem:[%s18987_s2 + $0x9d0] ss:$48 sps:$4 sm:$0xff]  }
 0x285   :  { %v16724_v60 = vpop.f32.mrb[8].mxu0  ;;  %v16726_v1 = vpop.f32.mrb[8].mxu1  ;;  %6345 = vmatprep.mubr.bf16.mxu0 %v14593_v2  ;;  %6474 = vmatprep.mubr.bf16.mxu1 %v14593_v2  ;;  %v13548_v2 = vld [vmem:[%s18987_s2 + $0xa94] ss:$48 sps:$4 sm:$0xff]  }
 0x286   :  { %v16731_v5 = vpop.f32.mrb[9].mxu0  ;;  %v16733_v6 = vpop.f32.mrb[9].mxu1 }
 0x287   :  { %v16735_v7 = vpop.f32.mrb[10].mxu0  ;;  %v16737_v8 = vpop.f32.mrb[10].mxu1  ;;  %6316 = vmatpush1.bf16.msra.mxu0 %v13480_v54  ;;  %6445 = vmatpush1.bf16.msra.mxu1 %v13483_v55  ;;  %v13542_v54 = vld [vmem:[%s18987_s2 + $0xa34] ss:$48 sps:$4 sm:$0xff]   ;;  %v13545_v55 = vld [vmem:[%s18987_s2 + $0xa3c] ss:$48 sps:$4 sm:$0xff]  }
 0x288   :  { %v16745_v11 = vpop.f32.mrb[11].mxu0  ;;  %v16747_v12 = vpop.f32.mrb[11].mxu1  ;;  %6317 = vmatprep.subr.bf16.mxu0 %v13488_v56  ;;  %6446 = vmatprep.subr.bf16.mxu1 %v13491_v57  ;;  %v13540_v56 = vld [vmem:[%s18987_s2 + $0xa30] ss:$48 sps:$4 sm:$0xff]   ;;  %v13543_v57 = vld [vmem:[%s18987_s2 + $0xa38] ss:$48 sps:$4 sm:$0xff]  }
 0x28b   :  { %6318 = vmatpush1.bf16.msra.mxu0 %v13486_v9  ;;  %6447 = vmatpush1.bf16.msra.mxu1 %v13489_v10  ;;  %v13551_v9 = vld [vmem:[%s18987_s2 + $0xa9c] ss:$48 sps:$4 sm:$0xff]   ;;  %v13546_v10 = vld [vmem:[%s18987_s2 + $0xa90] ss:$48 sps:$4 sm:$0xff]  }
 0x28c   :  { %6319 = vmatprep.subr.bf16.mxu0 %v13494_v13  ;;  %6448 = vmatprep.subr.bf16.mxu1 %v13497_v14  ;;  %v13549_v13 = vld [vmem:[%s18987_s2 + $0xa98] ss:$48 sps:$4 sm:$0xff]   ;;  %v13554_v14 = vld [vmem:[%s18987_s2 + $0xaf4] ss:$48 sps:$4 sm:$0xff]  }
 0x28f   :  { %6320 = vmatpush1.bf16.msra.mxu0 %v13492_v16  ;;  %6449 = vmatpush1.bf16.msra.mxu1 %v13495_v17  ;;  %v13557_v16 = vld [vmem:[%s18987_s2 + $0xafc] ss:$48 sps:$4 sm:$0xff]   ;;  %v13552_v17 = vld [vmem:[%s18987_s2 + $0xaf0] ss:$48 sps:$4 sm:$0xff]  }
 0x290   :  { %6321 = vmatprep.subr.bf16.mxu0 %v13500_v18  ;;  %6450 = vmatprep.subr.bf16.mxu1 %v13503_v19  ;;  %v13555_v18 = vld [vmem:[%s18987_s2 + $0xaf8] ss:$48 sps:$4 sm:$0xff]   ;;  %v13560_v19 = vld [vmem:[%s18987_s2 + $0xb54] ss:$48 sps:$4 sm:$0xff]  }
 0x293   :  { %6322 = vmatpush1.bf16.msra.mxu0 %v13498_v20  ;;  %6451 = vmatpush1.bf16.msra.mxu1 %v13501_v21  ;;  %v13563_v20 = vld [vmem:[%s18987_s2 + $0xb5c] ss:$48 sps:$4 sm:$0xff]   ;;  %v13558_v21 = vld [vmem:[%s18987_s2 + $0xb50] ss:$48 sps:$4 sm:$0xff]  }
 0x294   :  { %6323 = vmatprep.subr.bf16.mxu0 %v13506_v22  ;;  %6452 = vmatprep.subr.bf16.mxu1 %v13509_v23  ;;  %v13561_v22 = vld [vmem:[%s18987_s2 + $0xb58] ss:$48 sps:$4 sm:$0xff]   ;;  %v13566_v23 = vld [vmem:[%s18987_s2 + $0xbb4] ss:$48 sps:$4 sm:$0xff]  }
 0x297   :  { %6324 = vmatpush1.bf16.msra.mxu0 %v13504_v24  ;;  %6453 = vmatpush1.bf16.msra.mxu1 %v13507_v25  ;;  %v13569_v24 = vld [vmem:[%s18987_s2 + $0xbbc] ss:$48 sps:$4 sm:$0xff]   ;;  %v13564_v25 = vld [vmem:[%s18987_s2 + $0xbb0] ss:$48 sps:$4 sm:$0xff]  }
 0x298   :  { %6325 = vmatprep.subr.bf16.mxu0 %v13512_v26  ;;  %6454 = vmatprep.subr.bf16.mxu1 %v13515_v27  ;;  %v13567_v26 = vld [vmem:[%s18987_s2 + $0xbb8] ss:$48 sps:$4 sm:$0xff]   ;;  %v13572_v27 = vld [vmem:[%s18987_s2 + $0xc14] ss:$48 sps:$4 sm:$0xff]  }
 0x29b   :  { %6326 = vmatpush1.bf16.msra.mxu0 %v13510_v28  ;;  %6455 = vmatpush1.bf16.msra.mxu1 %v13513_v30  ;;  %v13575_v28 = vld [vmem:[%s18987_s2 + $0xc1c] ss:$48 sps:$4 sm:$0xff]   ;;  %v13570_v30 = vld [vmem:[%s18987_s2 + $0xc10] ss:$48 sps:$4 sm:$0xff]  }
 0x29c   :  { %6327 = vmatprep.subr.bf16.mxu0 %v13518_v31  ;;  %6456 = vmatprep.subr.bf16.mxu1 %v13521_v32  ;;  %v13573_v31 = vld [vmem:[%s18987_s2 + $0xc18] ss:$48 sps:$4 sm:$0xff]   ;;  %v13578_v32 = vld [vmem:[%s18987_s2 + $0xc74] ss:$48 sps:$4 sm:$0xff]  }
 0x29f   :  { %6328 = vmatpush1.bf16.msra.mxu0 %v13516_v33  ;;  %6457 = vmatpush1.bf16.msra.mxu1 %v13519_v34  ;;  %v13581_v33 = vld [vmem:[%s18987_s2 + $0xc7c] ss:$48 sps:$4 sm:$0xff]   ;;  %v16924_v34 = vmul.f32 -1.442695, %v15790_v58 }
 0x2a0   :  { %6329 = vmatprep.subr.bf16.mxu0 %v13524_v35  ;;  %6458 = vmatprep.subr.bf16.mxu1 %v13527_v36  ;;  %v16927_v35 = vmul.f32 -1.442695, %v15792_v59  ;;  %v14594_v36 = vld [vmem:[%s18985_s0 + $0x8] ss:$20 sps:$4 sm:$0xff]  }
 0x2a1   :  { %14482 = vpow2.f32 %v16924_v34  ;;  %v13642_v34 = vld [vmem:[%s18987_s2 + $0x320] ss:$48 sps:$4 sm:$0xff]  }
 0x2a2   :  { %14484 = vpow2.f32 %v16927_v35  ;;  %v13645_v35 = vld [vmem:[%s18987_s2 + $0x328] ss:$48 sps:$4 sm:$0xff]  }
 0x2a3   :  { %6330 = vmatpush1.bf16.msra.mxu0 %v13522_v47  ;;  %6459 = vmatpush1.bf16.msra.mxu1 %v13525_v37  ;;  %v13576_v47 = vld [vmem:[%s18987_s2 + $0xc70] ss:$48 sps:$4 sm:$0xff]   ;;  %v13579_v37 = vld [vmem:[%s18987_s2 + $0xc78] ss:$48 sps:$4 sm:$0xff]  }
 0x2a4   :  { %6331 = vmatprep.subr.bf16.mxu0 %v13530_v38  ;;  %6460 = vmatprep.subr.bf16.mxu1 %v13533_v29  ;;  %v13584_v38 = vld [vmem:[%s18987_s2 + $0xcd4] ss:$48 sps:$4 sm:$0xff]   ;;  %v13587_v29 = vld [vmem:[%s18987_s2 + $0xcdc] ss:$48 sps:$4 sm:$0xff]  }
 0x2a7   :  { %6332 = vmatpush1.bf16.msra.mxu0 %v13528_v39  ;;  %6461 = vmatpush1.bf16.msra.mxu1 %v13531_v40  ;;  %v16945_v39 = vmul.f32 -1.442695, %v15797_v61  ;;  %v13582_v40 = vld [vmem:[%s18987_s2 + $0xcd0] ss:$48 sps:$4 sm:$0xff]  }
 0x2a8   :  { %6333 = vmatprep.subr.bf16.mxu0 %v13536_v43  ;;  %6462 = vmatprep.subr.bf16.mxu1 %v13539_v49  ;;  %v13585_v43 = vld [vmem:[%s18987_s2 + $0xcd8] ss:$48 sps:$4 sm:$0xff]   ;;  %v13590_v49 = vld [vmem:[%s18987_s2 + $0xd34] ss:$48 sps:$4 sm:$0xff]  }
 0x2a9   :  { %14486 = vpow2.f32 %v16945_v39  ;;  %v13651_v39 = vld [vmem:[%s18987_s2 + $0x388] ss:$48 sps:$4 sm:$0xff]  }
 0x2ab   :  { %6334 = vmatpush1.bf16.msra.mxu0 %v13534_v50  ;;  %6463 = vmatpush1.bf16.msra.mxu1 %v13537_v53  ;;  %v13593_v50 = vld [vmem:[%s18987_s2 + $0xd3c] ss:$48 sps:$4 sm:$0xff]   ;;  %v13588_v53 = vld [vmem:[%s18987_s2 + $0xd30] ss:$48 sps:$4 sm:$0xff]  }
 0x2ac   :  { %6335 = vmatprep.subr.bf16.mxu0 %v13542_v54  ;;  %6464 = vmatprep.subr.bf16.mxu1 %v13545_v55  ;;  %v13591_v54 = vld [vmem:[%s18987_s2 + $0xd38] ss:$48 sps:$4 sm:$0xff]   ;;  %v13596_v55 = vld [vmem:[%s18987_s2 + $0x24] ss:$48 sps:$4 sm:$0xff]  }
 0x2af   :  { %6336 = vmatpush1.bf16.msra.mxu0 %v13540_v56  ;;  %6465 = vmatpush1.bf16.msra.mxu1 %v13543_v57  ;;  %v13599_v56 = vld [vmem:[%s18987_s2 + $0x2c] ss:$48 sps:$4 sm:$0xff]   ;;  %v13594_v57 = vld [vmem:[%s18987_s2 + $0x20] ss:$48 sps:$4 sm:$0xff]  }
 0x2b0   :  { %6337 = vmatprep.subr.bf16.mxu0 %v13548_v2  ;;  %6466 = vmatprep.subr.bf16.mxu1 %v13551_v9  ;;  %v13597_v2 = vld [vmem:[%s18987_s2 + $0x28] ss:$48 sps:$4 sm:$0xff]   ;;  %v13602_v9 = vld [vmem:[%s18987_s2 + $0x84] ss:$48 sps:$4 sm:$0xff]  }
 0x2b3   :  { %6338 = vmatpush1.bf16.msra.mxu0 %v13546_v10  ;;  %6467 = vmatpush1.bf16.msra.mxu1 %v13549_v13  ;;  %v13605_v10 = vld [vmem:[%s18987_s2 + $0x8c] ss:$48 sps:$4 sm:$0xff]   ;;  %v14595_v13 = vld [vmem:[%s18985_s0 + $0x10] ss:$20 sps:$4 sm:$0xff]  }
 0x2b4   :  { %6339 = vmatprep.subr.bf16.mxu0 %v13554_v14  ;;  %6468 = vmatprep.subr.bf16.mxu1 %v13557_v16  ;;  %v13600_v14 = vld [vmem:[%s18987_s2 + $0x80] ss:$48 sps:$4 sm:$0xff]   ;;  %v13603_v16 = vld [vmem:[%s18987_s2 + $0x88] ss:$48 sps:$4 sm:$0xff]  }
 0x2b7   :  { %6340 = vmatpush1.bf16.msra.mxu0 %v13552_v17  ;;  %6469 = vmatpush1.bf16.msra.mxu1 %v13555_v18  ;;  %v13608_v17 = vld [vmem:[%s18987_s2 + $0xe4] ss:$48 sps:$4 sm:$0xff]   ;;  %v13611_v18 = vld [vmem:[%s18987_s2 + $0xec] ss:$48 sps:$4 sm:$0xff]  }
 0x2b8   :  { %6341 = vmatprep.subr.bf16.mxu0 %v13560_v19  ;;  %6470 = vmatprep.subr.bf16.mxu1 %v13563_v20  ;;  %v14596_v19 = vld [vmem:[%s18985_s0 + $0x4] ss:$20 sps:$4 sm:$0xff]   ;;  %v13606_v20 = vld [vmem:[%s18987_s2 + $0xe0] ss:$48 sps:$4 sm:$0xff]  }
 0x2bb   :  { %6342 = vmatpush1.bf16.msra.mxu0 %v13558_v21  ;;  %6471 = vmatpush1.bf16.msra.mxu1 %v13561_v22  ;;  %v13609_v21 = vld [vmem:[%s18987_s2 + $0xe8] ss:$48 sps:$4 sm:$0xff]   ;;  %v13614_v22 = vld [vmem:[%s18987_s2 + $0x144] ss:$48 sps:$4 sm:$0xff]  }
 0x2bc   :  { %6343 = vmatprep.subr.bf16.mxu0 %v13566_v23  ;;  %6472 = vmatprep.subr.bf16.mxu1 %v13569_v24  ;;  %v13617_v23 = vld [vmem:[%s18987_s2 + $0x14c] ss:$48 sps:$4 sm:$0xff]   ;;  %v13612_v24 = vld [vmem:[%s18987_s2 + $0x140] ss:$48 sps:$4 sm:$0xff]  }
 0x2bf   :  { %6344 = vmatpush1.bf16.msra.mxu0 %v13564_v25  ;;  %6473 = vmatpush1.bf16.msra.mxu1 %v13567_v26  ;;  %v13615_v25 = vld [vmem:[%s18987_s2 + $0x148] ss:$48 sps:$4 sm:$0xff]   ;;  %v13620_v26 = vld [vmem:[%s18987_s2 + $0x1a4] ss:$48 sps:$4 sm:$0xff]  }
 0x2c0   :  { %6356 = vmatprep.subr.bf16.mxu0 %v13572_v27  ;;  %6485 = vmatprep.subr.bf16.mxu1 %v13575_v28  ;;  %v13623_v27 = vld [vmem:[%s18987_s2 + $0x1ac] ss:$48 sps:$4 sm:$0xff]   ;;  %v13618_v28 = vld [vmem:[%s18987_s2 + $0x1a0] ss:$48 sps:$4 sm:$0xff]  }
 0x2c2   :  { %6346 = vmatmul.mubr.bf16.vlgmr.msra.gmra.mrb[16].mxu0 %v14594_v36  ;;  %6475 = vmatmul.mubr.bf16.vlgmr.msra.gmra.mrb[16].mxu1 %v14594_v36  ;;  %v11743_v36 = vmul.f32 -1.442695, %v15801_v63 }
 0x2c3   :  { %6357 = vmatpush1.bf16.msra.mxu0 %v13570_v30  ;;  %6486 = vmatpush1.bf16.msra.mxu1 %v13573_v31  ;;  %v13621_v30 = vld [vmem:[%s18987_s2 + $0x1a8] ss:$48 sps:$4 sm:$0xff]   ;;  %v13626_v31 = vld [vmem:[%s18987_s2 + $0x204] ss:$48 sps:$4 sm:$0xff]  }
 0x2c4   :  { %6358 = vmatprep.subr.bf16.mxu0 %v13578_v32  ;;  %6487 = vmatprep.subr.bf16.mxu1 %v13581_v33  ;;  %v13629_v32 = vld [vmem:[%s18987_s2 + $0x20c] ss:$48 sps:$4 sm:$0xff]   ;;  %v11734_v33 = vmul.f32 -1.442695, %v15799_v62 }
 0x2c5   :  { %6388 = vmatprep.mubr.bf16.mxu0 %v14625_v15  ;;  %6517 = vmatprep.mubr.bf16.mxu1 %v14625_v15 }
 0x2c6   :  { %14488 = vpow2.f32 %v11734_v33 }
 0x2c7   :  { %6359 = vmatpush1.bf16.msra.mxu0 %v13576_v47  ;;  %6488 = vmatpush1.bf16.msra.mxu1 %v13579_v37  ;;  %v13624_v47 = vld [vmem:[%s18987_s2 + $0x200] ss:$48 sps:$4 sm:$0xff]   ;;  %v13627_v37 = vld [vmem:[%s18987_s2 + $0x208] ss:$48 sps:$4 sm:$0xff]   ;;  %14490 = vpow2.f32 %v11743_v36  ;;  %v13668_v36 = vld [vmem:[%s18987_s2 + $0x4a4] ss:$48 sps:$4 sm:$0xff]  }
 0x2c8   :  { %6360 = vmatprep.subr.bf16.mxu0 %v13584_v38  ;;  %6489 = vmatprep.subr.bf16.mxu1 %v13587_v29  ;;  %v13632_v38 = vld [vmem:[%s18987_s2 + $0x264] ss:$48 sps:$4 sm:$0xff]   ;;  %v13635_v29 = vld [vmem:[%s18987_s2 + $0x26c] ss:$48 sps:$4 sm:$0xff]  }
 0x2cb   :  { %6361 = vmatpush1.bf16.msra.mxu0 %v13582_v40  ;;  %6490 = vmatpush1.bf16.msra.mxu1 %v13585_v43  ;;  %v13630_v40 = vld [vmem:[%s18987_s2 + $0x260] ss:$48 sps:$4 sm:$0xff]   ;;  %v13633_v43 = vld [vmem:[%s18987_s2 + $0x268] ss:$48 sps:$4 sm:$0xff]  }
 0x2cc   :  { %6362 = vmatprep.subr.bf16.mxu0 %v13590_v49  ;;  %6491 = vmatprep.subr.bf16.mxu1 %v13593_v50  ;;  %v11745_v49 = vmul.f32 -1.442695, %v15803_v0  ;;  %v13638_v50 = vld [vmem:[%s18987_s2 + $0x2c4] ss:$48 sps:$4 sm:$0xff]  }
 0x2ce   :  { %14492 = vpow2.f32 %v11745_v49 }
 0x2cf   :  { %6363 = vmatpush1.bf16.msra.mxu0 %v13588_v53  ;;  %6492 = vmatpush1.bf16.msra.mxu1 %v13591_v54  ;;  %v13641_v53 = vld [vmem:[%s18987_s2 + $0x2cc] ss:$48 sps:$4 sm:$0xff]   ;;  %v13636_v54 = vld [vmem:[%s18987_s2 + $0x2c0] ss:$48 sps:$4 sm:$0xff]  }
 0x2d0   :  { %6528 = vmatprep.subr.bf16.mxu0 %v13596_v55  ;;  %6657 = vmatprep.subr.bf16.mxu1 %v13599_v56  ;;  %v13639_v55 = vld [vmem:[%s18987_s2 + $0x2c8] ss:$48 sps:$4 sm:$0xff]   ;;  %v11744_v56 = vmul.f32 -1.442695, %v15811_v3 }
 0x2d2   :  { %11727 = vmatmul.mubr.msk.bf16.vlgmr.msra.gmra.mrb[16].mxu0 %vm2642_vm0, %v14595_v13  ;;  %11728 = vmatmul.mubr.msk.bf16.vlgmr.msra.gmra.mrb[16].mxu1 %vm2642_vm0, %v14595_v13  ;;  %v13653_v13 = vld [vmem:[%s18987_s2 + $0x38c] ss:$48 sps:$4 sm:$0xff]   ;;  %14494 = vpow2.f32 %v11744_v56  ;;  %v13675_v56 = vld [vmem:[%s18987_s2 + $0x508] ss:$48 sps:$4 sm:$0xff]  }
 0x2d3   :  { %6529 = vmatpush1.bf16.msra.mxu0 %v13594_v57  ;;  %6658 = vmatpush1.bf16.msra.mxu1 %v13597_v2  ;;  %v13644_v57 = vld [vmem:[%s18987_s2 + $0x324] ss:$48 sps:$4 sm:$0xff]   ;;  %v13647_v2 = vld [vmem:[%s18987_s2 + $0x32c] ss:$48 sps:$4 sm:$0xff]  }
 0x2d4   :  { %6530 = vmatprep.subr.bf16.mxu0 %v13602_v9  ;;  %6659 = vmatprep.subr.bf16.mxu1 %v13605_v10  ;;  %v11746_v9 = vmul.f32 -1.442695, %v15813_v4  ;;  %v13650_v10 = vld [vmem:[%s18987_s2 + $0x384] ss:$48 sps:$4 sm:$0xff]  }
 0x2d5   :  { %6560 = vmatprep.mubr.bf16.mxu0 %v14596_v19  ;;  %6689 = vmatprep.mubr.bf16.mxu1 %v14596_v19 }
 0x2d6   :  { %14496 = vpow2.f32 %v11746_v9  ;;  %v13678_v9 = vld [vmem:[%s18987_s2 + $0x560] ss:$48 sps:$4 sm:$0xff]  }
 0x2d7   :  { %6531 = vmatpush1.bf16.msra.mxu0 %v13600_v14  ;;  %6660 = vmatpush1.bf16.msra.mxu1 %v13603_v16  ;;  %v13648_v14 = vld [vmem:[%s18987_s2 + $0x380] ss:$48 sps:$4 sm:$0xff]   ;;  %v14483_v16 = vpop.eup %14482 }
 0x2d8   :  { %6532 = vmatprep.subr.bf16.mxu0 %v13608_v17  ;;  %6661 = vmatprep.subr.bf16.mxu1 %v13611_v18  ;;  %v13656_v17 = vld [vmem:[%s18987_s2 + $0x3e4] ss:$48 sps:$4 sm:$0xff]   ;;  %v13659_v18 = vld [vmem:[%s18987_s2 + $0x3ec] ss:$48 sps:$4 sm:$0xff]   ;;  %v14485_v19 = vpop.eup %14484 }
 0x2db   :  { %6533 = vmatpush1.bf16.msra.mxu0 %v13606_v20  ;;  %6662 = vmatpush1.bf16.msra.mxu1 %v13609_v21  ;;  %v13654_v20 = vld [vmem:[%s18987_s2 + $0x3e0] ss:$48 sps:$4 sm:$0xff]   ;;  %v13657_v21 = vld [vmem:[%s18987_s2 + $0x3e8] ss:$48 sps:$4 sm:$0xff]  }
 0x2dc   :  { %6534 = vmatprep.subr.bf16.mxu0 %v13614_v22  ;;  %6663 = vmatprep.subr.bf16.mxu1 %v13617_v23  ;;  %v14487_v22 = vpop.eup %14486  ;;  %v6858_v23 = vadd.f32 1.0, %v14483_v16  ;;  %v13687_v16 = vld [vmem:[%s18987_s2 + $0x5c8] ss:$48 sps:$4 sm:$0xff]  }
 0x2de   :  { %14498 = vrcp.f32 %v6858_v23 }
 0x2df   :  { %6535 = vmatpush1.bf16.msra.mxu0 %v13612_v24  ;;  %6664 = vmatpush1.bf16.msra.mxu1 %v13615_v25  ;;  %v6860_v24 = vadd.f32 1.0, %v14485_v19  ;;  %v13662_v25 = vld [vmem:[%s18987_s2 + $0x444] ss:$48 sps:$4 sm:$0xff]  }
 0x2e0   :  { %6536 = vmatprep.subr.bf16.mxu0 %v13620_v26  ;;  %6665 = vmatprep.subr.bf16.mxu1 %v13623_v27  ;;  %v13665_v26 = vld [vmem:[%s18987_s2 + $0x44c] ss:$48 sps:$4 sm:$0xff]   ;;  %v14489_v27 = vpop.eup %14488 }
 0x2e1   :  { %v6861_v33 = vadd.f32 1.0, %v14489_v27  ;;  %14500 = vrcp.f32 %v6860_v24 }
 0x2e3   :  { %6537 = vmatpush1.bf16.msra.mxu0 %v13618_v28  ;;  %6666 = vmatpush1.bf16.msra.mxu1 %v13621_v30  ;;  %v13660_v28 = vld [vmem:[%s18987_s2 + $0x440] ss:$48 sps:$4 sm:$0xff]   ;;  %v13663_v30 = vld [vmem:[%s18987_s2 + $0x448] ss:$48 sps:$4 sm:$0xff]  }
 0x2e4   :  { %6538 = vmatprep.subr.bf16.mxu0 %v13626_v31  ;;  %6667 = vmatprep.subr.bf16.mxu1 %v13629_v32  ;;  %v14491_v31 = vpop.eup %14490  ;;  %v6859_v32 = vadd.f32 1.0, %v14487_v22 }
 0x2e6   :  { %14502 = vrcp.f32 %v6859_v32  ;;  %v14597_v32 = vld [vmem:[%s18985_s0] ss:$20 sps:$4 sm:$0xff]  }
 0x2e7   :  { %6539 = vmatpush1.bf16.msra.mxu0 %v13624_v47  ;;  %6668 = vmatpush1.bf16.msra.mxu1 %v13627_v37  ;;  %v13671_v47 = vld [vmem:[%s18987_s2 + $0x4ac] ss:$48 sps:$4 sm:$0xff]   ;;  %v14493_v37 = vpop.eup %14492  ;;  %14504 = vrcp.f32 %v6861_v33 }
 0x2e8   :  { %6540 = vmatprep.subr.bf16.mxu0 %v13632_v38  ;;  %6669 = vmatprep.subr.bf16.mxu1 %v13635_v29  ;;  %v13666_v38 = vld [vmem:[%s18987_s2 + $0x4a0] ss:$48 sps:$4 sm:$0xff]   ;;  %v13669_v29 = vld [vmem:[%s18987_s2 + $0x4a8] ss:$48 sps:$4 sm:$0xff]   ;;  %v6872_v49 = vadd.f32 1.0, %v14493_v37 }
 0x2eb   :  { %6541 = vmatpush1.bf16.msra.mxu0 %v13630_v40  ;;  %6670 = vmatpush1.bf16.msra.mxu1 %v13633_v43  ;;  %v14495_v40 = vpop.eup %14494  ;;  %v6870_v43 = vadd.f32 1.0, %v14491_v31 }
 0x2ec   :  { %6542 = vmatprep.subr.bf16.mxu0 %v13638_v50  ;;  %6671 = vmatprep.subr.bf16.mxu1 %v13641_v53  ;;  %v13674_v50 = vld [vmem:[%s18987_s2 + $0x504] ss:$48 sps:$4 sm:$0xff]   ;;  %v13677_v53 = vld [vmem:[%s18987_s2 + $0x50c] ss:$48 sps:$4 sm:$0xff]  }
 0x2ed   :  { %14506 = vrcp.f32 %v6870_v43 }
 0x2ee   :  { %14508 = vrcp.f32 %v6872_v49 }
 0x2ef   :  { %6543 = vmatpush1.bf16.msra.mxu0 %v13636_v54  ;;  %6672 = vmatpush1.bf16.msra.mxu1 %v13639_v55  ;;  %v14497_v54 = vpop.eup %14496  ;;  %v13672_v55 = vld [vmem:[%s18987_s2 + $0x500] ss:$48 sps:$4 sm:$0xff]  }
 0x2f0   :  { %6544 = vmatprep.subr.bf16.mxu0 %v13644_v57  ;;  %6673 = vmatprep.subr.bf16.mxu1 %v13647_v2  ;;  %v6871_v57 = vadd.f32 1.0, %v14495_v40  ;;  %v6873_v2 = vadd.f32 1.0, %v14497_v54  ;;  %v14499_v19 = vpop.eup %14498  ;;  %v14598_v54 = vld [vmem:[%s18985_s0 + $0xc] ss:$20 sps:$4 sm:$0xff]  }
 0x2f1   :  { %v14501_v22 = vpop.eup %14500 }
 0x2f2   :  { %14510 = vrcp.f32 %v6871_v57  ;;  %v14503_v23 = vpop.eup %14502  ;;  %v6932_v37 = vmul.f32 %v14501_v22, %v15792_v59  ;;  %v13702_v59 = vld [vmem:[%s18987_s2 + $0x6e0] ss:$48 sps:$4 sm:$0xff]  }
 0x2f3   :  { %6545 = vmatpush1.bf16.msra.mxu0 %v13642_v34  ;;  %6674 = vmatpush1.bf16.msra.mxu1 %v13645_v35  ;;  %v13680_v34 = vld [vmem:[%s18987_s2 + $0x564] ss:$48 sps:$4 sm:$0xff]   ;;  %v13683_v35 = vld [vmem:[%s18987_s2 + $0x56c] ss:$48 sps:$4 sm:$0xff]   ;;  %14512 = vrcp.f32 %v6873_v2  ;;  %v14505_v24 = vpop.eup %14504  ;;  %v6931_v40 = vmul.f32 %v14503_v23, %v15797_v61 }
 0x2f4   :  { %6546 = vmatprep.subr.bf16.mxu0 %v13650_v10  ;;  %6675 = vmatprep.subr.bf16.mxu1 %v13653_v13  ;;  %v13681_v10 = vld [vmem:[%s18987_s2 + $0x568] ss:$48 sps:$4 sm:$0xff]   ;;  %v13686_v13 = vld [vmem:[%s18987_s2 + $0x5c4] ss:$48 sps:$4 sm:$0xff]   ;;  %v6933_v43 = vmul.f32 %v14505_v24, %v15799_v62 }
 0x2f5   :  { %v13716_v24 = vld [vmem:[%s18987_s2 + $0x7a4] ss:$48 sps:$4 sm:$0xff]  }
 0x2f7   :  { %6547 = vmatpush1.bf16.msra.mxu0 %v13648_v14  ;;  %6676 = vmatpush1.bf16.msra.mxu1 %v13651_v39  ;;  %v13689_v14 = vld [vmem:[%s18987_s2 + $0x5cc] ss:$48 sps:$4 sm:$0xff]   ;;  %v13684_v39 = vld [vmem:[%s18987_s2 + $0x5c0] ss:$48 sps:$4 sm:$0xff]   ;;  %v14507_v27 = vpop.eup %14506 }
 0x2f8   :  { %6548 = vmatprep.subr.bf16.mxu0 %v13656_v17  ;;  %6677 = vmatprep.subr.bf16.mxu1 %v13659_v18  ;;  %v13692_v17 = vld [vmem:[%s18987_s2 + $0x624] ss:$48 sps:$4 sm:$0xff]   ;;  %v13695_v18 = vld [vmem:[%s18987_s2 + $0x62c] ss:$48 sps:$4 sm:$0xff]   ;;  %v14509_v31 = vpop.eup %14508  ;;  %v6942_v49 = vmul.f32 %v14507_v27, %v15801_v63  ;;  %v13717_v27 = vld [vmem:[%s18987_s2 + $0x7a8] ss:$48 sps:$4 sm:$0xff]  }
 0x2f9   :  { %v6944_v61 = vmul.f32 %v14509_v31, %v15803_v0  ;;  %v13710_v0 = vld [vmem:[%s18987_s2 + $0x744] ss:$48 sps:$4 sm:$0xff]   ;;  %v13720_v31 = vld [vmem:[%s18987_s2 + $0x800] ss:$48 sps:$4 sm:$0xff]  }
 0x2fb   :  { %6549 = vmatpush1.bf16.msra.mxu0 %v13654_v20  ;;  %6678 = vmatpush1.bf16.msra.mxu1 %v13657_v21  ;;  %v13690_v20 = vld [vmem:[%s18987_s2 + $0x620] ss:$48 sps:$4 sm:$0xff]   ;;  %v13693_v21 = vld [vmem:[%s18987_s2 + $0x628] ss:$48 sps:$4 sm:$0xff]  }
 0x2fc   :  { %6550 = vmatprep.subr.bf16.mxu0 %v13662_v25  ;;  %6679 = vmatprep.subr.bf16.mxu1 %v13665_v26  ;;  %v13698_v25 = vld [vmem:[%s18987_s2 + $0x684] ss:$48 sps:$4 sm:$0xff]   ;;  %v13701_v26 = vld [vmem:[%s18987_s2 + $0x68c] ss:$48 sps:$4 sm:$0xff]   ;;  %v14511_v33 = vpop.eup %14510 }
 0x2fd   :  { %v6943_v62 = vmul.f32 %v14511_v33, %v15811_v3  ;;  %v13713_v3 = vld [vmem:[%s18987_s2 + $0x74c] ss:$48 sps:$4 sm:$0xff]   ;;  %v13728_v33 = vld [vmem:[%s18987_s2 + $0x864] ss:$48 sps:$4 sm:$0xff]  }
 0x2ff   :  { %6551 = vmatpush1.bf16.msra.mxu0 %v13660_v28  ;;  %6680 = vmatpush1.bf16.msra.mxu1 %v13663_v30  ;;  %v13696_v28 = vld [vmem:[%s18987_s2 + $0x680] ss:$48 sps:$4 sm:$0xff]   ;;  %v13699_v30 = vld [vmem:[%s18987_s2 + $0x688] ss:$48 sps:$4 sm:$0xff]  }
 0x300   :  { %6552 = vmatprep.subr.bf16.mxu0 %v13668_v36  ;;  %6681 = vmatprep.subr.bf16.mxu1 %v13671_v47  ;;  %v14513_v36 = vpop.eup %14512  ;;  %v6930_v47 = vmul.f32 %v14499_v19, %v15790_v58  ;;  %v13711_v19 = vld [vmem:[%s18987_s2 + $0x748] ss:$48 sps:$4 sm:$0xff]  }
 0x301   :  { %v6945_v2 = vmul.f32 %v14513_v36, %v15813_v4  ;;  %v13731_v36 = vld [vmem:[%s18987_s2 + $0x86c] ss:$48 sps:$4 sm:$0xff]  }
 0x303   :  { %6553 = vmatpush1.bf16.msra.mxu0 %v13666_v38  ;;  %6682 = vmatpush1.bf16.msra.mxu1 %v13669_v29  ;;  %v13704_v38 = vld [vmem:[%s18987_s2 + $0x6e4] ss:$48 sps:$4 sm:$0xff]   ;;  %v13707_v29 = vld [vmem:[%s18987_s2 + $0x6ec] ss:$48 sps:$4 sm:$0xff]  }
 0x304   :  { %6554 = vmatprep.subr.bf16.mxu0 %v13674_v50  ;;  %6683 = vmatprep.subr.bf16.mxu1 %v13677_v53  ;;  %v13705_v53 = vld [vmem:[%s18987_s2 + $0x6e8] ss:$48 sps:$4 sm:$0xff]  }
 0x307   :  { %6555 = vmatpush1.bf16.msra.mxu0 %v13672_v55  ;;  %6684 = vmatpush1.bf16.msra.mxu1 %v13675_v56 }
 0x308   :  { %6556 = vmatprep.subr.bf16.mxu0 %v13680_v34  ;;  %6685 = vmatprep.subr.bf16.mxu1 %v13683_v35 }
 0x30b   :  { %6557 = vmatpush1.bf16.msra.mxu0 %v13678_v9  ;;  %6686 = vmatpush1.bf16.msra.mxu1 %v13681_v10 }
 0x30c   :  { %6558 = vmatprep.subr.bf16.mxu0 %v13686_v13  ;;  %6687 = vmatprep.subr.bf16.mxu1 %v13689_v14 }
 0x30f   :  { %6559 = vmatpush1.bf16.msra.mxu0 %v13684_v39  ;;  %6688 = vmatpush1.bf16.msra.mxu1 %v13687_v16 }
 0x310   :  { %6571 = vmatprep.subr.bf16.mxu0 %v13692_v17  ;;  %6700 = vmatprep.subr.bf16.mxu1 %v13695_v18  ;;  %v13708_v18 = vld [vmem:[%s18987_s2 + $0x740] ss:$48 sps:$4 sm:$0xff]  }
 0x312   :  { %6561 = vmatmul.mubr.bf16.vlgmr.msra.gmra.mrb[20].mxu0 %v14597_v32  ;;  %6690 = vmatmul.mubr.bf16.vlgmr.msra.gmra.mrb[20].mxu1 %v14597_v32  ;;  %v13723_v32 = vld [vmem:[%s18987_s2 + $0x808] ss:$48 sps:$4 sm:$0xff]  }
 0x313   :  { %6572 = vmatpush1.bf16.msra.mxu0 %v13690_v20  ;;  %6701 = vmatpush1.bf16.msra.mxu1 %v13693_v21 }
 0x314   :  { %6573 = vmatprep.subr.bf16.mxu0 %v13698_v25  ;;  %6702 = vmatprep.subr.bf16.mxu1 %v13701_v26  ;;  %v13719_v25 = vld [vmem:[%s18987_s2 + $0x7ac] ss:$48 sps:$4 sm:$0xff]   ;;  %v13714_v26 = vld [vmem:[%s18987_s2 + $0x7a0] ss:$48 sps:$4 sm:$0xff]  }
 0x315   :  { %v6132_v50 = vpop.f32.mrb[12].mxu0  ;;  %v6261_v58 = vpop.f32.mrb[12].mxu1  ;;  %6603 = vmatprep.mubr.bf16.mxu0 %v14598_v54  ;;  %6732 = vmatprep.mubr.bf16.mxu1 %v14598_v54 }
 0x316   :  { %v6954_v63 = vmul.f32 %v6930_v47, %v6132_v50  ;;  %v6956_v55 = vmul.f32 %v6932_v37, %v6261_v58  ;;  %v6134_v56 = vpop.f32.mrb[13].mxu0  ;;  %v6263_v57 = vpop.f32.mrb[13].mxu1 }
 0x317   :  { %v6955_v34 = vmul.f32 %v6931_v40, %v6134_v56  ;;  %v6957_v35 = vmul.f32 %v6933_v43, %v6263_v57  ;;  %v6136_v9 = vpop.f32.mrb[14].mxu0  ;;  %v6265_v10 = vpop.f32.mrb[14].mxu1  ;;  %6574 = vmatpush1.bf16.msra.mxu0 %v13696_v28  ;;  %6703 = vmatpush1.bf16.msra.mxu1 %v13699_v30  ;;  %v13722_v28 = vld [vmem:[%s18987_s2 + $0x804] ss:$48 sps:$4 sm:$0xff]   ;;  %v13725_v30 = vld [vmem:[%s18987_s2 + $0x80c] ss:$48 sps:$4 sm:$0xff]  }
 0x318   :  { %v6966_v13 = vmul.f32 %v6942_v49, %v6136_v9  ;;  %v6968_v14 = vmul.f32 %v6944_v61, %v6265_v10  ;;  %v6138_v39 = vpop.f32.mrb[15].mxu0  ;;  %v6267_v16 = vpop.f32.mrb[15].mxu1  ;;  %6575 = vmatprep.subr.bf16.mxu0 %v13704_v38  ;;  %6704 = vmatprep.subr.bf16.mxu1 %v13707_v29 }
 0x319   :  { %v6967_v4 = vmul.f32 %v6943_v62, %v6138_v39  ;;  %v6969_v17 = vmul.f32 %v6945_v2, %v6267_v16 }
 0x31a   :  { %v17237_v20 = vpack.c.bf16 %v6966_v13, %v6954_v63  ;;  %v17239_v21 = vpack.c.bf16 %v6968_v14, %v6956_v55 }
 0x31b   :  { %v17241_v22 = vpack.c.bf16 %v6967_v4, %v6955_v34  ;;  %v17243_v23 = vpack.c.bf16 %v6969_v17, %v6957_v35  ;;  %6576 = vmatpush1.bf16.msra.mxu0 %v13702_v59  ;;  %6705 = vmatpush1.bf16.msra.mxu1 %v13705_v53 }
 0x31c   :  { %6577 = vmatprep.subr.bf16.mxu0 %v13710_v0  ;;  %6706 = vmatprep.subr.bf16.mxu1 %v13713_v3 }
 0x31f   :  { %6578 = vmatpush1.bf16.msra.mxu0 %v13708_v18  ;;  %6707 = vmatpush1.bf16.msra.mxu1 %v13711_v19 }
 0x320   :  { %6579 = vmatprep.subr.bf16.mxu0 %v13716_v24  ;;  %6708 = vmatprep.subr.bf16.mxu1 %v13719_v25 }
 0x323   :  { %6580 = vmatpush1.bf16.msra.mxu0 %v13714_v26  ;;  %6709 = vmatpush1.bf16.msra.mxu1 %v13717_v27 }
 0x324   :  { %6581 = vmatprep.subr.bf16.mxu0 %v13722_v28  ;;  %6710 = vmatprep.subr.bf16.mxu1 %v13725_v30 }
 0x325   :  { %9 = vsyncpa [#allocation3], 0  ;;  %v13726_v47 = vld [vmem:[%s18987_s2 + $0x860] ss:$48 sps:$4 sm:$0xff]   ;;  %v13729_v37 = vld [vmem:[%s18987_s2 + $0x868] ss:$48 sps:$4 sm:$0xff]  }
 0x326   :  { %v13734_v38 = vld [vmem:[%s18987_s2 + $0x8c4] ss:$48 sps:$4 sm:$0xff]   ;;  %v13737_v29 = vld [vmem:[%s18987_s2 + $0x8cc] ss:$48 sps:$4 sm:$0xff]   ;;  %v13732_v40 = vld [vmem:[%s18987_s2 + $0x8c0] ss:$48 sps:$4 sm:$0xff]  }
 0x327   :  { %6582 = vmatpush1.bf16.msra.mxu0 %v13720_v31  ;;  %6711 = vmatpush1.bf16.msra.mxu1 %v13723_v32  ;;  %v13735_v43 = vld [vmem:[%s18987_s2 + $0x8c8] ss:$48 sps:$4 sm:$0xff]   ;;  %v13740_v49 = vld [vmem:[%s18987_s2 + $0x924] ss:$48 sps:$4 sm:$0xff]   ;;  %v13743_v50 = vld [vmem:[%s18987_s2 + $0x92c] ss:$48 sps:$4 sm:$0xff]  }
 0x328   :  { %6583 = vmatprep.subr.bf16.mxu0 %v13728_v33  ;;  %6712 = vmatprep.subr.bf16.mxu1 %v13731_v36  ;;  %v13738_v58 = vld [vmem:[%s18987_s2 + $0x920] ss:$48 sps:$4 sm:$0xff]   ;;  %v13741_v59 = vld [vmem:[%s18987_s2 + $0x928] ss:$48 sps:$4 sm:$0xff]   ;;  %v13746_v53 = vld [vmem:[%s18987_s2 + $0x984] ss:$48 sps:$4 sm:$0xff]  }
 0x329   :  { %v13749_v54 = vld [vmem:[%s18987_s2 + $0x98c] ss:$48 sps:$4 sm:$0xff]   ;;  %v13744_v61 = vld [vmem:[%s18987_s2 + $0x980] ss:$48 sps:$4 sm:$0xff]   ;;  %v13747_v62 = vld [vmem:[%s18987_s2 + $0x988] ss:$48 sps:$4 sm:$0xff]  }
 0x32a   :  { %v13752_v63 = vld [vmem:[%s18987_s2 + $0x9e4] ss:$48 sps:$4 sm:$0xff]   ;;  %v13755_v55 = vld [vmem:[%s18987_s2 + $0x9ec] ss:$48 sps:$4 sm:$0xff]   ;;  %v13750_v56 = vld [vmem:[%s18987_s2 + $0x9e0] ss:$48 sps:$4 sm:$0xff]  }
 0x32b   :  { %6584 = vmatpush1.bf16.msra.mxu0 %v13726_v47  ;;  %6713 = vmatpush1.bf16.msra.mxu1 %v13729_v37  ;;  %v13753_v57 = vld [vmem:[%s18987_s2 + $0x9e8] ss:$48 sps:$4 sm:$0xff]   ;;  %v13758_v2 = vld [vmem:[%s18987_s2 + $0xa44] ss:$48 sps:$4 sm:$0xff]   ;;  %v13761_v34 = vld [vmem:[%s18987_s2 + $0xa4c] ss:$48 sps:$4 sm:$0xff]  }
 0x32c   :  { %6585 = vmatprep.subr.bf16.mxu0 %v13734_v38  ;;  %6714 = vmatprep.subr.bf16.mxu1 %v13737_v29  ;;  %v13756_v35 = vld [vmem:[%s18987_s2 + $0xa40] ss:$48 sps:$4 sm:$0xff]   ;;  %v13759_v9 = vld [vmem:[%s18987_s2 + $0xa48] ss:$48 sps:$4 sm:$0xff]   ;;  %v13764_v10 = vld [vmem:[%s18987_s2 + $0xaa4] ss:$48 sps:$4 sm:$0xff]  }
 0x32d   :  { %v13767_v13 = vld [vmem:[%s18987_s2 + $0xaac] ss:$48 sps:$4 sm:$0xff]   ;;  %v13762_v14 = vld [vmem:[%s18987_s2 + $0xaa0] ss:$48 sps:$4 sm:$0xff]   ;;  %v13765_v39 = vld [vmem:[%s18987_s2 + $0xaa8] ss:$48 sps:$4 sm:$0xff]  }
 0x32e   :  { %v13770_v16 = vld [vmem:[%s18987_s2 + $0xb04] ss:$48 sps:$4 sm:$0xff]   ;;  %v13773_v0 = vld [vmem:[%s18987_s2 + $0xb0c] ss:$48 sps:$4 sm:$0xff]   ;;  %v13768_v3 = vld [vmem:[%s18987_s2 + $0xb00] ss:$48 sps:$4 sm:$0xff]  }
 0x32f   :  { %6586 = vmatpush1.bf16.msra.mxu0 %v13732_v40  ;;  %6715 = vmatpush1.bf16.msra.mxu1 %v13735_v43  ;;  %v13771_v4 = vld [vmem:[%s18987_s2 + $0xb08] ss:$48 sps:$4 sm:$0xff]   ;;  %v13776_v17 = vld [vmem:[%s18987_s2 + $0xb64] ss:$48 sps:$4 sm:$0xff]   ;;  %v13779_v18 = vld [vmem:[%s18987_s2 + $0xb6c] ss:$48 sps:$4 sm:$0xff]  }
 0x330   :  { %6587 = vmatprep.subr.bf16.mxu0 %v13740_v49  ;;  %6716 = vmatprep.subr.bf16.mxu1 %v13743_v50  ;;  %v13774_v19 = vld [vmem:[%s18987_s2 + $0xb60] ss:$48 sps:$4 sm:$0xff]   ;;  %v13777_v24 = vld [vmem:[%s18987_s2 + $0xb68] ss:$48 sps:$4 sm:$0xff]   ;;  %v13782_v25 = vld [vmem:[%s18987_s2 + $0xbc4] ss:$48 sps:$4 sm:$0xff]  }
 0x331   :  { %v13785_v26 = vld [vmem:[%s18987_s2 + $0xbcc] ss:$48 sps:$4 sm:$0xff]   ;;  %v13780_v27 = vld [vmem:[%s18987_s2 + $0xbc0] ss:$48 sps:$4 sm:$0xff]   ;;  %v13783_v28 = vld [vmem:[%s18987_s2 + $0xbc8] ss:$48 sps:$4 sm:$0xff]  }
 0x332   :  { %v13788_v30 = vld [vmem:[%s18987_s2 + $0xc24] ss:$48 sps:$4 sm:$0xff]   ;;  %v13791_v31 = vld [vmem:[%s18987_s2 + $0xc2c] ss:$48 sps:$4 sm:$0xff]   ;;  %v13786_v32 = vld [vmem:[%s18987_s2 + $0xc20] ss:$48 sps:$4 sm:$0xff]  }
 0x333   :  { %6588 = vmatpush1.bf16.msra.mxu0 %v13738_v58  ;;  %6717 = vmatpush1.bf16.msra.mxu1 %v13741_v59  ;;  %v13789_v33 = vld [vmem:[%s18987_s2 + $0xc28] ss:$48 sps:$4 sm:$0xff]   ;;  %v13794_v36 = vld [vmem:[%s18987_s2 + $0xc84] ss:$48 sps:$4 sm:$0xff]   ;;  %v13797_v47 = vld [vmem:[%s18987_s2 + $0xc8c] ss:$48 sps:$4 sm:$0xff]  }
 0x334   :  { %6589 = vmatprep.subr.bf16.mxu0 %v13746_v53  ;;  %6718 = vmatprep.subr.bf16.mxu1 %v13749_v54  ;;  %v14599_v37 = vld [vmem:[%s18985_s0 + $0x8] ss:$20 sps:$4 sm:$0xff]   ;;  %v13792_v38 = vld [vmem:[%s18987_s2 + $0xc80] ss:$48 sps:$4 sm:$0xff]   ;;  %v13800_v40 = vld [vmem:[%s18987_s2 + $0xce4] ss:$48 sps:$4 sm:$0xff]  }
 0x335   :  { %v13795_v29 = vld [vmem:[%s18987_s2 + $0xc88] ss:$48 sps:$4 sm:$0xff]   ;;  %v13803_v43 = vld [vmem:[%s18987_s2 + $0xcec] ss:$48 sps:$4 sm:$0xff]   ;;  %v13798_v49 = vld [vmem:[%s18987_s2 + $0xce0] ss:$48 sps:$4 sm:$0xff]  }
 0x336   :  { %v13801_v50 = vld [vmem:[%s18987_s2 + $0xce8] ss:$48 sps:$4 sm:$0xff]   ;;  %v13806_v58 = vld [vmem:[%s18987_s2 + $0xd44] ss:$48 sps:$4 sm:$0xff]   ;;  %v13804_v59 = vld [vmem:[%s18987_s2 + $0xd40] ss:$48 sps:$4 sm:$0xff]  }
 0x337   :  { %6590 = vmatpush1.bf16.msra.mxu0 %v13744_v61  ;;  %6719 = vmatpush1.bf16.msra.mxu1 %v13747_v62  ;;  %v13807_v53 = vld [vmem:[%s18987_s2 + $0xd48] ss:$48 sps:$4 sm:$0xff]   ;;  %v13815_v61 = vld [vmem:[%s18988_s3 + $0xc] ss:$20 sps:$4 sm:$0xff]  }
 0x338   :  { %6591 = vmatprep.subr.bf16.mxu0 %v13752_v63  ;;  %6720 = vmatprep.subr.bf16.mxu1 %v13755_v55  ;;  %v13812_v54 = vld [vmem:[%s18988_s3 + $0x4] ss:$20 sps:$4 sm:$0xff]   ;;  %v13810_v62 = vld [vmem:[%s18988_s3] ss:$20 sps:$4 sm:$0xff]   ;;  %v13813_v63 = vld [vmem:[%s18988_s3 + $0x8] ss:$20 sps:$4 sm:$0xff]  }
 0x339   :  { %v13818_v55 = vld [vmem:[%s18988_s3 + $0x2c] ss:$20 sps:$4 sm:$0xff]  }
 0x33b   :  { %6592 = vmatpush1.bf16.msra.mxu0 %v13750_v56  ;;  %6721 = vmatpush1.bf16.msra.mxu1 %v13753_v57  ;;  %v13821_v56 = vld [vmem:[%s18988_s3 + $0x34] ss:$20 sps:$4 sm:$0xff]   ;;  %v14600_v57 = vld [vmem:[%s18985_s0 + $0x10] ss:$20 sps:$4 sm:$0xff]  }
 0x33c   :  { %6593 = vmatprep.subr.bf16.mxu0 %v13758_v2  ;;  %6722 = vmatprep.subr.bf16.mxu1 %v13761_v34  ;;  %v13816_v2 = vld [vmem:[%s18988_s3 + $0x28] ss:$20 sps:$4 sm:$0xff]   ;;  %v13819_v34 = vld [vmem:[%s18988_s3 + $0x30] ss:$20 sps:$4 sm:$0xff]  }
 0x33f   :  { %6594 = vmatpush1.bf16.msra.mxu0 %v13756_v35  ;;  %6723 = vmatpush1.bf16.msra.mxu1 %v13759_v9  ;;  %v13824_v35 = vld [vmem:[%s18988_s3 + $0x54] ss:$20 sps:$4 sm:$0xff]   ;;  %v13827_v9 = vld [vmem:[%s18988_s3 + $0x5c] ss:$20 sps:$4 sm:$0xff]  }
 0x340   :  { %6595 = vmatprep.subr.bf16.mxu0 %v13764_v10  ;;  %6724 = vmatprep.subr.bf16.mxu1 %v13767_v13  ;;  %v13822_v10 = vld [vmem:[%s18988_s3 + $0x50] ss:$20 sps:$4 sm:$0xff]   ;;  %v13825_v13 = vld [vmem:[%s18988_s3 + $0x58] ss:$20 sps:$4 sm:$0xff]  }
 0x343   :  { %6596 = vmatpush1.bf16.msra.mxu0 %v13762_v14  ;;  %6725 = vmatpush1.bf16.msra.mxu1 %v13765_v39  ;;  %v13830_v14 = vld [vmem:[%s18988_s3 + $0x7c] ss:$20 sps:$4 sm:$0xff]   ;;  %v13833_v39 = vld [vmem:[%s18988_s3 + $0x84] ss:$20 sps:$4 sm:$0xff]  }
 0x344   :  { %6597 = vmatprep.subr.bf16.mxu0 %v13770_v16  ;;  %6726 = vmatprep.subr.bf16.mxu1 %v13773_v0  ;;  %v13828_v16 = vld [vmem:[%s18988_s3 + $0x78] ss:$20 sps:$4 sm:$0xff]   ;;  %v13831_v0 = vld [vmem:[%s18988_s3 + $0x80] ss:$20 sps:$4 sm:$0xff]  }
 0x347   :  { %6598 = vmatpush1.bf16.msra.mxu0 %v13768_v3  ;;  %6727 = vmatpush1.bf16.msra.mxu1 %v13771_v4  ;;  %v13836_v3 = vld [vmem:[%s18988_s3 + $0xa4] ss:$20 sps:$4 sm:$0xff]   ;;  %v13839_v4 = vld [vmem:[%s18988_s3 + $0xac] ss:$20 sps:$4 sm:$0xff]  }
 0x348   :  { %6599 = vmatprep.subr.bf16.mxu0 %v13776_v17  ;;  %6728 = vmatprep.subr.bf16.mxu1 %v13779_v18  ;;  %v13834_v17 = vld [vmem:[%s18988_s3 + $0xa0] ss:$20 sps:$4 sm:$0xff]   ;;  %v13837_v18 = vld [vmem:[%s18988_s3 + $0xa8] ss:$20 sps:$4 sm:$0xff]  }
 0x34b   :  { %6600 = vmatpush1.bf16.msra.mxu0 %v13774_v19  ;;  %6729 = vmatpush1.bf16.msra.mxu1 %v13777_v24  ;;  %v13842_v19 = vld [vmem:[%s18988_s3 + $0xcc] ss:$20 sps:$4 sm:$0xff]   ;;  %v13845_v24 = vld [vmem:[%s18988_s3 + $0xd4] ss:$20 sps:$4 sm:$0xff]  }
 0x34c   :  { %6601 = vmatprep.subr.bf16.mxu0 %v13782_v25  ;;  %6730 = vmatprep.subr.bf16.mxu1 %v13785_v26  ;;  %v13840_v25 = vld [vmem:[%s18988_s3 + $0xc8] ss:$20 sps:$4 sm:$0xff]   ;;  %v13843_v26 = vld [vmem:[%s18988_s3 + $0xd0] ss:$20 sps:$4 sm:$0xff]  }
 0x34f   :  { %6602 = vmatpush1.bf16.msra.mxu0 %v13780_v27  ;;  %6731 = vmatpush1.bf16.msra.mxu1 %v13783_v28  ;;  %v13848_v27 = vld [vmem:[%s18988_s3 + $0xf4] ss:$20 sps:$4 sm:$0xff]   ;;  %v13851_v28 = vld [vmem:[%s18988_s3 + $0xfc] ss:$20 sps:$4 sm:$0xff]  }
 0x350   :  { %6614 = vmatprep.subr.bf16.mxu0 %v13788_v30  ;;  %6743 = vmatprep.subr.bf16.mxu1 %v13791_v31  ;;  %v13846_v30 = vld [vmem:[%s18988_s3 + $0xf0] ss:$20 sps:$4 sm:$0xff]   ;;  %v13849_v31 = vld [vmem:[%s18988_s3 + $0xf8] ss:$20 sps:$4 sm:$0xff]  }
 0x352   :  { %6604 = vmatmul.mubr.bf16.vlgmr.msra.gmra.mrb[20].mxu0 %v14599_v37  ;;  %6733 = vmatmul.mubr.bf16.vlgmr.msra.gmra.mrb[20].mxu1 %v14599_v37  ;;  %v13860_v37 = vld [vmem:[%s18988_s3 + $0x144] ss:$20 sps:$4 sm:$0xff]  }
 0x353   :  { %6615 = vmatpush1.bf16.msra.mxu0 %v13786_v32  ;;  %6744 = vmatpush1.bf16.msra.mxu1 %v13789_v33  ;;  %v13854_v32 = vld [vmem:[%s18988_s3 + $0x11c] ss:$20 sps:$4 sm:$0xff]   ;;  %v13857_v33 = vld [vmem:[%s18988_s3 + $0x124] ss:$20 sps:$4 sm:$0xff]  }
 0x354   :  { %6616 = vmatprep.subr.bf16.mxu0 %v13794_v36  ;;  %6745 = vmatprep.subr.bf16.mxu1 %v13797_v47  ;;  %v13852_v36 = vld [vmem:[%s18988_s3 + $0x118] ss:$20 sps:$4 sm:$0xff]   ;;  %v13855_v47 = vld [vmem:[%s18988_s3 + $0x120] ss:$20 sps:$4 sm:$0xff]  }
 0x355   :  { %6646 = vmatprep.mubr.bf16.mxu0 %v14625_v15  ;;  %6775 = vmatprep.mubr.bf16.mxu1 %v14625_v15  ;;  %v13809_v15 = vld [vmem:[%s18987_s2 + $0xd4c] ss:$48 sps:$4 sm:$0xff]  }
 0x357   :  { %6617 = vmatpush1.bf16.msra.mxu0 %v13792_v38  ;;  %6746 = vmatpush1.bf16.msra.mxu1 %v13795_v29  ;;  %v13863_v38 = vld [vmem:[%s18988_s3 + $0x14c] ss:$20 sps:$4 sm:$0xff]   ;;  %v11735_v29 = vmul.f32 -1.442695, %v16257_v41 }
 0x358   :  { %6618 = vmatprep.subr.bf16.mxu0 %v13800_v40  ;;  %6747 = vmatprep.subr.bf16.mxu1 %v13803_v43  ;;  %v11737_v40 = vmul.f32 -1.442695, %v16259_v42  ;;  %v13858_v43 = vld [vmem:[%s18988_s3 + $0x140] ss:$20 sps:$4 sm:$0xff]  }
 0x359   :  { %14514 = vpow2.f32 %v11735_v29  ;;  %v13896_v29 = vld [vmem:[%s18988_s3 + $0x234] ss:$20 sps:$4 sm:$0xff]  }
 0x35a   :  { %14516 = vpow2.f32 %v11737_v40 }
 0x35b   :  { %6619 = vmatpush1.bf16.msra.mxu0 %v13798_v49  ;;  %6748 = vmatpush1.bf16.msra.mxu1 %v13801_v50  ;;  %v11736_v49 = vmul.f32 -1.442695, %v16264_v44  ;;  %v13861_v50 = vld [vmem:[%s18988_s3 + $0x148] ss:$20 sps:$4 sm:$0xff]  }
 0x35c   :  { %6620 = vmatprep.subr.bf16.mxu0 %v13806_v58  ;;  %6749 = vmatprep.subr.bf16.mxu1 %v13809_v15  ;;  %v13866_v58 = vld [vmem:[%s18988_s3 + $0x16c] ss:$20 sps:$4 sm:$0xff]   ;;  %v11738_v15 = vmul.f32 -1.442695, %v16266_v45 }
 0x35d   :  { %14518 = vpow2.f32 %v11736_v49 }
 0x35e   :  { %14520 = vpow2.f32 %v11738_v15  ;;  %v13902_v15 = vld [vmem:[%s18988_s3 + $0x25c] ss:$20 sps:$4 sm:$0xff]  }
 0x35f   :  { %6621 = vmatpush1.bf16.msra.mxu0 %v13804_v59  ;;  %6750 = vmatpush1.bf16.msra.mxu1 %v13807_v53  ;;  %v13869_v59 = vld [vmem:[%s18988_s3 + $0x174] ss:$20 sps:$4 sm:$0xff]   ;;  %v11747_v53 = vmul.f32 -1.442695, %v16268_v46 }
 0x360   :  { %10062 = vmatprep.subr.bf16.mxu0 %v13812_v54  ;;  %10320 = vmatprep.subr.bf16.mxu1 %v13815_v61  ;;  %v11749_v54 = vmul.f32 -1.442695, %v16270_v48  ;;  %v13864_v61 = vld [vmem:[%s18988_s3 + $0x168] ss:$20 sps:$4 sm:$0xff]  }
 0x361   :  { %14522 = vpow2.f32 %v11747_v53  ;;  %v13900_v53 = vld [vmem:[%s18988_s3 + $0x258] ss:$20 sps:$4 sm:$0xff]  }
 0x362   :  { %11729 = vmatmul.mubr.msk.bf16.vlgmr.msra.gmra.mrb[20].mxu0 %vm2642_vm0, %v14600_v57  ;;  %11730 = vmatmul.mubr.msk.bf16.vlgmr.msra.gmra.mrb[20].mxu1 %vm2642_vm0, %v14600_v57  ;;  %v13875_v57 = vld [vmem:[%s18988_s3 + $0x19c] ss:$20 sps:$4 sm:$0xff]   ;;  %14524 = vpow2.f32 %v11749_v54  ;;  %v13903_v54 = vld [vmem:[%s18988_s3 + $0x260] ss:$20 sps:$4 sm:$0xff]  }
 0x363   :  { %10063 = vmatpush1.bf16.msra.mxu0 %v13810_v62  ;;  %10094 = vmatprep.mubr.bf16.mxu0 %v17241_v22  ;;  %v11748_v62 = vmul.f32 -1.442695, %v16278_v51 }
 0x364   :  { %10321 = vmatpush1.bf16.msra.mxu1 %v13813_v63  ;;  %10352 = vmatprep.mubr.bf16.mxu1 %v17241_v22  ;;  %v13867_v63 = vld [vmem:[%s18988_s3 + $0x170] ss:$20 sps:$4 sm:$0xff]  }
 0x365   :  { %10064 = vmatprep.subr.bf16.mxu0 %v13818_v55  ;;  %10322 = vmatprep.subr.bf16.mxu1 %v13821_v56  ;;  %v13872_v55 = vld [vmem:[%s18988_s3 + $0x194] ss:$20 sps:$4 sm:$0xff]   ;;  %v11750_v56 = vmul.f32 -1.442695, %v16280_v52  ;;  %14526 = vpow2.f32 %v11748_v62 }
 0x367   :  { %10065 = vmatpush1.bf16.msra.mxu0 %v13816_v2  ;;  %v13870_v2 = vld [vmem:[%s18988_s3 + $0x190] ss:$20 sps:$4 sm:$0xff]   ;;  %14528 = vpow2.f32 %v11750_v56 }
 0x368   :  { %10323 = vmatpush1.bf16.msra.mxu1 %v13819_v34  ;;  %10066 = vmatprep.subr.bf16.mxu0 %v13824_v35  ;;  %v13873_v34 = vld [vmem:[%s18988_s3 + $0x198] ss:$20 sps:$4 sm:$0xff]   ;;  %v13878_v35 = vld [vmem:[%s18988_s3 + $0x1bc] ss:$20 sps:$4 sm:$0xff]  }
 0x369   :  { %10324 = vmatprep.subr.bf16.mxu1 %v13827_v9  ;;  %v13881_v9 = vld [vmem:[%s18988_s3 + $0x1c4] ss:$20 sps:$4 sm:$0xff]  }
 0x36b   :  { %10067 = vmatpush1.bf16.msra.mxu0 %v13822_v10  ;;  %v13876_v10 = vld [vmem:[%s18988_s3 + $0x1b8] ss:$20 sps:$4 sm:$0xff]  }
 0x36c   :  { %10325 = vmatpush1.bf16.msra.mxu1 %v13825_v13  ;;  %10068 = vmatprep.subr.bf16.mxu0 %v13830_v14  ;;  %v14515_v13 = vpop.eup %14514  ;;  %v13879_v14 = vld [vmem:[%s18988_s3 + $0x1c0] ss:$20 sps:$4 sm:$0xff]  }
 0x36d   :  { %10326 = vmatprep.subr.bf16.mxu1 %v13833_v39  ;;  %v13884_v39 = vld [vmem:[%s18988_s3 + $0x1e4] ss:$20 sps:$4 sm:$0xff]  }
 0x36f   :  { %10069 = vmatpush1.bf16.msra.mxu0 %v13828_v16  ;;  %v14517_v16 = vpop.eup %14516 }
 0x370   :  { %10327 = vmatpush1.bf16.msra.mxu1 %v13831_v0  ;;  %10070 = vmatprep.subr.bf16.mxu0 %v13836_v3  ;;  %v13887_v0 = vld [vmem:[%s18988_s3 + $0x1ec] ss:$20 sps:$4 sm:$0xff]   ;;  %v14519_v3 = vpop.eup %14518 }
 0x371   :  { %10328 = vmatprep.subr.bf16.mxu1 %v13839_v4  ;;  %v14521_v4 = vpop.eup %14520 }
 0x373   :  { %10071 = vmatpush1.bf16.msra.mxu0 %v13834_v17  ;;  %v6862_v17 = vadd.f32 1.0, %v14515_v13  ;;  %v13917_v13 = vld [vmem:[%s18988_s3 + $0x2b4] ss:$20 sps:$4 sm:$0xff]  }
 0x374   :  { %10329 = vmatpush1.bf16.msra.mxu1 %v13837_v18  ;;  %10072 = vmatprep.subr.bf16.mxu0 %v13842_v19  ;;  %v13882_v18 = vld [vmem:[%s18988_s3 + $0x1e0] ss:$20 sps:$4 sm:$0xff]   ;;  %v14523_v19 = vpop.eup %14522 }
 0x375   :  { %10330 = vmatprep.subr.bf16.mxu1 %v13845_v24  ;;  %v6864_v24 = vadd.f32 1.0, %v14517_v16  ;;  %14530 = vrcp.f32 %v6862_v17  ;;  %v13920_v17 = vld [vmem:[%s18988_s3 + $0x2d4] ss:$20 sps:$4 sm:$0xff]  }
 0x377   :  { %10073 = vmatpush1.bf16.msra.mxu0 %v13840_v25  ;;  %v13885_v25 = vld [vmem:[%s18988_s3 + $0x1e8] ss:$20 sps:$4 sm:$0xff]   ;;  %14532 = vrcp.f32 %v6864_v24 }
 0x378   :  { %10331 = vmatpush1.bf16.msra.mxu1 %v13843_v26  ;;  %10074 = vmatprep.subr.bf16.mxu0 %v13848_v27  ;;  %v13890_v26 = vld [vmem:[%s18988_s3 + $0x20c] ss:$20 sps:$4 sm:$0xff]   ;;  %v14525_v27 = vpop.eup %14524 }
 0x379   :  { %10332 = vmatprep.subr.bf16.mxu1 %v13851_v28  ;;  %v6863_v28 = vadd.f32 1.0, %v14519_v3 }
 0x37b   :  { %10075 = vmatpush1.bf16.msra.mxu0 %v13846_v30  ;;  %v13893_v30 = vld [vmem:[%s18988_s3 + $0x214] ss:$20 sps:$4 sm:$0xff]   ;;  %14534 = vrcp.f32 %v6863_v28 }
 0x37c   :  { %10333 = vmatpush1.bf16.msra.mxu1 %v13849_v31  ;;  %10076 = vmatprep.subr.bf16.mxu0 %v13854_v32  ;;  %v14527_v31 = vpop.eup %14526  ;;  %v6865_v32 = vadd.f32 1.0, %v14521_v4  ;;  %v13915_v4 = vld [vmem:[%s18988_s3 + $0x2b0] ss:$20 sps:$4 sm:$0xff]  }
 0x37d   :  { %10334 = vmatprep.subr.bf16.mxu1 %v13857_v33  ;;  %v14529_v33 = vpop.eup %14528  ;;  %v6875_v40 = vadd.f32 1.0, %v14527_v31 }
 0x37e   :  { %14536 = vrcp.f32 %v6865_v32  ;;  %v6877_v49 = vadd.f32 1.0, %v14529_v33 }
 0x37f   :  { %10077 = vmatpush1.bf16.msra.mxu0 %v13852_v36  ;;  %v6874_v36 = vadd.f32 1.0, %v14523_v19  ;;  %v14531_v62 = vpop.eup %14530 }
 0x380   :  { %10335 = vmatpush1.bf16.msra.mxu1 %v13855_v47  ;;  %10078 = vmatprep.subr.bf16.mxu0 %v13860_v37  ;;  %v13888_v47 = vld [vmem:[%s18988_s3 + $0x208] ss:$20 sps:$4 sm:$0xff]   ;;  %v6876_v37 = vadd.f32 1.0, %v14525_v27 }
 0x381   :  { %10336 = vmatprep.subr.bf16.mxu1 %v13863_v38  ;;  %v13891_v38 = vld [vmem:[%s18988_s3 + $0x210] ss:$20 sps:$4 sm:$0xff]   ;;  %14538 = vrcp.f32 %v6874_v36 }
 0x382   :  { %14540 = vrcp.f32 %v6876_v37 }
 0x383   :  { %10079 = vmatpush1.bf16.msra.mxu0 %v13858_v43  ;;  %v13899_v43 = vld [vmem:[%s18988_s3 + $0x23c] ss:$20 sps:$4 sm:$0xff]   ;;  %14542 = vrcp.f32 %v6875_v40 }
 0x384   :  { %10337 = vmatpush1.bf16.msra.mxu1 %v13861_v50  ;;  %10080 = vmatprep.subr.bf16.mxu0 %v13866_v58  ;;  %v13894_v50 = vld [vmem:[%s18988_s3 + $0x230] ss:$20 sps:$4 sm:$0xff]   ;;  %v13897_v58 = vld [vmem:[%s18988_s3 + $0x238] ss:$20 sps:$4 sm:$0xff]   ;;  %14544 = vrcp.f32 %v6877_v49 }
 0x385   :  { %10338 = vmatprep.subr.bf16.mxu1 %v13869_v59  ;;  %v13905_v59 = vld [vmem:[%s18988_s3 + $0x264] ss:$20 sps:$4 sm:$0xff]  }
 0x386   :  { %v13929_v49 = vld [vmem:[%s18988_s3 + $0x304] ss:$20 sps:$4 sm:$0xff]  }
 0x387   :  { %10081 = vmatpush1.bf16.msra.mxu0 %v13864_v61  ;;  %v13908_v61 = vld [vmem:[%s18988_s3 + $0x284] ss:$20 sps:$4 sm:$0xff]  }
 0x388   :  { %10339 = vmatpush1.bf16.msra.mxu1 %v13867_v63  ;;  %10082 = vmatprep.subr.bf16.mxu0 %v13872_v55  ;;  %v13911_v63 = vld [vmem:[%s18988_s3 + $0x28c] ss:$20 sps:$4 sm:$0xff]   ;;  %v14533_v55 = vpop.eup %14532 }
 0x389   :  { %10340 = vmatprep.subr.bf16.mxu1 %v13875_v57  ;;  %v14535_v56 = vpop.eup %14534  ;;  %v13906_v57 = vld [vmem:[%s18988_s3 + $0x280] ss:$20 sps:$4 sm:$0xff]   ;;  %v6936_v3 = vmul.f32 %v14533_v55, %v16259_v42  ;;  %v13923_v42 = vld [vmem:[%s18988_s3 + $0x2dc] ss:$20 sps:$4 sm:$0xff]  }
 0x38a   :  { %v13933_v55 = vld [vmem:[%s18988_s3 + $0x328] ss:$20 sps:$4 sm:$0xff]  }
 0x38b   :  { %10083 = vmatpush1.bf16.msra.mxu0 %v13870_v2  ;;  %v14537_v2 = vpop.eup %14536 }
 0x38c   :  { %10341 = vmatpush1.bf16.msra.mxu1 %v13873_v34  ;;  %10084 = vmatprep.subr.bf16.mxu0 %v13878_v35  ;;  %v13909_v34 = vld [vmem:[%s18988_s3 + $0x288] ss:$20 sps:$4 sm:$0xff]   ;;  %v14539_v35 = vpop.eup %14538  ;;  %v6937_v19 = vmul.f32 %v14537_v2, %v16266_v45 }
 0x38d   :  { %10342 = vmatprep.subr.bf16.mxu1 %v13881_v9  ;;  %v13914_v9 = vld [vmem:[%s18988_s3 + $0x2ac] ss:$20 sps:$4 sm:$0xff]   ;;  %v13936_v2 = vld [vmem:[%s18988_s3 + $0x348] ss:$20 sps:$4 sm:$0xff]  }
 0x38f   :  { %10085 = vmatpush1.bf16.msra.mxu0 %v13876_v10  ;;  %v14541_v10 = vpop.eup %14540 }
 0x390   :  { %10343 = vmatpush1.bf16.msra.mxu1 %v13879_v14  ;;  %10086 = vmatprep.subr.bf16.mxu0 %v13884_v39  ;;  %v14543_v14 = vpop.eup %14542  ;;  %v13912_v39 = vld [vmem:[%s18988_s3 + $0x2a8] ss:$20 sps:$4 sm:$0xff]  }
 0x391   :  { %10344 = vmatprep.subr.bf16.mxu1 %v13887_v0  ;;  %v14545_v16 = vpop.eup %14544  ;;  %v6934_v0 = vmul.f32 %v14531_v62, %v16257_v41  ;;  %v13935_v62 = vld [vmem:[%s18988_s3 + $0x32c] ss:$20 sps:$4 sm:$0xff]  }
 0x392   :  { %v6949_v45 = vmul.f32 %v14545_v16, %v16280_v52  ;;  %v13926_v52 = vld [vmem:[%s18988_s3 + $0x2fc] ss:$20 sps:$4 sm:$0xff]   ;;  %v13948_v16 = vld [vmem:[%s18988_s3 + $0x398] ss:$20 sps:$4 sm:$0xff]  }
 0x393   :  { %10087 = vmatpush1.bf16.msra.mxu0 %v13882_v18  ;;  %v6935_v18 = vmul.f32 %v14535_v56, %v16264_v44  ;;  %v6947_v44 = vmul.f32 %v14543_v14, %v16278_v51  ;;  %v13921_v51 = vld [vmem:[%s18988_s3 + $0x2d8] ss:$20 sps:$4 sm:$0xff]   ;;  %v13950_v14 = vld [vmem:[%s18988_s3 + $0x39c] ss:$20 sps:$4 sm:$0xff]  }
 0x394   :  { %10345 = vmatpush1.bf16.msra.mxu1 %v13885_v25  ;;  %10088 = vmatprep.subr.bf16.mxu0 %v13890_v26  ;;  %v6946_v25 = vmul.f32 %v14539_v35, %v16268_v46  ;;  %v6948_v26 = vmul.f32 %v14541_v10, %v16270_v48  ;;  %v13918_v46 = vld [vmem:[%s18988_s3 + $0x2d0] ss:$20 sps:$4 sm:$0xff]   ;;  %v13938_v56 = vld [vmem:[%s18988_s3 + $0x34c] ss:$20 sps:$4 sm:$0xff]   ;;  %v13944_v35 = vld [vmem:[%s18988_s3 + $0x374] ss:$20 sps:$4 sm:$0xff]  }
 0x395   :  { %10346 = vmatprep.subr.bf16.mxu1 %v13893_v30  ;;  %v13942_v10 = vld [vmem:[%s18988_s3 + $0x370] ss:$20 sps:$4 sm:$0xff]  }
 0x397   :  { %10089 = vmatpush1.bf16.msra.mxu0 %v13888_v47 }
 0x398   :  { %10347 = vmatpush1.bf16.msra.mxu1 %v13891_v38  ;;  %10090 = vmatprep.subr.bf16.mxu0 %v13896_v29 }
 0x399   :  { %10348 = vmatprep.subr.bf16.mxu1 %v13899_v43 }
 0x39b   :  { %10091 = vmatpush1.bf16.msra.mxu0 %v13894_v50 }
 0x39c   :  { %10349 = vmatpush1.bf16.msra.mxu1 %v13897_v58  ;;  %10092 = vmatprep.subr.bf16.mxu0 %v13902_v15 }
 0x39d   :  { %10350 = vmatprep.subr.bf16.mxu1 %v13905_v59 }
 0x39f   :  { %10093 = vmatpush1.bf16.msra.mxu0 %v13900_v53  ;;  %v13924_v53 = vld [vmem:[%s18988_s3 + $0x2f8] ss:$20 sps:$4 sm:$0xff]  }
 0x3a0   :  { %10351 = vmatpush1.bf16.msra.mxu1 %v13903_v54  ;;  %10105 = vmatprep.subr.bf16.mxu0 %v13908_v61  ;;  %v13927_v54 = vld [vmem:[%s18988_s3 + $0x300] ss:$20 sps:$4 sm:$0xff]   ;;  %v13932_v61 = vld [vmem:[%s18988_s3 + $0x324] ss:$20 sps:$4 sm:$0xff]  }
 0x3a1   :  { %10363 = vmatprep.subr.bf16.mxu1 %v13911_v63  ;;  %v13930_v63 = vld [vmem:[%s18988_s3 + $0x320] ss:$20 sps:$4 sm:$0xff]  }
 0x3a2   :  { %10095 = vmatmul.mubr.bf16.vlgmr.msra.gmra.mrb[24].mxu0 %v17237_v20 }
 0x3a3   :  { %10353 = vmatmul.mubr.bf16.vlgmr.msra.gmra.mrb[24].mxu1 %v17237_v20  ;;  %10106 = vmatpush1.bf16.msra.mxu0 %v13906_v57  ;;  %v13941_v57 = vld [vmem:[%s18988_s3 + $0x354] ss:$20 sps:$4 sm:$0xff]  }
 0x3a4   :  { %10137 = vmatprep.mubr.bf16.mxu0 %v17243_v23  ;;  %10364 = vmatpush1.bf16.msra.mxu1 %v13909_v34  ;;  %v13939_v34 = vld [vmem:[%s18988_s3 + $0x350] ss:$20 sps:$4 sm:$0xff]  }
 0x3a5   :  { %10395 = vmatprep.mubr.bf16.mxu1 %v17243_v23  ;;  %v6390_v41 = vpop.f32.mrb[16].mxu0  ;;  %v6519_v24 = vpop.f32.mrb[16].mxu1  ;;  %10107 = vmatprep.subr.bf16.mxu0 %v13914_v9  ;;  %v13947_v9 = vld [vmem:[%s18988_s3 + $0x37c] ss:$20 sps:$4 sm:$0xff]  }
 0x3a6   :  { %v6958_v27 = vmul.f32 %v6934_v0, %v6390_v41  ;;  %v6960_v28 = vmul.f32 %v6936_v3, %v6519_v24  ;;  %v6392_v30 = vpop.f32.mrb[17].mxu0  ;;  %v6521_v31 = vpop.f32.mrb[17].mxu1  ;;  %10365 = vmatprep.subr.bf16.mxu1 %v13917_v13  ;;  %v13945_v13 = vld [vmem:[%s18988_s3 + $0x378] ss:$20 sps:$4 sm:$0xff]   ;;  %v13951_v0 = vld [vmem:[%s18988_s3 + $0x3a0] ss:$20 sps:$4 sm:$0xff]  }
 0x3a7   :  { %v6959_v32 = vmul.f32 %v6935_v18, %v6392_v30  ;;  %v6961_v33 = vmul.f32 %v6937_v19, %v6521_v31  ;;  %v6394_v36 = vpop.f32.mrb[18].mxu0  ;;  %v6523_v47 = vpop.f32.mrb[18].mxu1  ;;  %10108 = vmatpush1.bf16.msra.mxu0 %v13912_v39  ;;  %v13953_v39 = vld [vmem:[%s18988_s3 + $0x3a4] ss:$20 sps:$4 sm:$0xff]   ;;  %v13957_v18 = vld [vmem:[%s18988_s3 + $0x3c8] ss:$20 sps:$4 sm:$0xff]  }
 0x3a8   :  { %v6970_v37 = vmul.f32 %v6946_v25, %v6394_v36  ;;  %v6972_v48 = vmul.f32 %v6948_v26, %v6523_v47  ;;  %10366 = vmatpush1.bf16.msra.mxu1 %v13915_v4  ;;  %v6396_v38 = vpop.f32.mrb[19].mxu0  ;;  %v6525_v29 = vpop.f32.mrb[19].mxu1  ;;  %10109 = vmatprep.subr.bf16.mxu0 %v13920_v17  ;;  %v13956_v3 = vld [vmem:[%s18988_s3 + $0x3c4] ss:$20 sps:$4 sm:$0xff]   ;;  %v13959_v4 = vld [vmem:[%s18988_s3 + $0x3cc] ss:$20 sps:$4 sm:$0xff]  }
 0x3a9   :  { %v6971_v40 = vmul.f32 %v6947_v44, %v6396_v38  ;;  %v6973_v43 = vmul.f32 %v6949_v45, %v6525_v29  ;;  %10367 = vmatprep.subr.bf16.mxu1 %v13923_v42  ;;  %v13954_v17 = vld [vmem:[%s18988_s3 + $0x3c0] ss:$20 sps:$4 sm:$0xff]   ;;  %v13960_v24 = vld [vmem:[%s18988_s3 + $0x3e8] ss:$20 sps:$4 sm:$0xff]   ;;  %v13963_v42 = vld [vmem:[%s18988_s3 + $0x3f0] ss:$20 sps:$4 sm:$0xff]  }
 0x3aa   :  { %v17703_v50 = vpack.c.bf16 %v6970_v37, %v6958_v27  ;;  %v17705_v58 = vpack.c.bf16 %v6972_v48, %v6960_v28  ;;  %v13962_v19 = vld [vmem:[%s18988_s3 + $0x3ec] ss:$20 sps:$4 sm:$0xff]   ;;  %v13965_v41 = vld [vmem:[%s18988_s3 + $0x3f4] ss:$20 sps:$4 sm:$0xff]   ;;  %v13971_v26 = vld [vmem:[%s18988_s3 + $0x41c] ss:$20 sps:$4 sm:$0xff]  }
 0x3ab   :  { %v17707_v15 = vpack.c.bf16 %v6971_v40, %v6959_v32  ;;  %v17709_v59 = vpack.c.bf16 %v6973_v43, %v6961_v33  ;;  %10110 = vmatpush1.bf16.msra.mxu0 %v13918_v46  ;;  %v13968_v25 = vld [vmem:[%s18988_s3 + $0x414] ss:$20 sps:$4 sm:$0xff]   ;;  %v13966_v27 = vld [vmem:[%s18988_s3 + $0x410] ss:$20 sps:$4 sm:$0xff]   ;;  %v13969_v28 = vld [vmem:[%s18988_s3 + $0x418] ss:$20 sps:$4 sm:$0xff]  }
 0x3ac   :  { %10368 = vmatpush1.bf16.msra.mxu1 %v13921_v51  ;;  %10111 = vmatprep.subr.bf16.mxu0 %v13926_v52  ;;  %v13974_v30 = vld [vmem:[%s18988_s3 + $0x43c] ss:$20 sps:$4 sm:$0xff]   ;;  %v13977_v31 = vld [vmem:[%s18988_s3 + $0x444] ss:$20 sps:$4 sm:$0xff]   ;;  %v13975_v45 = vld [vmem:[%s18988_s3 + $0x440] ss:$20 sps:$4 sm:$0xff]  }
 0x3ad   :  { %10369 = vmatprep.subr.bf16.mxu1 %v13929_v49  ;;  %v13972_v44 = vld [vmem:[%s18988_s3 + $0x438] ss:$20 sps:$4 sm:$0xff]   ;;  %v13978_v36 = vld [vmem:[%s18988_s3 + $0x460] ss:$20 sps:$4 sm:$0xff]   ;;  %v13981_v47 = vld [vmem:[%s18988_s3 + $0x468] ss:$20 sps:$4 sm:$0xff]  }
 0x3ae   :  { %v13980_v32 = vld [vmem:[%s18988_s3 + $0x464] ss:$20 sps:$4 sm:$0xff]   ;;  %v13983_v33 = vld [vmem:[%s18988_s3 + $0x46c] ss:$20 sps:$4 sm:$0xff]   ;;  %v13989_v37 = vld [vmem:[%s18988_s3 + $0x494] ss:$20 sps:$4 sm:$0xff]  }
 0x3af   :  { %10112 = vmatpush1.bf16.msra.mxu0 %v13924_v53  ;;  %v13986_v46 = vld [vmem:[%s18988_s3 + $0x48c] ss:$20 sps:$4 sm:$0xff]   ;;  %v13984_v48 = vld [vmem:[%s18988_s3 + $0x488] ss:$20 sps:$4 sm:$0xff]   ;;  %v13987_v38 = vld [vmem:[%s18988_s3 + $0x490] ss:$20 sps:$4 sm:$0xff]  }
 0x3b0   :  { %10370 = vmatpush1.bf16.msra.mxu1 %v13927_v54  ;;  %10113 = vmatprep.subr.bf16.mxu0 %v13932_v61  ;;  %v13992_v29 = vld [vmem:[%s18988_s3 + $0x4b4] ss:$20 sps:$4 sm:$0xff]   ;;  %v13995_v51 = vld [vmem:[%s18988_s3 + $0x4bc] ss:$20 sps:$4 sm:$0xff]   ;;  %v13993_v40 = vld [vmem:[%s18988_s3 + $0x4b8] ss:$20 sps:$4 sm:$0xff]  }
 0x3b1   :  { %10371 = vmatprep.subr.bf16.mxu1 %v13935_v62  ;;  %v13990_v52 = vld [vmem:[%s18988_s3 + $0x4b0] ss:$20 sps:$4 sm:$0xff]   ;;  %v13996_v53 = vld [vmem:[%s18988_s3 + $0x4d8] ss:$20 sps:$4 sm:$0xff]   ;;  %v13999_v54 = vld [vmem:[%s18988_s3 + $0x4e0] ss:$20 sps:$4 sm:$0xff]  }
 0x3b2   :  { %v13998_v43 = vld [vmem:[%s18988_s3 + $0x4dc] ss:$20 sps:$4 sm:$0xff]   ;;  %v14001_v49 = vld [vmem:[%s18988_s3 + $0x4e4] ss:$20 sps:$4 sm:$0xff]   ;;  %v14007_v62 = vld [vmem:[%s18988_s3 + $0x50c] ss:$20 sps:$4 sm:$0xff]  }
 0x3b3   :  { %10114 = vmatpush1.bf16.msra.mxu0 %v13930_v63  ;;  %v14004_v61 = vld [vmem:[%s18988_s3 + $0x504] ss:$20 sps:$4 sm:$0xff]   ;;  %v14002_v63 = vld [vmem:[%s18988_s3 + $0x500] ss:$20 sps:$4 sm:$0xff]  }
 0x3b4   :  { %10372 = vmatpush1.bf16.msra.mxu1 %v13933_v55  ;;  %10115 = vmatprep.subr.bf16.mxu0 %v13938_v56  ;;  %v14005_v55 = vld [vmem:[%s18988_s3 + $0x508] ss:$20 sps:$4 sm:$0xff]   ;;  %v14010_v56 = vld [vmem:[%s18988_s3 + $0x52c] ss:$20 sps:$4 sm:$0xff]  }
 0x3b5   :  { %10373 = vmatprep.subr.bf16.mxu1 %v13941_v57  ;;  %v14013_v57 = vld [vmem:[%s18988_s3 + $0x534] ss:$20 sps:$4 sm:$0xff]  }
 0x3b7   :  { %10116 = vmatpush1.bf16.msra.mxu0 %v13936_v2  ;;  %v14008_v2 = vld [vmem:[%s18988_s3 + $0x528] ss:$20 sps:$4 sm:$0xff]  }
 0x3b8   :  { %10374 = vmatpush1.bf16.msra.mxu1 %v13939_v34  ;;  %10117 = vmatprep.subr.bf16.mxu0 %v13944_v35  ;;  %v14011_v34 = vld [vmem:[%s18988_s3 + $0x530] ss:$20 sps:$4 sm:$0xff]   ;;  %v14016_v35 = vld [vmem:[%s18988_s3 + $0x554] ss:$20 sps:$4 sm:$0xff]  }
 0x3b9   :  { %10375 = vmatprep.subr.bf16.mxu1 %v13947_v9  ;;  %v14019_v9 = vld [vmem:[%s18988_s3 + $0x55c] ss:$20 sps:$4 sm:$0xff]  }
 0x3bb   :  { %10118 = vmatpush1.bf16.msra.mxu0 %v13942_v10  ;;  %v14014_v10 = vld [vmem:[%s18988_s3 + $0x550] ss:$20 sps:$4 sm:$0xff]  }
 0x3bc   :  { %10376 = vmatpush1.bf16.msra.mxu1 %v13945_v13  ;;  %10119 = vmatprep.subr.bf16.mxu0 %v13950_v14  ;;  %v14017_v13 = vld [vmem:[%s18988_s3 + $0x558] ss:$20 sps:$4 sm:$0xff]   ;;  %v14022_v14 = vld [vmem:[%s18988_s3 + $0x57c] ss:$20 sps:$4 sm:$0xff]  }
 0x3bd   :  { %10377 = vmatprep.subr.bf16.mxu1 %v13953_v39  ;;  %v14025_v39 = vld [vmem:[%s18988_s3 + $0x584] ss:$20 sps:$4 sm:$0xff]  }
 0x3bf   :  { %10120 = vmatpush1.bf16.msra.mxu0 %v13948_v16  ;;  %v14020_v16 = vld [vmem:[%s18988_s3 + $0x578] ss:$20 sps:$4 sm:$0xff]  }
 0x3c0   :  { %10378 = vmatpush1.bf16.msra.mxu1 %v13951_v0  ;;  %10121 = vmatprep.subr.bf16.mxu0 %v13956_v3  ;;  %v14023_v0 = vld [vmem:[%s18988_s3 + $0x580] ss:$20 sps:$4 sm:$0xff]   ;;  %v14028_v3 = vld [vmem:[%s18988_s3 + $0x5a4] ss:$20 sps:$4 sm:$0xff]  }
 0x3c1   :  { %10379 = vmatprep.subr.bf16.mxu1 %v13959_v4  ;;  %v14031_v4 = vld [vmem:[%s18988_s3 + $0x5ac] ss:$20 sps:$4 sm:$0xff]  }
 0x3c3   :  { %10122 = vmatpush1.bf16.msra.mxu0 %v13954_v17  ;;  %v14026_v17 = vld [vmem:[%s18988_s3 + $0x5a0] ss:$20 sps:$4 sm:$0xff]  }
 0x3c4   :  { %10380 = vmatpush1.bf16.msra.mxu1 %v13957_v18  ;;  %10123 = vmatprep.subr.bf16.mxu0 %v13962_v19  ;;  %v14029_v18 = vld [vmem:[%s18988_s3 + $0x5a8] ss:$20 sps:$4 sm:$0xff]   ;;  %v14034_v19 = vld [vmem:[%s18988_s3 + $0x5cc] ss:$20 sps:$4 sm:$0xff]  }
 0x3c5   :  { %10381 = vmatprep.subr.bf16.mxu1 %v13965_v41  ;;  %v14037_v41 = vld [vmem:[%s18988_s3 + $0x5d4] ss:$20 sps:$4 sm:$0xff]  }
 0x3c7   :  { %10124 = vmatpush1.bf16.msra.mxu0 %v13960_v24  ;;  %v14032_v24 = vld [vmem:[%s18988_s3 + $0x5c8] ss:$20 sps:$4 sm:$0xff]  }
 0x3c8   :  { %10382 = vmatpush1.bf16.msra.mxu1 %v13963_v42  ;;  %10125 = vmatprep.subr.bf16.mxu0 %v13968_v25  ;;  %v14035_v42 = vld [vmem:[%s18988_s3 + $0x5d0] ss:$20 sps:$4 sm:$0xff]   ;;  %v14040_v25 = vld [vmem:[%s18988_s3 + $0x5f4] ss:$20 sps:$4 sm:$0xff]  }
 0x3c9   :  { %10383 = vmatprep.subr.bf16.mxu1 %v13971_v26  ;;  %v14043_v26 = vld [vmem:[%s18988_s3 + $0x5fc] ss:$20 sps:$4 sm:$0xff]  }
 0x3cb   :  { %10126 = vmatpush1.bf16.msra.mxu0 %v13966_v27  ;;  %v14038_v27 = vld [vmem:[%s18988_s3 + $0x5f0] ss:$20 sps:$4 sm:$0xff]  }
 0x3cc   :  { %10384 = vmatpush1.bf16.msra.mxu1 %v13969_v28  ;;  %10127 = vmatprep.subr.bf16.mxu0 %v13974_v30  ;;  %v14041_v28 = vld [vmem:[%s18988_s3 + $0x5f8] ss:$20 sps:$4 sm:$0xff]   ;;  %v14046_v30 = vld [vmem:[%s18988_s3 + $0x61c] ss:$20 sps:$4 sm:$0xff]  }
 0x3cd   :  { %10385 = vmatprep.subr.bf16.mxu1 %v13977_v31  ;;  %v14049_v31 = vld [vmem:[%s18988_s3 + $0x624] ss:$20 sps:$4 sm:$0xff]  }
 0x3cf   :  { %10128 = vmatpush1.bf16.msra.mxu0 %v13972_v44  ;;  %v14044_v44 = vld [vmem:[%s18988_s3 + $0x618] ss:$20 sps:$4 sm:$0xff]  }
 0x3d0   :  { %10386 = vmatpush1.bf16.msra.mxu1 %v13975_v45  ;;  %10129 = vmatprep.subr.bf16.mxu0 %v13980_v32  ;;  %v14047_v45 = vld [vmem:[%s18988_s3 + $0x620] ss:$20 sps:$4 sm:$0xff]   ;;  %v14052_v32 = vld [vmem:[%s18988_s3 + $0x644] ss:$20 sps:$4 sm:$0xff]  }
 0x3d1   :  { %10387 = vmatprep.subr.bf16.mxu1 %v13983_v33  ;;  %v14055_v33 = vld [vmem:[%s18988_s3 + $0x64c] ss:$20 sps:$4 sm:$0xff]  }
 0x3d3   :  { %10130 = vmatpush1.bf16.msra.mxu0 %v13978_v36  ;;  %v14050_v36 = vld [vmem:[%s18988_s3 + $0x640] ss:$20 sps:$4 sm:$0xff]  }
 0x3d4   :  { %10388 = vmatpush1.bf16.msra.mxu1 %v13981_v47  ;;  %10131 = vmatprep.subr.bf16.mxu0 %v13986_v46  ;;  %v14053_v47 = vld [vmem:[%s18988_s3 + $0x648] ss:$20 sps:$4 sm:$0xff]   ;;  %v14058_v46 = vld [vmem:[%s18988_s3 + $0x66c] ss:$20 sps:$4 sm:$0xff]  }
 0x3d5   :  { %10389 = vmatprep.subr.bf16.mxu1 %v13989_v37  ;;  %v14061_v37 = vld [vmem:[%s18988_s3 + $0x674] ss:$20 sps:$4 sm:$0xff]  }
 0x3d7   :  { %10132 = vmatpush1.bf16.msra.mxu0 %v13984_v48  ;;  %v14056_v48 = vld [vmem:[%s18988_s3 + $0x668] ss:$20 sps:$4 sm:$0xff]  }
 0x3d8   :  { %10390 = vmatpush1.bf16.msra.mxu1 %v13987_v38  ;;  %10133 = vmatprep.subr.bf16.mxu0 %v13992_v29  ;;  %v14059_v38 = vld [vmem:[%s18988_s3 + $0x670] ss:$20 sps:$4 sm:$0xff]   ;;  %v14064_v29 = vld [vmem:[%s18988_s3 + $0x694] ss:$20 sps:$4 sm:$0xff]  }
 0x3d9   :  { %10391 = vmatprep.subr.bf16.mxu1 %v13995_v51  ;;  %v14067_v51 = vld [vmem:[%s18988_s3 + $0x69c] ss:$20 sps:$4 sm:$0xff]  }
 0x3db   :  { %10134 = vmatpush1.bf16.msra.mxu0 %v13990_v52  ;;  %v14062_v52 = vld [vmem:[%s18988_s3 + $0x690] ss:$20 sps:$4 sm:$0xff]  }
 0x3dc   :  { %10392 = vmatpush1.bf16.msra.mxu1 %v13993_v40  ;;  %10135 = vmatprep.subr.bf16.mxu0 %v13998_v43  ;;  %v14065_v40 = vld [vmem:[%s18988_s3 + $0x698] ss:$20 sps:$4 sm:$0xff]   ;;  %v14070_v43 = vld [vmem:[%s18988_s3 + $0x6bc] ss:$20 sps:$4 sm:$0xff]  }
 0x3dd   :  { %10393 = vmatprep.subr.bf16.mxu1 %v14001_v49  ;;  %v14073_v49 = vld [vmem:[%s18988_s3 + $0x6c4] ss:$20 sps:$4 sm:$0xff]  }
 0x3df   :  { %10136 = vmatpush1.bf16.msra.mxu0 %v13996_v53  ;;  %v14068_v53 = vld [vmem:[%s18988_s3 + $0x6b8] ss:$20 sps:$4 sm:$0xff]  }
 0x3e0   :  { %10394 = vmatpush1.bf16.msra.mxu1 %v13999_v54  ;;  %10148 = vmatprep.subr.bf16.mxu0 %v14004_v61  ;;  %v14071_v54 = vld [vmem:[%s18988_s3 + $0x6c0] ss:$20 sps:$4 sm:$0xff]   ;;  %v14076_v61 = vld [vmem:[%s18988_s3 + $0x6e4] ss:$20 sps:$4 sm:$0xff]  }
 0x3e1   :  { %10406 = vmatprep.subr.bf16.mxu1 %v14007_v62  ;;  %v14079_v62 = vld [vmem:[%s18988_s3 + $0x6ec] ss:$20 sps:$4 sm:$0xff]  }
 0x3e2   :  { %10138 = vmatmul.mubr.bf16.vlgmr.msra.gmra.mrb[24].mxu0 %v17239_v21 }
 0x3e3   :  { %10396 = vmatmul.mubr.bf16.vlgmr.msra.gmra.mrb[24].mxu1 %v17239_v21  ;;  %10149 = vmatpush1.bf16.msra.mxu0 %v14002_v63  ;;  %v11739_v63 = vmul.f32 -1.442695, %v16724_v60 }
 0x3e4   :  { %10180 = vmatprep.mubr.bf16.mxu0 %v17707_v15  ;;  %10407 = vmatpush1.bf16.msra.mxu1 %v14005_v55  ;;  %v11741_v55 = vmul.f32 -1.442695, %v16726_v1 }
 0x3e5   :  { %10438 = vmatprep.mubr.bf16.mxu1 %v17707_v15  ;;  %10150 = vmatprep.subr.bf16.mxu0 %v14010_v56  ;;  %v14074_v56 = vld [vmem:[%s18988_s3 + $0x6e0] ss:$20 sps:$4 sm:$0xff]   ;;  %14546 = vpow2.f32 %v11739_v63  ;;  %v14110_v63 = vld [vmem:[%s18988_s3 + $0x7d0] ss:$20 sps:$4 sm:$0xff]  }
 0x3e6   :  { %10408 = vmatprep.subr.bf16.mxu1 %v14013_v57  ;;  %v11740_v57 = vmul.f32 -1.442695, %v16731_v5  ;;  %14548 = vpow2.f32 %v11741_v55  ;;  %v14113_v55 = vld [vmem:[%s18988_s3 + $0x7d8] ss:$20 sps:$4 sm:$0xff]  }
 0x3e7   :  { %10151 = vmatpush1.bf16.msra.mxu0 %v14008_v2  ;;  %v14077_v2 = vld [vmem:[%s18988_s3 + $0x6e8] ss:$20 sps:$4 sm:$0xff]  }
 0x3e8   :  { %10409 = vmatpush1.bf16.msra.mxu1 %v14011_v34  ;;  %10152 = vmatprep.subr.bf16.mxu0 %v14016_v35  ;;  %v14082_v34 = vld [vmem:[%s18988_s3 + $0x70c] ss:$20 sps:$4 sm:$0xff]   ;;  %v11742_v35 = vmul.f32 -1.442695, %v16733_v6  ;;  %14550 = vpow2.f32 %v11740_v57  ;;  %v14121_v57 = vld [vmem:[%s18988_s3 + $0x804] ss:$20 sps:$4 sm:$0xff]  }
 0x3e9   :  { %10410 = vmatprep.subr.bf16.mxu1 %v14019_v9  ;;  %v14085_v9 = vld [vmem:[%s18988_s3 + $0x714] ss:$20 sps:$4 sm:$0xff]  }
 0x3ea   :  { %14552 = vpow2.f32 %v11742_v35  ;;  %v14124_v35 = vld [vmem:[%s18988_s3 + $0x824] ss:$20 sps:$4 sm:$0xff]  }
 0x3eb   :  { %10153 = vmatpush1.bf16.msra.mxu0 %v14014_v10  ;;  %v11751_v10 = vmul.f32 -1.442695, %v16735_v7 }
 0x3ec   :  { %10411 = vmatpush1.bf16.msra.mxu1 %v14017_v13  ;;  %10154 = vmatprep.subr.bf16.mxu0 %v14022_v14  ;;  %v11753_v13 = vmul.f32 -1.442695, %v16737_v8  ;;  %v14080_v14 = vld [vmem:[%s18988_s3 + $0x708] ss:$20 sps:$4 sm:$0xff]  }
 0x3ed   :  { %10412 = vmatprep.subr.bf16.mxu1 %v14025_v39  ;;  %v11752_v39 = vmul.f32 -1.442695, %v16745_v11  ;;  %14554 = vpow2.f32 %v11751_v10  ;;  %v14127_v10 = vld [vmem:[%s18988_s3 + $0x82c] ss:$20 sps:$4 sm:$0xff]  }
 0x3ee   :  { %14556 = vpow2.f32 %v11753_v13 }
 0x3ef   :  { %10155 = vmatpush1.bf16.msra.mxu0 %v14020_v16  ;;  %v14083_v16 = vld [vmem:[%s18988_s3 + $0x710] ss:$20 sps:$4 sm:$0xff]   ;;  %14558 = vpow2.f32 %v11752_v39  ;;  %v14122_v39 = vld [vmem:[%s18988_s3 + $0x820] ss:$20 sps:$4 sm:$0xff]  }
 0x3f0   :  { %10413 = vmatpush1.bf16.msra.mxu1 %v14023_v0  ;;  %10156 = vmatprep.subr.bf16.mxu0 %v14028_v3  ;;  %v14088_v0 = vld [vmem:[%s18988_s3 + $0x734] ss:$20 sps:$4 sm:$0xff]   ;;  %v11754_v3 = vmul.f32 -1.442695, %v16747_v12 }
 0x3f1   :  { %10414 = vmatprep.subr.bf16.mxu1 %v14031_v4  ;;  %v14091_v4 = vld [vmem:[%s18988_s3 + $0x73c] ss:$20 sps:$4 sm:$0xff]  }
 0x3f2   :  { %14560 = vpow2.f32 %v11754_v3  ;;  %v14130_v3 = vld [vmem:[%s18988_s3 + $0x84c] ss:$20 sps:$4 sm:$0xff]  }
 0x3f3   :  { %10157 = vmatpush1.bf16.msra.mxu0 %v14026_v17  ;;  %v14086_v17 = vld [vmem:[%s18988_s3 + $0x730] ss:$20 sps:$4 sm:$0xff]  }
 0x3f4   :  { %10415 = vmatpush1.bf16.msra.mxu1 %v14029_v18  ;;  %10158 = vmatprep.subr.bf16.mxu0 %v14034_v19  ;;  %v14089_v18 = vld [vmem:[%s18988_s3 + $0x738] ss:$20 sps:$4 sm:$0xff]   ;;  %v14094_v19 = vld [vmem:[%s18988_s3 + $0x75c] ss:$20 sps:$4 sm:$0xff]  }
 0x3f5   :  { %10416 = vmatprep.subr.bf16.mxu1 %v14037_v41  ;;  %v14097_v41 = vld [vmem:[%s18988_s3 + $0x764] ss:$20 sps:$4 sm:$0xff]  }
 0x3f7   :  { %10159 = vmatpush1.bf16.msra.mxu0 %v14032_v24  ;;  %v14092_v24 = vld [vmem:[%s18988_s3 + $0x758] ss:$20 sps:$4 sm:$0xff]  }
 0x3f8   :  { %10417 = vmatpush1.bf16.msra.mxu1 %v14035_v42  ;;  %10160 = vmatprep.subr.bf16.mxu0 %v14040_v25  ;;  %v14547_v42 = vpop.eup %14546  ;;  %v14095_v25 = vld [vmem:[%s18988_s3 + $0x760] ss:$20 sps:$4 sm:$0xff]  }
 0x3f9   :  { %10418 = vmatprep.subr.bf16.mxu1 %v14043_v26  ;;  %v14100_v26 = vld [vmem:[%s18988_s3 + $0x784] ss:$20 sps:$4 sm:$0xff]  }
 0x3fb   :  { %10161 = vmatpush1.bf16.msra.mxu0 %v14038_v27  ;;  %v14549_v27 = vpop.eup %14548 }
 0x3fc   :  { %10419 = vmatpush1.bf16.msra.mxu1 %v14041_v28  ;;  %10162 = vmatprep.subr.bf16.mxu0 %v14046_v30  ;;  %v14103_v28 = vld [vmem:[%s18988_s3 + $0x78c] ss:$20 sps:$4 sm:$0xff]   ;;  %v14551_v30 = vpop.eup %14550 }
 0x3fd   :  { %10420 = vmatprep.subr.bf16.mxu1 %v14049_v31  ;;  %v14553_v31 = vpop.eup %14552 }
 0x3ff   :  { %10163 = vmatpush1.bf16.msra.mxu0 %v14044_v44  ;;  %v6866_v44 = vadd.f32 1.0, %v14547_v42 }
 0x400   :  { %10421 = vmatpush1.bf16.msra.mxu1 %v14047_v45  ;;  %10164 = vmatprep.subr.bf16.mxu0 %v14052_v32  ;;  %v14098_v45 = vld [vmem:[%s18988_s3 + $0x780] ss:$20 sps:$4 sm:$0xff]   ;;  %v14555_v32 = vpop.eup %14554 }
 0x401   :  { %10422 = vmatprep.subr.bf16.mxu1 %v14055_v33  ;;  %v6868_v33 = vadd.f32 1.0, %v14549_v27  ;;  %14562 = vrcp.f32 %v6866_v44  ;;  %v14136_v27 = vld [vmem:[%s18988_s3 + $0x874] ss:$20 sps:$4 sm:$0xff]  }
 0x403   :  { %10165 = vmatpush1.bf16.msra.mxu0 %v14050_v36  ;;  %v14101_v36 = vld [vmem:[%s18988_s3 + $0x788] ss:$20 sps:$4 sm:$0xff]   ;;  %14564 = vrcp.f32 %v6868_v33 }
 0x404   :  { %10423 = vmatpush1.bf16.msra.mxu1 %v14053_v47  ;;  %10166 = vmatprep.subr.bf16.mxu0 %v14058_v46  ;;  %v14557_v47 = vpop.eup %14556  ;;  %v6867_v46 = vadd.f32 1.0, %v14551_v30 }
 0x405   :  { %10424 = vmatprep.subr.bf16.mxu1 %v14061_v37  ;;  %v14106_v37 = vld [vmem:[%s18988_s3 + $0x7ac] ss:$20 sps:$4 sm:$0xff]  }
 0x406   :  { %14566 = vrcp.f32 %v6867_v46 }
 0x407   :  { %10167 = vmatpush1.bf16.msra.mxu0 %v14056_v48  ;;  %v14559_v48 = vpop.eup %14558 }
 0x408   :  { %10425 = vmatpush1.bf16.msra.mxu1 %v14059_v38  ;;  %10168 = vmatprep.subr.bf16.mxu0 %v14064_v29  ;;  %v6869_v38 = vadd.f32 1.0, %v14553_v31  ;;  %v14109_v29 = vld [vmem:[%s18988_s3 + $0x7b4] ss:$20 sps:$4 sm:$0xff]  }
 0x409   :  { %10426 = vmatprep.subr.bf16.mxu1 %v14067_v51  ;;  %v14561_v51 = vpop.eup %14560 }
 0x40a   :  { %14568 = vrcp.f32 %v6869_v38 }
 0x40b   :  { %10169 = vmatpush1.bf16.msra.mxu0 %v14062_v52  ;;  %v6878_v52 = vadd.f32 1.0, %v14555_v32 }
 0x40c   :  { %10427 = vmatpush1.bf16.msra.mxu1 %v14065_v40  ;;  %10170 = vmatprep.subr.bf16.mxu0 %v14070_v43  ;;  %v14104_v40 = vld [vmem:[%s18988_s3 + $0x7a8] ss:$20 sps:$4 sm:$0xff]   ;;  %v6880_v43 = vadd.f32 1.0, %v14557_v47 }
 0x40d   :  { %10428 = vmatprep.subr.bf16.mxu1 %v14073_v49  ;;  %v14107_v49 = vld [vmem:[%s18988_s3 + $0x7b0] ss:$20 sps:$4 sm:$0xff]   ;;  %14570 = vrcp.f32 %v6878_v52 }
 0x40e   :  { %14572 = vrcp.f32 %v6880_v43 }
 0x40f   :  { %10171 = vmatpush1.bf16.msra.mxu0 %v14068_v53  ;;  %v14112_v53 = vld [vmem:[%s18988_s3 + $0x7d4] ss:$20 sps:$4 sm:$0xff]  }
 0x410   :  { %10429 = vmatpush1.bf16.msra.mxu1 %v14071_v54  ;;  %10172 = vmatprep.subr.bf16.mxu0 %v14076_v61  ;;  %v6879_v54 = vadd.f32 1.0, %v14559_v48  ;;  %v14115_v61 = vld [vmem:[%s18988_s3 + $0x7dc] ss:$20 sps:$4 sm:$0xff]  }
 0x411   :  { %10430 = vmatprep.subr.bf16.mxu1 %v14079_v62  ;;  %v6881_v62 = vadd.f32 1.0, %v14561_v51 }
 0x412   :  { %14574 = vrcp.f32 %v6879_v54 }
 0x413   :  { %10173 = vmatpush1.bf16.msra.mxu0 %v14074_v56  ;;  %v14118_v56 = vld [vmem:[%s18988_s3 + $0x7fc] ss:$20 sps:$4 sm:$0xff]   ;;  %14576 = vrcp.f32 %v6881_v62 }
 0x414   :  { %10431 = vmatpush1.bf16.msra.mxu1 %v14077_v2  ;;  %10174 = vmatprep.subr.bf16.mxu0 %v14082_v34  ;;  %v14116_v2 = vld [vmem:[%s18988_s3 + $0x7f8] ss:$20 sps:$4 sm:$0xff]   ;;  %v14119_v34 = vld [vmem:[%s18988_s3 + $0x800] ss:$20 sps:$4 sm:$0xff]  }
 0x415   :  { %10432 = vmatprep.subr.bf16.mxu1 %v14085_v9  ;;  %v14563_v9 = vpop.eup %14562 }
 0x416   :  { %v14565_v13 = vpop.eup %14564  ;;  %v6938_v42 = vmul.f32 %v14563_v9, %v16724_v60  ;;  %v14139_v60 = vld [vmem:[%s18988_s3 + $0x87c] ss:$20 sps:$4 sm:$0xff]   ;;  %v14157_v9 = vld [vmem:[%s18988_s3 + $0x8f4] ss:$20 sps:$4 sm:$0xff]  }
 0x417   :  { %10175 = vmatpush1.bf16.msra.mxu0 %v14080_v14  ;;  %v14567_v14 = vpop.eup %14566 }
 0x418   :  { %10433 = vmatpush1.bf16.msra.mxu1 %v14083_v16  ;;  %10176 = vmatprep.subr.bf16.mxu0 %v14088_v0  ;;  %v14569_v16 = vpop.eup %14568  ;;  %v14125_v0 = vld [vmem:[%s18988_s3 + $0x828] ss:$20 sps:$4 sm:$0xff]  }
 0x419   :  { %10434 = vmatprep.subr.bf16.mxu1 %v14091_v4  ;;  %v14571_v4 = vpop.eup %14570  ;;  %v6941_v30 = vmul.f32 %v14569_v16, %v16733_v6  ;;  %v14158_v16 = vld [vmem:[%s18988_s3 + $0x910] ss:$20 sps:$4 sm:$0xff]  }
 0x41b   :  { %10177 = vmatpush1.bf16.msra.mxu0 %v14086_v17  ;;  %v14133_v17 = vld [vmem:[%s18988_s3 + $0x854] ss:$20 sps:$4 sm:$0xff]  }
 0x41c   :  { %10435 = vmatpush1.bf16.msra.mxu1 %v14089_v18  ;;  %10178 = vmatprep.subr.bf16.mxu0 %v14094_v19  ;;  %v14573_v18 = vpop.eup %14572 }
 0x41d   :  { %10436 = vmatprep.subr.bf16.mxu1 %v14097_v41  ;;  %v14575_v19 = vpop.eup %14574  ;;  %v14128_v41 = vld [vmem:[%s18988_s3 + $0x848] ss:$20 sps:$4 sm:$0xff]  }
 0x41e   :  { %v6951_v46 = vmul.f32 %v14575_v19, %v16745_v11  ;;  %v14137_v11 = vld [vmem:[%s18988_s3 + $0x878] ss:$20 sps:$4 sm:$0xff]  }
 0x41f   :  { %10179 = vmatpush1.bf16.msra.mxu0 %v14092_v24  ;;  %v14577_v24 = vpop.eup %14576  ;;  %v14172_v19 = vld [vmem:[%s18988_s3 + $0x964] ss:$20 sps:$4 sm:$0xff]  }
 0x420   :  { %10437 = vmatpush1.bf16.msra.mxu1 %v14095_v25  ;;  %10191 = vmatprep.subr.bf16.mxu0 %v14100_v26  ;;  %v6940_v25 = vmul.f32 %v14565_v13, %v16726_v1  ;;  %v14131_v26 = vld [vmem:[%s18988_s3 + $0x850] ss:$20 sps:$4 sm:$0xff]   ;;  %v6950_v1 = vmul.f32 %v14571_v4, %v16735_v7 }
 0x421   :  { %10449 = vmatprep.subr.bf16.mxu1 %v14103_v28  ;;  %v6939_v28 = vmul.f32 %v14567_v14, %v16731_v5  ;;  %v6953_v5 = vmul.f32 %v14577_v24, %v16747_v12  ;;  %v14142_v12 = vld [vmem:[%s18988_s3 + $0x89c] ss:$20 sps:$4 sm:$0xff]   ;;  %v14160_v14 = vld [vmem:[%s18988_s3 + $0x914] ss:$20 sps:$4 sm:$0xff]   ;;  %v14169_v4 = vld [vmem:[%s18988_s3 + $0x944] ss:$20 sps:$4 sm:$0xff]  }
 0x422   :  { %10181 = vmatmul.mubr.bf16.vlgmr.msra.gmra.mrb[24].mxu0 %v17703_v50  ;;  %v14155_v13 = vld [vmem:[%s18988_s3 + $0x8f0] ss:$20 sps:$4 sm:$0xff]   ;;  %v14170_v24 = vld [vmem:[%s18988_s3 + $0x960] ss:$20 sps:$4 sm:$0xff]  }
 0x423   :  { %10439 = vmatmul.mubr.bf16.vlgmr.msra.gmra.mrb[24].mxu1 %v17703_v50  ;;  %10192 = vmatpush1.bf16.msra.mxu0 %v14098_v45  ;;  %v6952_v45 = vmul.f32 %v14573_v18, %v16737_v8  ;;  %v14167_v18 = vld [vmem:[%s18988_s3 + $0x940] ss:$20 sps:$4 sm:$0xff]  }
 0x424   :  { %10223 = vmatprep.mubr.bf16.mxu0 %v17709_v59  ;;  %10450 = vmatpush1.bf16.msra.mxu1 %v14101_v36 }
 0x425   :  { %10481 = vmatprep.mubr.bf16.mxu1 %v17709_v59  ;;  %10193 = vmatprep.subr.bf16.mxu0 %v14106_v37 }
 0x426   :  { %10451 = vmatprep.subr.bf16.mxu1 %v14109_v29  ;;  %v14134_v29 = vld [vmem:[%s18988_s3 + $0x870] ss:$20 sps:$4 sm:$0xff]  }
 0x427   :  { %10194 = vmatpush1.bf16.msra.mxu0 %v14104_v40 }
 0x428   :  { %10452 = vmatpush1.bf16.msra.mxu1 %v14107_v49  ;;  %10195 = vmatprep.subr.bf16.mxu0 %v14112_v53  ;;  %v14145_v49 = vld [vmem:[%s18988_s3 + $0x8a4] ss:$20 sps:$4 sm:$0xff]  }
 0x429   :  { %10453 = vmatprep.subr.bf16.mxu1 %v14115_v61 }
 0x42b   :  { %10196 = vmatpush1.bf16.msra.mxu0 %v14110_v63  ;;  %v14140_v63 = vld [vmem:[%s18988_s3 + $0x898] ss:$20 sps:$4 sm:$0xff]  }
 0x42c   :  { %10454 = vmatpush1.bf16.msra.mxu1 %v14113_v55  ;;  %10197 = vmatprep.subr.bf16.mxu0 %v14118_v56  ;;  %v14143_v55 = vld [vmem:[%s18988_s3 + $0x8a0] ss:$20 sps:$4 sm:$0xff]   ;;  %v14148_v56 = vld [vmem:[%s18988_s3 + $0x8c4] ss:$20 sps:$4 sm:$0xff]  }
 0x42d   :  { %10455 = vmatprep.subr.bf16.mxu1 %v14121_v57  ;;  %v14151_v57 = vld [vmem:[%s18988_s3 + $0x8cc] ss:$20 sps:$4 sm:$0xff]  }
 0x42f   :  { %10198 = vmatpush1.bf16.msra.mxu0 %v14116_v2  ;;  %v14146_v2 = vld [vmem:[%s18988_s3 + $0x8c0] ss:$20 sps:$4 sm:$0xff]  }
 0x430   :  { %10456 = vmatpush1.bf16.msra.mxu1 %v14119_v34  ;;  %10199 = vmatprep.subr.bf16.mxu0 %v14124_v35  ;;  %v14149_v34 = vld [vmem:[%s18988_s3 + $0x8c8] ss:$20 sps:$4 sm:$0xff]   ;;  %v14154_v35 = vld [vmem:[%s18988_s3 + $0x8ec] ss:$20 sps:$4 sm:$0xff]  }
 0x431   :  { %10457 = vmatprep.subr.bf16.mxu1 %v14127_v10  ;;  %v14152_v10 = vld [vmem:[%s18988_s3 + $0x8e8] ss:$20 sps:$4 sm:$0xff]  }
 0x433   :  { %10200 = vmatpush1.bf16.msra.mxu0 %v14122_v39  ;;  %v14163_v39 = vld [vmem:[%s18988_s3 + $0x91c] ss:$20 sps:$4 sm:$0xff]  }
 0x434   :  { %10458 = vmatpush1.bf16.msra.mxu1 %v14125_v0  ;;  %10201 = vmatprep.subr.bf16.mxu0 %v14130_v3  ;;  %v14161_v0 = vld [vmem:[%s18988_s3 + $0x918] ss:$20 sps:$4 sm:$0xff]   ;;  %v14166_v3 = vld [vmem:[%s18988_s3 + $0x93c] ss:$20 sps:$4 sm:$0xff]  }
 0x435   :  { %v6648_v31 = vpop.f32.mrb[20].mxu0  ;;  %v6777_v44 = vpop.f32.mrb[20].mxu1  ;;  %10459 = vmatprep.subr.bf16.mxu1 %v14133_v17  ;;  %v14164_v17 = vld [vmem:[%s18988_s3 + $0x938] ss:$20 sps:$4 sm:$0xff]  }
 0x436   :  { %v6962_v32 = vmul.f32 %v6938_v42, %v6648_v31  ;;  %v6964_v33 = vmul.f32 %v6940_v25, %v6777_v44  ;;  %v6650_v36 = vpop.f32.mrb[21].mxu0  ;;  %v6779_v47 = vpop.f32.mrb[21].mxu1  ;;  %v14173_v42 = vld [vmem:[%s18988_s3 + $0x968] ss:$20 sps:$4 sm:$0xff]   ;;  %v14178_v25 = vld [vmem:[%s18988_s3 + $0x98c] ss:$20 sps:$4 sm:$0xff]  }
 0x437   :  { %v6963_v6 = vmul.f32 %v6939_v28, %v6650_v36  ;;  %v6965_v37 = vmul.f32 %v6941_v30, %v6779_v47  ;;  %v6652_v48 = vpop.f32.mrb[22].mxu0  ;;  %v6781_v38 = vpop.f32.mrb[22].mxu1  ;;  %10202 = vmatpush1.bf16.msra.mxu0 %v14128_v41  ;;  %v14175_v41 = vld [vmem:[%s18988_s3 + $0x96c] ss:$20 sps:$4 sm:$0xff]   ;;  %v14179_v28 = vld [vmem:[%s18988_s3 + $0x990] ss:$20 sps:$4 sm:$0xff]  }
 0x438   :  { %v6974_v7 = vmul.f32 %v6950_v1, %v6652_v48  ;;  %v6976_v51 = vmul.f32 %v6952_v45, %v6781_v38  ;;  %10460 = vmatpush1.bf16.msra.mxu1 %v14131_v26  ;;  %v6654_v8 = vpop.f32.mrb[23].mxu0  ;;  %v6783_v52 = vpop.f32.mrb[23].mxu1  ;;  %10203 = vmatprep.subr.bf16.mxu0 %v14136_v27  ;;  %v14181_v26 = vld [vmem:[%s18988_s3 + $0x994] ss:$20 sps:$4 sm:$0xff]   ;;  %v14187_v31 = vld [vmem:[%s18988_s3 + $0x9bc] ss:$20 sps:$4 sm:$0xff]  }
 0x439   :  { %v6975_v40 = vmul.f32 %v6951_v46, %v6654_v8  ;;  %v6977_v43 = vmul.f32 %v6953_v5, %v6783_v52  ;;  %10461 = vmatprep.subr.bf16.mxu1 %v14139_v60  ;;  %v14176_v27 = vld [vmem:[%s18988_s3 + $0x988] ss:$20 sps:$4 sm:$0xff]   ;;  %v14182_v44 = vld [vmem:[%s18988_s3 + $0x9b0] ss:$20 sps:$4 sm:$0xff]   ;;  %v14185_v60 = vld [vmem:[%s18988_s3 + $0x9b8] ss:$20 sps:$4 sm:$0xff]  }
 0x43a   :  { %v18167_v53 = vpack.c.bf16 %v6974_v7, %v6962_v32  ;;  %v18169_v54 = vpack.c.bf16 %v6976_v51, %v6964_v33  ;;  %v14184_v30 = vld [vmem:[%s18988_s3 + $0x9b4] ss:$20 sps:$4 sm:$0xff]   ;;  %v14190_v1 = vld [vmem:[%s18988_s3 + $0x9dc] ss:$20 sps:$4 sm:$0xff]   ;;  %v14193_v45 = vld [vmem:[%s18988_s3 + $0x9e4] ss:$20 sps:$4 sm:$0xff]  }
 0x43b   :  { %v18171_v61 = vpack.c.bf16 %v6975_v40, %v6963_v6  ;;  %v18173_v62 = vpack.c.bf16 %v6977_v43, %v6965_v37  ;;  %10204 = vmatpush1.bf16.msra.mxu0 %v14134_v29  ;;  %v14188_v32 = vld [vmem:[%s18988_s3 + $0x9d8] ss:$20 sps:$4 sm:$0xff]   ;;  %v14191_v33 = vld [vmem:[%s18988_s3 + $0x9e0] ss:$20 sps:$4 sm:$0xff]   ;;  %v14197_v5 = vld [vmem:[%s18988_s3 + $0xa08] ss:$20 sps:$4 sm:$0xff]  }
 0x43c   :  { %10462 = vmatpush1.bf16.msra.mxu1 %v14137_v11  ;;  %10205 = vmatprep.subr.bf16.mxu0 %v14142_v12  ;;  %v14196_v36 = vld [vmem:[%s18988_s3 + $0xa04] ss:$20 sps:$4 sm:$0xff]   ;;  %v14199_v47 = vld [vmem:[%s18988_s3 + $0xa0c] ss:$20 sps:$4 sm:$0xff]   ;;  %v14205_v37 = vld [vmem:[%s18988_s3 + $0xa34] ss:$20 sps:$4 sm:$0xff]  }
 0x43d   :  { %10463 = vmatprep.subr.bf16.mxu1 %v14145_v49  ;;  %v14194_v46 = vld [vmem:[%s18988_s3 + $0xa00] ss:$20 sps:$4 sm:$0xff]   ;;  %v14200_v48 = vld [vmem:[%s18988_s3 + $0xa28] ss:$20 sps:$4 sm:$0xff]   ;;  %v14203_v38 = vld [vmem:[%s18988_s3 + $0xa30] ss:$20 sps:$4 sm:$0xff]  }
 0x43e   :  { %v14202_v6 = vld [vmem:[%s18988_s3 + $0xa2c] ss:$20 sps:$4 sm:$0xff]   ;;  %v14208_v29 = vld [vmem:[%s18988_s3 + $0xa54] ss:$20 sps:$4 sm:$0xff]   ;;  %v14211_v7 = vld [vmem:[%s18988_s3 + $0xa5c] ss:$20 sps:$4 sm:$0xff]  }
 0x43f   :  { %10206 = vmatpush1.bf16.msra.mxu0 %v14140_v63  ;;  %v14206_v51 = vld [vmem:[%s18988_s3 + $0xa50] ss:$20 sps:$4 sm:$0xff]   ;;  %v14209_v8 = vld [vmem:[%s18988_s3 + $0xa58] ss:$20 sps:$4 sm:$0xff]   ;;  %v14215_v40 = vld [vmem:[%s18988_s3 + $0xa80] ss:$20 sps:$4 sm:$0xff]  }
 0x440   :  { %10464 = vmatpush1.bf16.msra.mxu1 %v14143_v55  ;;  %10207 = vmatprep.subr.bf16.mxu0 %v14148_v56  ;;  %v14214_v52 = vld [vmem:[%s18988_s3 + $0xa7c] ss:$20 sps:$4 sm:$0xff]   ;;  %v14217_v11 = vld [vmem:[%s18988_s3 + $0xa84] ss:$20 sps:$4 sm:$0xff]   ;;  %v14223_v49 = vld [vmem:[%s18988_s3 + $0xaac] ss:$20 sps:$4 sm:$0xff]  }
 0x441   :  { %10465 = vmatprep.subr.bf16.mxu1 %v14151_v57  ;;  %v14212_v12 = vld [vmem:[%s18988_s3 + $0xa78] ss:$20 sps:$4 sm:$0xff]   ;;  %v14218_v63 = vld [vmem:[%s18988_s3 + $0xaa0] ss:$20 sps:$4 sm:$0xff]   ;;  %v14221_v55 = vld [vmem:[%s18988_s3 + $0xaa8] ss:$20 sps:$4 sm:$0xff]  }
 0x442   :  { %v14220_v43 = vld [vmem:[%s18988_s3 + $0xaa4] ss:$20 sps:$4 sm:$0xff]   ;;  %v14226_v56 = vld [vmem:[%s18988_s3 + $0xacc] ss:$20 sps:$4 sm:$0xff]   ;;  %v14229_v57 = vld [vmem:[%s18988_s3 + $0xad4] ss:$20 sps:$4 sm:$0xff]  }
 0x443   :  { %10208 = vmatpush1.bf16.msra.mxu0 %v14146_v2  ;;  %v14224_v2 = vld [vmem:[%s18988_s3 + $0xac8] ss:$20 sps:$4 sm:$0xff]  }
 0x444   :  { %10466 = vmatpush1.bf16.msra.mxu1 %v14149_v34  ;;  %10209 = vmatprep.subr.bf16.mxu0 %v14154_v35  ;;  %v14227_v34 = vld [vmem:[%s18988_s3 + $0xad0] ss:$20 sps:$4 sm:$0xff]   ;;  %v14232_v35 = vld [vmem:[%s18988_s3 + $0xaf4] ss:$20 sps:$4 sm:$0xff]  }
 0x445   :  { %10467 = vmatprep.subr.bf16.mxu1 %v14157_v9  ;;  %v14235_v9 = vld [vmem:[%s18988_s3 + $0xafc] ss:$20 sps:$4 sm:$0xff]  }
 0x447   :  { %10210 = vmatpush1.bf16.msra.mxu0 %v14152_v10  ;;  %v14230_v10 = vld [vmem:[%s18988_s3 + $0xaf0] ss:$20 sps:$4 sm:$0xff]  }
 0x448   :  { %10468 = vmatpush1.bf16.msra.mxu1 %v14155_v13  ;;  %10211 = vmatprep.subr.bf16.mxu0 %v14160_v14  ;;  %v14233_v13 = vld [vmem:[%s18988_s3 + $0xaf8] ss:$20 sps:$4 sm:$0xff]   ;;  %v14238_v14 = vld [vmem:[%s18988_s3 + $0xb1c] ss:$20 sps:$4 sm:$0xff]  }
 0x449   :  { %10469 = vmatprep.subr.bf16.mxu1 %v14163_v39  ;;  %v14241_v39 = vld [vmem:[%s18988_s3 + $0xb24] ss:$20 sps:$4 sm:$0xff]  }
 0x44b   :  { %10212 = vmatpush1.bf16.msra.mxu0 %v14158_v16  ;;  %v14236_v16 = vld [vmem:[%s18988_s3 + $0xb18] ss:$20 sps:$4 sm:$0xff]  }
 0x44c   :  { %10470 = vmatpush1.bf16.msra.mxu1 %v14161_v0  ;;  %10213 = vmatprep.subr.bf16.mxu0 %v14166_v3  ;;  %v14239_v0 = vld [vmem:[%s18988_s3 + $0xb20] ss:$20 sps:$4 sm:$0xff]   ;;  %v14244_v3 = vld [vmem:[%s18988_s3 + $0xb44] ss:$20 sps:$4 sm:$0xff]  }
 0x44d   :  { %10471 = vmatprep.subr.bf16.mxu1 %v14169_v4  ;;  %v14247_v4 = vld [vmem:[%s18988_s3 + $0xb4c] ss:$20 sps:$4 sm:$0xff]  }
 0x44f   :  { %10214 = vmatpush1.bf16.msra.mxu0 %v14164_v17  ;;  %v14242_v17 = vld [vmem:[%s18988_s3 + $0xb40] ss:$20 sps:$4 sm:$0xff]  }
 0x450   :  { %10472 = vmatpush1.bf16.msra.mxu1 %v14167_v18  ;;  %10215 = vmatprep.subr.bf16.mxu0 %v14172_v19  ;;  %v14245_v18 = vld [vmem:[%s18988_s3 + $0xb48] ss:$20 sps:$4 sm:$0xff]   ;;  %v14250_v19 = vld [vmem:[%s18988_s3 + $0xb6c] ss:$20 sps:$4 sm:$0xff]  }
 0x451   :  { %10473 = vmatprep.subr.bf16.mxu1 %v14175_v41  ;;  %v14253_v41 = vld [vmem:[%s18988_s3 + $0xb74] ss:$20 sps:$4 sm:$0xff]  }
 0x453   :  { %10216 = vmatpush1.bf16.msra.mxu0 %v14170_v24  ;;  %v14248_v24 = vld [vmem:[%s18988_s3 + $0xb68] ss:$20 sps:$4 sm:$0xff]  }
 0x454   :  { %10474 = vmatpush1.bf16.msra.mxu1 %v14173_v42  ;;  %10217 = vmatprep.subr.bf16.mxu0 %v14178_v25  ;;  %v14251_v42 = vld [vmem:[%s18988_s3 + $0xb70] ss:$20 sps:$4 sm:$0xff]   ;;  %v14256_v25 = vld [vmem:[%s18988_s3 + $0xb94] ss:$20 sps:$4 sm:$0xff]  }
 0x455   :  { %10475 = vmatprep.subr.bf16.mxu1 %v14181_v26  ;;  %v14259_v26 = vld [vmem:[%s18988_s3 + $0xb9c] ss:$20 sps:$4 sm:$0xff]  }
 0x457   :  { %10218 = vmatpush1.bf16.msra.mxu0 %v14176_v27  ;;  %v14254_v27 = vld [vmem:[%s18988_s3 + $0xb90] ss:$20 sps:$4 sm:$0xff]  }
 0x458   :  { %10476 = vmatpush1.bf16.msra.mxu1 %v14179_v28  ;;  %10219 = vmatprep.subr.bf16.mxu0 %v14184_v30  ;;  %v14257_v28 = vld [vmem:[%s18988_s3 + $0xb98] ss:$20 sps:$4 sm:$0xff]   ;;  %v14262_v30 = vld [vmem:[%s18988_s3 + $0xbbc] ss:$20 sps:$4 sm:$0xff]  }
 0x459   :  { %10477 = vmatprep.subr.bf16.mxu1 %v14187_v31  ;;  %v14265_v31 = vld [vmem:[%s18988_s3 + $0xbc4] ss:$20 sps:$4 sm:$0xff]  }
 0x45b   :  { %10220 = vmatpush1.bf16.msra.mxu0 %v14182_v44  ;;  %v14260_v44 = vld [vmem:[%s18988_s3 + $0xbb8] ss:$20 sps:$4 sm:$0xff]  }
 0x45c   :  { %10478 = vmatpush1.bf16.msra.mxu1 %v14185_v60  ;;  %10221 = vmatprep.subr.bf16.mxu0 %v14190_v1  ;;  %v14263_v60 = vld [vmem:[%s18988_s3 + $0xbc0] ss:$20 sps:$4 sm:$0xff]   ;;  %v14268_v1 = vld [vmem:[%s18988_s3 + $0xbe4] ss:$20 sps:$4 sm:$0xff]  }
 0x45d   :  { %10479 = vmatprep.subr.bf16.mxu1 %v14193_v45  ;;  %v14271_v45 = vld [vmem:[%s18988_s3 + $0xbec] ss:$20 sps:$4 sm:$0xff]  }
 0x45f   :  { %10222 = vmatpush1.bf16.msra.mxu0 %v14188_v32  ;;  %v14266_v32 = vld [vmem:[%s18988_s3 + $0xbe0] ss:$20 sps:$4 sm:$0xff]  }
 0x460   :  { %10480 = vmatpush1.bf16.msra.mxu1 %v14191_v33  ;;  %10234 = vmatprep.subr.bf16.mxu0 %v14196_v36  ;;  %v14269_v33 = vld [vmem:[%s18988_s3 + $0xbe8] ss:$20 sps:$4 sm:$0xff]   ;;  %v14274_v36 = vld [vmem:[%s18988_s3 + $0xc0c] ss:$20 sps:$4 sm:$0xff]  }
 0x461   :  { %10492 = vmatprep.subr.bf16.mxu1 %v14199_v47  ;;  %v14277_v47 = vld [vmem:[%s18988_s3 + $0xc14] ss:$20 sps:$4 sm:$0xff]  }
 0x462   :  { %10224 = vmatmul.mubr.bf16.vlgmr.msra.gmra.mrb[24].mxu0 %v17705_v58 }
 0x463   :  { %10482 = vmatmul.mubr.bf16.vlgmr.msra.gmra.mrb[24].mxu1 %v17705_v58  ;;  %10235 = vmatpush1.bf16.msra.mxu0 %v14194_v46  ;;  %v14272_v46 = vld [vmem:[%s18988_s3 + $0xc08] ss:$20 sps:$4 sm:$0xff]  }
 0x464   :  { %10266 = vmatprep.mubr.bf16.mxu0 %v18171_v61  ;;  %10493 = vmatpush1.bf16.msra.mxu1 %v14197_v5  ;;  %v14275_v5 = vld [vmem:[%s18988_s3 + $0xc10] ss:$20 sps:$4 sm:$0xff]  }
 0x465   :  { %10524 = vmatprep.mubr.bf16.mxu1 %v18171_v61  ;;  %10236 = vmatprep.subr.bf16.mxu0 %v14202_v6  ;;  %v14280_v6 = vld [vmem:[%s18988_s3 + $0xc34] ss:$20 sps:$4 sm:$0xff]  }
 0x466   :  { %10494 = vmatprep.subr.bf16.mxu1 %v14205_v37  ;;  %v14283_v37 = vld [vmem:[%s18988_s3 + $0xc3c] ss:$20 sps:$4 sm:$0xff]  }
 0x467   :  { %10237 = vmatpush1.bf16.msra.mxu0 %v14200_v48  ;;  %v14278_v48 = vld [vmem:[%s18988_s3 + $0xc30] ss:$20 sps:$4 sm:$0xff]  }
 0x468   :  { %10495 = vmatpush1.bf16.msra.mxu1 %v14203_v38  ;;  %10238 = vmatprep.subr.bf16.mxu0 %v14208_v29  ;;  %v14281_v38 = vld [vmem:[%s18988_s3 + $0xc38] ss:$20 sps:$4 sm:$0xff]   ;;  %v14286_v29 = vld [vmem:[%s18988_s3 + $0xc5c] ss:$20 sps:$4 sm:$0xff]  }
 0x469   :  { %10496 = vmatprep.subr.bf16.mxu1 %v14211_v7  ;;  %v14289_v7 = vld [vmem:[%s18988_s3 + $0xc64] ss:$20 sps:$4 sm:$0xff]  }
 0x46b   :  { %10239 = vmatpush1.bf16.msra.mxu0 %v14206_v51  ;;  %v14284_v51 = vld [vmem:[%s18988_s3 + $0xc58] ss:$20 sps:$4 sm:$0xff]  }
 0x46c   :  { %10497 = vmatpush1.bf16.msra.mxu1 %v14209_v8  ;;  %10240 = vmatprep.subr.bf16.mxu0 %v14214_v52  ;;  %v14287_v8 = vld [vmem:[%s18988_s3 + $0xc60] ss:$20 sps:$4 sm:$0xff]   ;;  %v14292_v52 = vld [vmem:[%s18988_s3 + $0xc84] ss:$20 sps:$4 sm:$0xff]  }
 0x46d   :  { %10498 = vmatprep.subr.bf16.mxu1 %v14217_v11  ;;  %v14295_v11 = vld [vmem:[%s18988_s3 + $0xc8c] ss:$20 sps:$4 sm:$0xff]  }
 0x46f   :  { %10241 = vmatpush1.bf16.msra.mxu0 %v14212_v12  ;;  %v14290_v12 = vld [vmem:[%s18988_s3 + $0xc80] ss:$20 sps:$4 sm:$0xff]  }
 0x470   :  { %10499 = vmatpush1.bf16.msra.mxu1 %v14215_v40  ;;  %10242 = vmatprep.subr.bf16.mxu0 %v14220_v43  ;;  %v14293_v40 = vld [vmem:[%s18988_s3 + $0xc88] ss:$20 sps:$4 sm:$0xff]   ;;  %v14298_v43 = vld [vmem:[%s18988_s3 + $0xcac] ss:$20 sps:$4 sm:$0xff]  }
 0x471   :  { %10500 = vmatprep.subr.bf16.mxu1 %v14223_v49  ;;  %v14301_v49 = vld [vmem:[%s18988_s3 + $0xcb4] ss:$20 sps:$4 sm:$0xff]  }
 0x473   :  { %10243 = vmatpush1.bf16.msra.mxu0 %v14218_v63  ;;  %v14296_v63 = vld [vmem:[%s18988_s3 + $0xca8] ss:$20 sps:$4 sm:$0xff]  }
 0x474   :  { %10501 = vmatpush1.bf16.msra.mxu1 %v14221_v55  ;;  %10244 = vmatprep.subr.bf16.mxu0 %v14226_v56  ;;  %v14299_v55 = vld [vmem:[%s18988_s3 + $0xcb0] ss:$20 sps:$4 sm:$0xff]   ;;  %v14304_v56 = vld [vmem:[%s18988_s3 + $0xcd4] ss:$20 sps:$4 sm:$0xff]  }
 0x475   :  { %10502 = vmatprep.subr.bf16.mxu1 %v14229_v57  ;;  %v14307_v57 = vld [vmem:[%s18988_s3 + $0xcdc] ss:$20 sps:$4 sm:$0xff]  }
 0x477   :  { %10245 = vmatpush1.bf16.msra.mxu0 %v14224_v2  ;;  %v14302_v2 = vld [vmem:[%s18988_s3 + $0xcd0] ss:$20 sps:$4 sm:$0xff]  }
 0x478   :  { %10503 = vmatpush1.bf16.msra.mxu1 %v14227_v34  ;;  %10246 = vmatprep.subr.bf16.mxu0 %v14232_v35  ;;  %v14305_v34 = vld [vmem:[%s18988_s3 + $0xcd8] ss:$20 sps:$4 sm:$0xff]   ;;  %v14310_v35 = vld [vmem:[%s18988_s3 + $0xcfc] ss:$20 sps:$4 sm:$0xff]  }
 0x479   :  { %10504 = vmatprep.subr.bf16.mxu1 %v14235_v9  ;;  %v14313_v9 = vld [vmem:[%s18988_s3 + $0xd04] ss:$20 sps:$4 sm:$0xff]  }
 0x47b   :  { %10247 = vmatpush1.bf16.msra.mxu0 %v14230_v10  ;;  %v14308_v10 = vld [vmem:[%s18988_s3 + $0xcf8] ss:$20 sps:$4 sm:$0xff]  }
 0x47c   :  { %10505 = vmatpush1.bf16.msra.mxu1 %v14233_v13  ;;  %10248 = vmatprep.subr.bf16.mxu0 %v14238_v14  ;;  %v14311_v13 = vld [vmem:[%s18988_s3 + $0xd00] ss:$20 sps:$4 sm:$0xff]   ;;  %v14316_v14 = vld [vmem:[%s18988_s3 + $0xd24] ss:$20 sps:$4 sm:$0xff]  }
 0x47d   :  { %10506 = vmatprep.subr.bf16.mxu1 %v14241_v39  ;;  %v14319_v39 = vld [vmem:[%s18988_s3 + $0xd2c] ss:$20 sps:$4 sm:$0xff]  }
 0x47f   :  { %10249 = vmatpush1.bf16.msra.mxu0 %v14236_v16  ;;  %v14314_v16 = vld [vmem:[%s18988_s3 + $0xd20] ss:$20 sps:$4 sm:$0xff]  }
 0x480   :  { %10507 = vmatpush1.bf16.msra.mxu1 %v14239_v0  ;;  %10250 = vmatprep.subr.bf16.mxu0 %v14244_v3  ;;  %v14317_v0 = vld [vmem:[%s18988_s3 + $0xd28] ss:$20 sps:$4 sm:$0xff]   ;;  %v14322_v3 = vld [vmem:[%s18988_s3 + $0xd4c] ss:$20 sps:$4 sm:$0xff]  }
 0x481   :  { %10508 = vmatprep.subr.bf16.mxu1 %v14247_v4  ;;  %v14325_v4 = vld [vmem:[%s18988_s3 + $0xd54] ss:$20 sps:$4 sm:$0xff]  }
 0x483   :  { %10251 = vmatpush1.bf16.msra.mxu0 %v14242_v17  ;;  %v14320_v17 = vld [vmem:[%s18988_s3 + $0xd48] ss:$20 sps:$4 sm:$0xff]  }
 0x484   :  { %10509 = vmatpush1.bf16.msra.mxu1 %v14245_v18  ;;  %10252 = vmatprep.subr.bf16.mxu0 %v14250_v19  ;;  %v14323_v18 = vld [vmem:[%s18988_s3 + $0xd50] ss:$20 sps:$4 sm:$0xff]   ;;  %v14328_v19 = vld [vmem:[%s18988_s3 + $0xd74] ss:$20 sps:$4 sm:$0xff]  }
 0x485   :  { %10510 = vmatprep.subr.bf16.mxu1 %v14253_v41  ;;  %v14331_v41 = vld [vmem:[%s18988_s3 + $0xd7c] ss:$20 sps:$4 sm:$0xff]  }
 0x487   :  { %10253 = vmatpush1.bf16.msra.mxu0 %v14248_v24  ;;  %v14326_v24 = vld [vmem:[%s18988_s3 + $0xd70] ss:$20 sps:$4 sm:$0xff]  }
 0x488   :  { %10511 = vmatpush1.bf16.msra.mxu1 %v14251_v42  ;;  %10254 = vmatprep.subr.bf16.mxu0 %v14256_v25  ;;  %v14329_v42 = vld [vmem:[%s18988_s3 + $0xd78] ss:$20 sps:$4 sm:$0xff]   ;;  %v14334_v25 = vld [vmem:[%s18988_s3 + $0xd9c] ss:$20 sps:$4 sm:$0xff]  }
 0x489   :  { %10512 = vmatprep.subr.bf16.mxu1 %v14259_v26  ;;  %v14337_v26 = vld [vmem:[%s18988_s3 + $0xda4] ss:$20 sps:$4 sm:$0xff]  }
 0x48b   :  { %10255 = vmatpush1.bf16.msra.mxu0 %v14254_v27  ;;  %v14332_v27 = vld [vmem:[%s18988_s3 + $0xd98] ss:$20 sps:$4 sm:$0xff]  }
 0x48c   :  { %10513 = vmatpush1.bf16.msra.mxu1 %v14257_v28  ;;  %10256 = vmatprep.subr.bf16.mxu0 %v14262_v30  ;;  %v14335_v28 = vld [vmem:[%s18988_s3 + $0xda0] ss:$20 sps:$4 sm:$0xff]   ;;  %v14340_v30 = vld [vmem:[%s18988_s3 + $0xdc4] ss:$20 sps:$4 sm:$0xff]  }
 0x48d   :  { %10514 = vmatprep.subr.bf16.mxu1 %v14265_v31  ;;  %v14343_v31 = vld [vmem:[%s18988_s3 + $0xdcc] ss:$20 sps:$4 sm:$0xff]  }
 0x48f   :  { %10257 = vmatpush1.bf16.msra.mxu0 %v14260_v44  ;;  %v14338_v44 = vld [vmem:[%s18988_s3 + $0xdc0] ss:$20 sps:$4 sm:$0xff]  }
 0x490   :  { %10515 = vmatpush1.bf16.msra.mxu1 %v14263_v60  ;;  %10258 = vmatprep.subr.bf16.mxu0 %v14268_v1  ;;  %v14341_v60 = vld [vmem:[%s18988_s3 + $0xdc8] ss:$20 sps:$4 sm:$0xff]   ;;  %v14346_v1 = vld [vmem:[%s18988_s3 + $0xdec] ss:$20 sps:$4 sm:$0xff]  }
 0x491   :  { %10516 = vmatprep.subr.bf16.mxu1 %v14271_v45  ;;  %v14349_v45 = vld [vmem:[%s18988_s3 + $0xdf4] ss:$20 sps:$4 sm:$0xff]  }
 0x493   :  { %10259 = vmatpush1.bf16.msra.mxu0 %v14266_v32  ;;  %v14344_v32 = vld [vmem:[%s18988_s3 + $0xde8] ss:$20 sps:$4 sm:$0xff]  }
 0x494   :  { %10517 = vmatpush1.bf16.msra.mxu1 %v14269_v33  ;;  %10260 = vmatprep.subr.bf16.mxu0 %v14274_v36  ;;  %v14347_v33 = vld [vmem:[%s18988_s3 + $0xdf0] ss:$20 sps:$4 sm:$0xff]   ;;  %v14352_v36 = vld [vmem:[%s18988_s3 + $0xe14] ss:$20 sps:$4 sm:$0xff]  }
 0x495   :  { %10518 = vmatprep.subr.bf16.mxu1 %v14277_v47  ;;  %v14355_v47 = vld [vmem:[%s18988_s3 + $0xe1c] ss:$20 sps:$4 sm:$0xff]  }
 0x497   :  { %10261 = vmatpush1.bf16.msra.mxu0 %v14272_v46  ;;  %v14350_v46 = vld [vmem:[%s18988_s3 + $0xe10] ss:$20 sps:$4 sm:$0xff]  }
 0x498   :  { %10519 = vmatpush1.bf16.msra.mxu1 %v14275_v5  ;;  %10262 = vmatprep.subr.bf16.mxu0 %v14280_v6  ;;  %v14353_v5 = vld [vmem:[%s18988_s3 + $0xe18] ss:$20 sps:$4 sm:$0xff]   ;;  %v14358_v6 = vld [vmem:[%s18988_s3 + $0xe3c] ss:$20 sps:$4 sm:$0xff]  }
 0x499   :  { %10520 = vmatprep.subr.bf16.mxu1 %v14283_v37  ;;  %v14361_v37 = vld [vmem:[%s18988_s3 + $0xe44] ss:$20 sps:$4 sm:$0xff]  }
 0x49b   :  { %10263 = vmatpush1.bf16.msra.mxu0 %v14278_v48  ;;  %v14356_v48 = vld [vmem:[%s18988_s3 + $0xe38] ss:$20 sps:$4 sm:$0xff]  }
 0x49c   :  { %10521 = vmatpush1.bf16.msra.mxu1 %v14281_v38  ;;  %10264 = vmatprep.subr.bf16.mxu0 %v14286_v29  ;;  %v14359_v38 = vld [vmem:[%s18988_s3 + $0xe40] ss:$20 sps:$4 sm:$0xff]   ;;  %v14364_v29 = vld [vmem:[%s18988_s3 + $0xe64] ss:$20 sps:$4 sm:$0xff]  }
 0x49d   :  { %10522 = vmatprep.subr.bf16.mxu1 %v14289_v7  ;;  %v14367_v7 = vld [vmem:[%s18988_s3 + $0xe6c] ss:$20 sps:$4 sm:$0xff]  }
 0x49f   :  { %10265 = vmatpush1.bf16.msra.mxu0 %v14284_v51  ;;  %v14362_v51 = vld [vmem:[%s18988_s3 + $0xe60] ss:$20 sps:$4 sm:$0xff]  }
 0x4a0   :  { %10523 = vmatpush1.bf16.msra.mxu1 %v14287_v8  ;;  %10277 = vmatprep.subr.bf16.mxu0 %v14292_v52  ;;  %v14365_v8 = vld [vmem:[%s18988_s3 + $0xe68] ss:$20 sps:$4 sm:$0xff]   ;;  %v14370_v52 = vld [vmem:[%s18988_s3 + $0xe8c] ss:$20 sps:$4 sm:$0xff]  }
 0x4a1   :  { %10535 = vmatprep.subr.bf16.mxu1 %v14295_v11  ;;  %v14373_v11 = vld [vmem:[%s18988_s3 + $0xe94] ss:$20 sps:$4 sm:$0xff]  }
 0x4a2   :  { %10267 = vmatmul.mubr.bf16.vlgmr.msra.gmra.mrb[24].mxu0 %v18167_v53 }
 0x4a3   :  { %10525 = vmatmul.mubr.bf16.vlgmr.msra.gmra.mrb[24].mxu1 %v18167_v53  ;;  %10278 = vmatpush1.bf16.msra.mxu0 %v14290_v12  ;;  %v14368_v12 = vld [vmem:[%s18988_s3 + $0xe88] ss:$20 sps:$4 sm:$0xff]  }
 0x4a4   :  { %10309 = vmatprep.mubr.bf16.mxu0 %v18173_v62  ;;  %10536 = vmatpush1.bf16.msra.mxu1 %v14293_v40  ;;  %v14371_v40 = vld [vmem:[%s18988_s3 + $0xe90] ss:$20 sps:$4 sm:$0xff]  }
 0x4a5   :  { %10567 = vmatprep.mubr.bf16.mxu1 %v18173_v62  ;;  %10279 = vmatprep.subr.bf16.mxu0 %v14298_v43  ;;  %v14376_v43 = vld [vmem:[%s18988_s3 + $0xeb4] ss:$20 sps:$4 sm:$0xff]  }
 0x4a6   :  { %10537 = vmatprep.subr.bf16.mxu1 %v14301_v49  ;;  %v14379_v49 = vld [vmem:[%s18988_s3 + $0xebc] ss:$20 sps:$4 sm:$0xff]  }
 0x4a7   :  { %10280 = vmatpush1.bf16.msra.mxu0 %v14296_v63  ;;  %v14374_v63 = vld [vmem:[%s18988_s3 + $0xeb0] ss:$20 sps:$4 sm:$0xff]  }
 0x4a8   :  { %10538 = vmatpush1.bf16.msra.mxu1 %v14299_v55  ;;  %10281 = vmatprep.subr.bf16.mxu0 %v14304_v56  ;;  %v14377_v55 = vld [vmem:[%s18988_s3 + $0xeb8] ss:$20 sps:$4 sm:$0xff]   ;;  %v14382_v56 = vld [vmem:[%s18988_s3 + $0xedc] ss:$20 sps:$4 sm:$0xff]  }
 0x4a9   :  { %10539 = vmatprep.subr.bf16.mxu1 %v14307_v57  ;;  %v14385_v57 = vld [vmem:[%s18988_s3 + $0xee4] ss:$20 sps:$4 sm:$0xff]  }
 0x4ab   :  { %10282 = vmatpush1.bf16.msra.mxu0 %v14302_v2  ;;  %v14380_v2 = vld [vmem:[%s18988_s3 + $0xed8] ss:$20 sps:$4 sm:$0xff]  }
 0x4ac   :  { %10540 = vmatpush1.bf16.msra.mxu1 %v14305_v34  ;;  %10283 = vmatprep.subr.bf16.mxu0 %v14310_v35  ;;  %v14383_v34 = vld [vmem:[%s18988_s3 + $0xee0] ss:$20 sps:$4 sm:$0xff]   ;;  %v14386_v35 = vld [vmem:[%s18988_s3 + $0x150] ss:$20 sps:$4 sm:$0xff]  }
 0x4ad   :  { %10541 = vmatprep.subr.bf16.mxu1 %v14313_v9  ;;  %v14387_v9 = vld [vmem:[%s18988_s3 + $0x3d0] ss:$20 sps:$4 sm:$0xff]  }
 0x4af   :  { %10284 = vmatpush1.bf16.msra.mxu0 %v14308_v10  ;;  %v14388_v10 = vld [vmem:[%s18988_s3 + $0x10] ss:$20 sps:$4 sm:$0xff]  }
 0x4b0   :  { %10542 = vmatpush1.bf16.msra.mxu1 %v14311_v13  ;;  %10285 = vmatprep.subr.bf16.mxu0 %v14316_v14  ;;  %v14389_v13 = vld [vmem:[%s18988_s3 + $0x290] ss:$20 sps:$4 sm:$0xff]   ;;  %v14390_v14 = vld [vmem:[%s18988_s3 + $0x178] ss:$20 sps:$4 sm:$0xff]  }
 0x4b1   :  { %10543 = vmatprep.subr.bf16.mxu1 %v14319_v39  ;;  %v14391_v39 = vld [vmem:[%s18988_s3 + $0x3f8] ss:$20 sps:$4 sm:$0xff]  }
 0x4b3   :  { %10286 = vmatpush1.bf16.msra.mxu0 %v14314_v16  ;;  %v14392_v16 = vld [vmem:[%s18988_s3 + $0x38] ss:$20 sps:$4 sm:$0xff]  }
 0x4b4   :  { %10544 = vmatpush1.bf16.msra.mxu1 %v14317_v0  ;;  %10287 = vmatprep.subr.bf16.mxu0 %v14322_v3  ;;  %v14393_v0 = vld [vmem:[%s18988_s3 + $0x2b8] ss:$20 sps:$4 sm:$0xff]   ;;  %v14394_v3 = vld [vmem:[%s18988_s3 + $0x1a0] ss:$20 sps:$4 sm:$0xff]  }
 0x4b5   :  { %10545 = vmatprep.subr.bf16.mxu1 %v14325_v4  ;;  %v14395_v4 = vld [vmem:[%s18988_s3 + $0x420] ss:$20 sps:$4 sm:$0xff]  }
 0x4b7   :  { %10288 = vmatpush1.bf16.msra.mxu0 %v14320_v17  ;;  %v14397_v17 = vld [vmem:[%s18988_s3 + $0x2e0] ss:$20 sps:$4 sm:$0xff]  }
 0x4b8   :  { %10546 = vmatpush1.bf16.msra.mxu1 %v14323_v18  ;;  %10289 = vmatprep.subr.bf16.mxu0 %v14328_v19  ;;  %v14399_v18 = vld [vmem:[%s18988_s3 + $0x448] ss:$20 sps:$4 sm:$0xff]  }
 0x4b9   :  { %10547 = vmatprep.subr.bf16.mxu1 %v14331_v41  ;;  %v14400_v19 = vld [vmem:[%s18988_s3 + $0x88] ss:$20 sps:$4 sm:$0xff]  }
 0x4ba   :  { %v14401_v41 = vld [vmem:[%s18988_s3 + $0x308] ss:$20 sps:$4 sm:$0xff]  }
 0x4bb   :  { %10290 = vmatpush1.bf16.msra.mxu0 %v14326_v24  ;;  %v14402_v24 = vld [vmem:[%s18988_s3 + $0x1f0] ss:$20 sps:$4 sm:$0xff]  }
 0x4bc   :  { %10548 = vmatpush1.bf16.msra.mxu1 %v14329_v42  ;;  %10291 = vmatprep.subr.bf16.mxu0 %v14334_v25  ;;  %v14403_v42 = vld [vmem:[%s18988_s3 + $0x470] ss:$20 sps:$4 sm:$0xff]  }
 0x4bd   :  { %10549 = vmatprep.subr.bf16.mxu1 %v14337_v26  ;;  %v14404_v25 = vld [vmem:[%s18988_s3 + $0xb0] ss:$20 sps:$4 sm:$0xff]  }
 0x4be   :  { %v14405_v26 = vld [vmem:[%s18988_s3 + $0x330] ss:$20 sps:$4 sm:$0xff]  }
 0x4bf   :  { %10292 = vmatpush1.bf16.msra.mxu0 %v14332_v27  ;;  %v14406_v27 = vld [vmem:[%s18988_s3 + $0x218] ss:$20 sps:$4 sm:$0xff]  }
 0x4c0   :  { %10550 = vmatpush1.bf16.msra.mxu1 %v14335_v28  ;;  %10293 = vmatprep.subr.bf16.mxu0 %v14340_v30  ;;  %v14407_v28 = vld [vmem:[%s18988_s3 + $0x498] ss:$20 sps:$4 sm:$0xff]  }
 0x4c1   :  { %10551 = vmatprep.subr.bf16.mxu1 %v14343_v31  ;;  %v14408_v30 = vld [vmem:[%s18988_s3 + $0xd8] ss:$20 sps:$4 sm:$0xff]  }
 0x4c2   :  { %v14409_v31 = vld [vmem:[%s18988_s3 + $0x358] ss:$20 sps:$4 sm:$0xff]  }
 0x4c3   :  { %10294 = vmatpush1.bf16.msra.mxu0 %v14338_v44  ;;  %v14410_v44 = vld [vmem:[%s18988_s3 + $0x240] ss:$20 sps:$4 sm:$0xff]  }
 0x4c4   :  { %10552 = vmatpush1.bf16.msra.mxu1 %v14341_v60  ;;  %10295 = vmatprep.subr.bf16.mxu0 %v14346_v1  ;;  %v14411_v60 = vld [vmem:[%s18988_s3 + $0x4c0] ss:$20 sps:$4 sm:$0xff]  }
 0x4c5   :  { %10553 = vmatprep.subr.bf16.mxu1 %v14349_v45  ;;  %v14412_v1 = vld [vmem:[%s18988_s3 + $0x100] ss:$20 sps:$4 sm:$0xff]  }
 0x4c6   :  { %v14413_v45 = vld [vmem:[%s18988_s3 + $0x380] ss:$20 sps:$4 sm:$0xff]  }
 0x4c7   :  { %10296 = vmatpush1.bf16.msra.mxu0 %v14344_v32  ;;  %v14414_v32 = vld [vmem:[%s18988_s3 + $0x268] ss:$20 sps:$4 sm:$0xff]  }
 0x4c8   :  { %10554 = vmatpush1.bf16.msra.mxu1 %v14347_v33  ;;  %10297 = vmatprep.subr.bf16.mxu0 %v14352_v36  ;;  %v14415_v33 = vld [vmem:[%s18988_s3 + $0x4e8] ss:$20 sps:$4 sm:$0xff]  }
 0x4c9   :  { %10555 = vmatprep.subr.bf16.mxu1 %v14355_v47  ;;  %v14416_v36 = vld [vmem:[%s18988_s3 + $0x128] ss:$20 sps:$4 sm:$0xff]  }
 0x4ca   :  { %v14417_v47 = vld [vmem:[%s18988_s3 + $0x3a8] ss:$20 sps:$4 sm:$0xff]  }
 0x4cb   :  { %10298 = vmatpush1.bf16.msra.mxu0 %v14350_v46  ;;  %v14418_v46 = vld [vmem:[%s18988_s3 + $0x650] ss:$20 sps:$4 sm:$0xff]  }
 0x4cc   :  { %10556 = vmatpush1.bf16.msra.mxu1 %v14353_v5  ;;  %10299 = vmatprep.subr.bf16.mxu0 %v14358_v6  ;;  %v14419_v5 = vld [vmem:[%s18988_s3 + $0x8d0] ss:$20 sps:$4 sm:$0xff]  }
 0x4cd   :  { %10557 = vmatprep.subr.bf16.mxu1 %v14361_v37  ;;  %v14420_v6 = vld [vmem:[%s18988_s3 + $0x510] ss:$20 sps:$4 sm:$0xff]  }
 0x4ce   :  { %v14421_v37 = vld [vmem:[%s18988_s3 + $0x790] ss:$20 sps:$4 sm:$0xff]  }
 0x4cf   :  { %10300 = vmatpush1.bf16.msra.mxu0 %v14356_v48  ;;  %v14422_v48 = vld [vmem:[%s18988_s3 + $0x678] ss:$20 sps:$4 sm:$0xff]  }
 0x4d0   :  { %10558 = vmatpush1.bf16.msra.mxu1 %v14359_v38  ;;  %10301 = vmatprep.subr.bf16.mxu0 %v14364_v29  ;;  %v14423_v38 = vld [vmem:[%s18988_s3 + $0x8f8] ss:$20 sps:$4 sm:$0xff]  }
 0x4d1   :  { %10559 = vmatprep.subr.bf16.mxu1 %v14367_v7  ;;  %v14424_v29 = vld [vmem:[%s18988_s3 + $0x538] ss:$20 sps:$4 sm:$0xff]  }
 0x4d2   :  { %v14425_v7 = vld [vmem:[%s18988_s3 + $0x7b8] ss:$20 sps:$4 sm:$0xff]  }
 0x4d3   :  { %10302 = vmatpush1.bf16.msra.mxu0 %v14362_v51  ;;  %v14429_v51 = vld [vmem:[%s18988_s3 + $0x7e0] ss:$20 sps:$4 sm:$0xff]  }
 0x4d4   :  { %10560 = vmatpush1.bf16.msra.mxu1 %v14365_v8  ;;  %10303 = vmatprep.subr.bf16.mxu0 %v14370_v52  ;;  %v14431_v8 = vld [vmem:[%s18988_s3 + $0x948] ss:$20 sps:$4 sm:$0xff]  }
 0x4d5   :  { %10561 = vmatprep.subr.bf16.mxu1 %v14373_v11  ;;  %v14432_v52 = vld [vmem:[%s18988_s3 + $0x588] ss:$20 sps:$4 sm:$0xff]  }
 0x4d6   :  { %v14433_v11 = vld [vmem:[%s18988_s3 + $0x808] ss:$20 sps:$4 sm:$0xff]  }
 0x4d7   :  { %10304 = vmatpush1.bf16.msra.mxu0 %v14368_v12  ;;  %v14434_v12 = vld [vmem:[%s18988_s3 + $0x6f0] ss:$20 sps:$4 sm:$0xff]  }
 0x4d8   :  { %10562 = vmatpush1.bf16.msra.mxu1 %v14371_v40  ;;  %10305 = vmatprep.subr.bf16.mxu0 %v14376_v43  ;;  %v14435_v40 = vld [vmem:[%s18988_s3 + $0x970] ss:$20 sps:$4 sm:$0xff]  }
 0x4d9   :  { %10563 = vmatprep.subr.bf16.mxu1 %v14379_v49  ;;  %v14436_v43 = vld [vmem:[%s18988_s3 + $0x5b0] ss:$20 sps:$4 sm:$0xff]  }
 0x4da   :  { %v14437_v49 = vld [vmem:[%s18988_s3 + $0x830] ss:$20 sps:$4 sm:$0xff]  }
 0x4db   :  { %10306 = vmatpush1.bf16.msra.mxu0 %v14374_v63  ;;  %v14438_v63 = vld [vmem:[%s18988_s3 + $0x718] ss:$20 sps:$4 sm:$0xff]  }
 0x4dc   :  { %10564 = vmatpush1.bf16.msra.mxu1 %v14377_v55  ;;  %10307 = vmatprep.subr.bf16.mxu0 %v14382_v56  ;;  %v14439_v55 = vld [vmem:[%s18988_s3 + $0x998] ss:$20 sps:$4 sm:$0xff]  }
 0x4dd   :  { %10565 = vmatprep.subr.bf16.mxu1 %v14385_v57  ;;  %v14440_v56 = vld [vmem:[%s18988_s3 + $0x5d8] ss:$20 sps:$4 sm:$0xff]  }
 0x4de   :  { %v14441_v57 = vld [vmem:[%s18988_s3 + $0x858] ss:$20 sps:$4 sm:$0xff]  }
 0x4df   :  { %10308 = vmatpush1.bf16.msra.mxu0 %v14380_v2  ;;  %v14442_v2 = vld [vmem:[%s18988_s3 + $0x740] ss:$20 sps:$4 sm:$0xff]  }
 0x4e0   :  { %10566 = vmatpush1.bf16.msra.mxu1 %v14383_v34  ;;  %12235 = vmatprep.subr.bf16.mxu0 %v14386_v35  ;;  %v14443_v34 = vld [vmem:[%s18988_s3 + $0x9c0] ss:$20 sps:$4 sm:$0xff]  }
 0x4e1   :  { %12257 = vmatprep.subr.bf16.mxu1 %v14387_v9  ;;  %v14444_v35 = vld [vmem:[%s18988_s3 + $0x600] ss:$20 sps:$4 sm:$0xff]  }
 0x4e2   :  { %10310 = vmatmul.mubr.bf16.vlgmr.msra.gmra.mrb[24].mxu0 %v18169_v54  ;;  %v14445_v9 = vld [vmem:[%s18988_s3 + $0x880] ss:$20 sps:$4 sm:$0xff]  }
 0x4e3   :  { %10568 = vmatmul.mubr.bf16.vlgmr.msra.gmra.mrb[24].mxu1 %v18169_v54  ;;  %12236 = vmatpush3.bf16.msra.mxu0 %v14388_v10  ;;  %v14446_v10 = vld [vmem:[%s18988_s3 + $0x768] ss:$20 sps:$4 sm:$0xff]  }
 0x4e4   :  { %10610 = vmatprep.mubr.bf16.mxu0 %v17241_v22  ;;  %12258 = vmatpush3.bf16.msra.mxu1 %v14389_v13  ;;  %v14396_v22 = vld [vmem:[%s18988_s3 + $0x60] ss:$20 sps:$4 sm:$0xff]   ;;  %v14447_v13 = vld [vmem:[%s18988_s3 + $0x9e8] ss:$20 sps:$4 sm:$0xff]  }
 0x4e5   :  { %10651 = vmatprep.mubr.bf16.mxu1 %v17243_v23  ;;  %12237 = vmatprep.subr.bf16.mxu0 %v14390_v14  ;;  %v14398_v23 = vld [vmem:[%s18988_s3 + $0x1c8] ss:$20 sps:$4 sm:$0xff]  }
 0x4e6   :  { %12259 = vmatprep.subr.bf16.mxu1 %v14391_v39  ;;  %v14448_v14 = vld [vmem:[%s18988_s3 + $0x628] ss:$20 sps:$4 sm:$0xff]  }
 0x4e7   :  { %12238 = vmatpush3.bf16.msra.mxu0 %v14392_v16  ;;  %v14449_v39 = vld [vmem:[%s18988_s3 + $0x8a8] ss:$20 sps:$4 sm:$0xff]   ;;  %v14450_v16 = vld [vmem:[%s18988_s3 + $0xb50] ss:$20 sps:$4 sm:$0xff]  }
 0x4e8   :  { %12260 = vmatpush3.bf16.msra.mxu1 %v14393_v0  ;;  %12239 = vmatprep.subr.bf16.mxu0 %v14394_v3  ;;  %v14451_v0 = vld [vmem:[%s18988_s3 + $0xdd0] ss:$20 sps:$4 sm:$0xff]  }
 0x4e9   :  { %12261 = vmatprep.subr.bf16.mxu1 %v14395_v4  ;;  %v14452_v3 = vld [vmem:[%s18988_s3 + $0xa10] ss:$20 sps:$4 sm:$0xff]  }
 0x4ea   :  { %v14453_v4 = vld [vmem:[%s18988_s3 + $0xc90] ss:$20 sps:$4 sm:$0xff]  }
 0x4eb   :  { %12240 = vmatpush3.bf16.msra.mxu0 %v14396_v22  ;;  %v14454_v22 = vld [vmem:[%s18988_s3 + $0xb78] ss:$20 sps:$4 sm:$0xff]  }
 0x4ec   :  { %12262 = vmatpush3.bf16.msra.mxu1 %v14397_v17  ;;  %12241 = vmatprep.subr.bf16.mxu0 %v14398_v23  ;;  %v14455_v17 = vld [vmem:[%s18988_s3 + $0xdf8] ss:$20 sps:$4 sm:$0xff]  }
 0x4ed   :  { %12263 = vmatprep.subr.bf16.mxu1 %v14399_v18  ;;  %v14456_v23 = vld [vmem:[%s18988_s3 + $0xa38] ss:$20 sps:$4 sm:$0xff]  }
 0x4ee   :  { %v14457_v18 = vld [vmem:[%s18988_s3 + $0xcb8] ss:$20 sps:$4 sm:$0xff]  }
 0x4ef   :  { %12242 = vmatpush3.bf16.msra.mxu0 %v14400_v19  ;;  %v14461_v19 = vld [vmem:[%s18988_s3 + $0xce0] ss:$20 sps:$4 sm:$0xff]  }
 0x4f0   :  { %12264 = vmatpush3.bf16.msra.mxu1 %v14401_v41  ;;  %12243 = vmatprep.subr.bf16.mxu0 %v14402_v24  ;;  %v14463_v41 = vld [vmem:[%s18988_s3 + $0xe48] ss:$20 sps:$4 sm:$0xff]  }
 0x4f1   :  { %12265 = vmatprep.subr.bf16.mxu1 %v14403_v42  ;;  %v14464_v24 = vld [vmem:[%s18988_s3 + $0xa88] ss:$20 sps:$4 sm:$0xff]  }
 0x4f2   :  { %v14465_v42 = vld [vmem:[%s18988_s3 + $0xd08] ss:$20 sps:$4 sm:$0xff]  }
 0x4f3   :  { %12244 = vmatpush3.bf16.msra.mxu0 %v14404_v25  ;;  %v14466_v25 = vld [vmem:[%s18988_s3 + $0xbf0] ss:$20 sps:$4 sm:$0xff]  }
 0x4f4   :  { %12266 = vmatpush3.bf16.msra.mxu1 %v14405_v26  ;;  %12245 = vmatprep.subr.bf16.mxu0 %v14406_v27  ;;  %v14467_v26 = vld [vmem:[%s18988_s3 + $0xe70] ss:$20 sps:$4 sm:$0xff]  }
 0x4f5   :  { %12267 = vmatprep.subr.bf16.mxu1 %v14407_v28  ;;  %v14468_v27 = vld [vmem:[%s18988_s3 + $0xab0] ss:$20 sps:$4 sm:$0xff]  }
 0x4f6   :  { %v14469_v28 = vld [vmem:[%s18988_s3 + $0xd30] ss:$20 sps:$4 sm:$0xff]  }
 0x4f7   :  { %12246 = vmatpush3.bf16.msra.mxu0 %v14408_v30  ;;  %v14470_v30 = vld [vmem:[%s18988_s3 + $0xc18] ss:$20 sps:$4 sm:$0xff]  }
 0x4f8   :  { %12268 = vmatpush3.bf16.msra.mxu1 %v14409_v31  ;;  %12247 = vmatprep.subr.bf16.mxu0 %v14410_v44  ;;  %v14471_v31 = vld [vmem:[%s18988_s3 + $0xe98] ss:$20 sps:$4 sm:$0xff]  }
 0x4f9   :  { %12269 = vmatprep.subr.bf16.mxu1 %v14411_v60  ;;  %v14472_v44 = vld [vmem:[%s18988_s3 + $0xad8] ss:$20 sps:$4 sm:$0xff]  }
 0x4fa   :  { %v14473_v60 = vld [vmem:[%s18988_s3 + $0xd58] ss:$20 sps:$4 sm:$0xff]  }
 0x4fb   :  { %12248 = vmatpush3.bf16.msra.mxu0 %v14412_v1  ;;  %v14474_v1 = vld [vmem:[%s18988_s3 + $0xc40] ss:$20 sps:$4 sm:$0xff]  }
 0x4fc   :  { %12270 = vmatpush3.bf16.msra.mxu1 %v14413_v45  ;;  %12249 = vmatprep.subr.bf16.mxu0 %v14414_v32  ;;  %v14475_v45 = vld [vmem:[%s18988_s3 + $0xec0] ss:$20 sps:$4 sm:$0xff]  }
 0x4fd   :  { %12271 = vmatprep.subr.bf16.mxu1 %v14415_v33  ;;  %v14476_v32 = vld [vmem:[%s18988_s3 + $0xb00] ss:$20 sps:$4 sm:$0xff]  }
 0x4fe   :  { %v14477_v33 = vld [vmem:[%s18988_s3 + $0xd80] ss:$20 sps:$4 sm:$0xff]  }
 0x4ff   :  { %12250 = vmatpush3.bf16.msra.mxu0 %v14416_v36  ;;  %v14478_v36 = vld [vmem:[%s18988_s3 + $0xc68] ss:$20 sps:$4 sm:$0xff]  }
 0x500   :  { %12272 = vmatpush3.bf16.msra.mxu1 %v14417_v47  ;;  %12279 = vmatprep.subr.bf16.mxu0 %v14418_v46  ;;  %v14479_v47 = vld [vmem:[%s18988_s3 + $0xee8] ss:$20 sps:$4 sm:$0xff]  }
 0x501   :  { %12301 = vmatprep.subr.bf16.mxu1 %v14419_v5  ;;  %v14480_v46 = vld [vmem:[%s18988_s3 + $0xb28] ss:$20 sps:$4 sm:$0xff]  }
 0x502   :  { %10611 = vmatmul.mubr.bf16.vlgmr.msra.gmra.mrb[28].mxu0 %v17237_v20  ;;  %v14426_v20 = vld [vmem:[%s18988_s3 + $0x6a0] ss:$20 sps:$4 sm:$0xff]   ;;  %v14481_v5 = vld [vmem:[%s18988_s3 + $0xda8] ss:$20 sps:$4 sm:$0xff]  }
 0x503   :  { %10652 = vmatmul.mubr.bf16.vlgmr.msra.gmra.mrb[28].mxu1 %v17239_v21  ;;  %12280 = vmatpush3.bf16.msra.mxu0 %v14420_v6  ;;  %v14427_v21 = vld [vmem:[%s18988_s3 + $0x920] ss:$20 sps:$4 sm:$0xff]  }
 0x504   :  { %10692 = vmatprep.mubr.bf16.mxu0 %v17707_v15  ;;  %12302 = vmatpush3.bf16.msra.mxu1 %v14421_v37  ;;  %v14428_v15 = vld [vmem:[%s18988_s3 + $0x560] ss:$20 sps:$4 sm:$0xff]  }
 0x505   :  { %10733 = vmatprep.mubr.bf16.mxu1 %v17709_v59  ;;  %12281 = vmatprep.subr.bf16.mxu0 %v14422_v48  ;;  %v14430_v59 = vld [vmem:[%s18988_s3 + $0x6c8] ss:$20 sps:$4 sm:$0xff]  }
 0x506   :  { %12303 = vmatprep.subr.bf16.mxu1 %v14423_v38 }
 0x507   :  { %12282 = vmatpush3.bf16.msra.mxu0 %v14424_v29 }
 0x508   :  { %12304 = vmatpush3.bf16.msra.mxu1 %v14425_v7  ;;  %12283 = vmatprep.subr.bf16.mxu0 %v14426_v20 }
 0x509   :  { %12305 = vmatprep.subr.bf16.mxu1 %v14427_v21 }
 0x50b   :  { %12284 = vmatpush3.bf16.msra.mxu0 %v14428_v15 }
 0x50c   :  { %12306 = vmatpush3.bf16.msra.mxu1 %v14429_v51  ;;  %12285 = vmatprep.subr.bf16.mxu0 %v14430_v59 }
 0x50d   :  { %12307 = vmatprep.subr.bf16.mxu1 %v14431_v8 }
 0x50f   :  { %12286 = vmatpush3.bf16.msra.mxu0 %v14432_v52 }
 0x510   :  { %12308 = vmatpush3.bf16.msra.mxu1 %v14433_v11  ;;  %12287 = vmatprep.subr.bf16.mxu0 %v14434_v12 }
 0x511   :  { %12309 = vmatprep.subr.bf16.mxu1 %v14435_v40 }
 0x513   :  { %12288 = vmatpush3.bf16.msra.mxu0 %v14436_v43 }
 0x514   :  { %12310 = vmatpush3.bf16.msra.mxu1 %v14437_v49  ;;  %12289 = vmatprep.subr.bf16.mxu0 %v14438_v63 }
 0x515   :  { %12311 = vmatprep.subr.bf16.mxu1 %v14439_v55 }
 0x517   :  { %12290 = vmatpush3.bf16.msra.mxu0 %v14440_v56 }
 0x518   :  { %12312 = vmatpush3.bf16.msra.mxu1 %v14441_v57  ;;  %12291 = vmatprep.subr.bf16.mxu0 %v14442_v2 }
 0x519   :  { %12313 = vmatprep.subr.bf16.mxu1 %v14443_v34 }
 0x51b   :  { %12292 = vmatpush3.bf16.msra.mxu0 %v14444_v35 }
 0x51c   :  { %12314 = vmatpush3.bf16.msra.mxu1 %v14445_v9  ;;  %12293 = vmatprep.subr.bf16.mxu0 %v14446_v10 }
 0x51d   :  { %12315 = vmatprep.subr.bf16.mxu1 %v14447_v13 }
 0x51f   :  { %12294 = vmatpush3.bf16.msra.mxu0 %v14448_v14 }
 0x520   :  { %12316 = vmatpush3.bf16.msra.mxu1 %v14449_v39  ;;  %12323 = vmatprep.subr.bf16.mxu0 %v14450_v16 }
 0x521   :  { %12345 = vmatprep.subr.bf16.mxu1 %v14451_v0 }
 0x522   :  { %10693 = vmatmul.mubr.bf16.vlgmr.msra.gmra.mrb[32].mxu0 %v17703_v50  ;;  %v14458_v50 = vld [vmem:[%s18988_s3 + $0xba0] ss:$20 sps:$4 sm:$0xff]  }
 0x523   :  { %10734 = vmatmul.mubr.bf16.vlgmr.msra.gmra.mrb[32].mxu1 %v17705_v58  ;;  %12324 = vmatpush3.bf16.msra.mxu0 %v14452_v3  ;;  %v14459_v58 = vld [vmem:[%s18988_s3 + $0xe20] ss:$20 sps:$4 sm:$0xff]  }
 0x524   :  { %10774 = vmatprep.mubr.bf16.mxu0 %v18171_v61  ;;  %12346 = vmatpush3.bf16.msra.mxu1 %v14453_v4  ;;  %v14460_v61 = vld [vmem:[%s18988_s3 + $0xa60] ss:$20 sps:$4 sm:$0xff]  }
 0x525   :  { %10815 = vmatprep.mubr.bf16.mxu1 %v18173_v62  ;;  %12325 = vmatprep.subr.bf16.mxu0 %v14454_v22  ;;  %v14462_v62 = vld [vmem:[%s18988_s3 + $0xbc8] ss:$20 sps:$4 sm:$0xff]   ;;  %s14626_s3 = smov [#allocation2]  }
 0x526   :  { %12347 = vmatprep.subr.bf16.mxu1 %v14455_v17  ;;  %s10839_s1 = sshll.u32 %s14626_s3, 4  ;;  %s10840_s1 = int_to_ptr.vmem [resolvable:$true] %s10839_s1 }
 0x527   :  { %12326 = vmatpush3.bf16.msra.mxu0 %v14456_v23  ;;  %s14601_s27 = scalar_lea.vmem %s10840_s1, 1280  ;;  %p14606_p1 = scmp.lt.s32.totalorder %s10840_s1, %s10840_s1 }
 0x528   :  { %12348 = vmatpush3.bf16.msra.mxu1 %v14457_v18  ;;  %12327 = vmatprep.subr.bf16.mxu0 %v14458_v50  ;;  %p14602_p0 = scmp.ne.s32.totalorder %s10840_s1, %s14601_s27  ;;  %p14607_p2 = scmp.lt.s32.totalorder %s14601_s27, %s14601_s27 }
 0x529   :  { %12349 = vmatprep.subr.bf16.mxu1 %v14459_v58 }
 0x52a   :  { %p14608_p3 = por %p14607_p2, %p14606_p1 }
 0x52b   :  { %12328 = vmatpush3.bf16.msra.mxu0 %v14460_v61 }
 0x52c   :  { %12350 = vmatpush3.bf16.msra.mxu1 %v14461_v19  ;;  %12329 = vmatprep.subr.bf16.mxu0 %v14462_v62  ;;  %p14609_p4 = pnand %p14608_p3, %p14602_p0 }
 0x52d   :  { %12351 = vmatprep.subr.bf16.mxu1 %v14463_v41 }
 0x52f   :  { %12330 = vmatpush3.bf16.msra.mxu0 %v14464_v24 }
 0x530   :  { %12352 = vmatpush3.bf16.msra.mxu1 %v14465_v42  ;;  %12331 = vmatprep.subr.bf16.mxu0 %v14466_v25 }
 0x531   :  { %12353 = vmatprep.subr.bf16.mxu1 %v14467_v26 }
 0x533   :  { %12332 = vmatpush3.bf16.msra.mxu0 %v14468_v27 }
 0x534   :  { %12354 = vmatpush3.bf16.msra.mxu1 %v14469_v28  ;;  %12333 = vmatprep.subr.bf16.mxu0 %v14470_v30 }
 0x535   :  { %12355 = vmatprep.subr.bf16.mxu1 %v14471_v31 }
 0x537   :  { %12334 = vmatpush3.bf16.msra.mxu0 %v14472_v44 }
 0x538   :  { %12356 = vmatpush3.bf16.msra.mxu1 %v14473_v60  ;;  %12335 = vmatprep.subr.bf16.mxu0 %v14474_v1 }
 0x539   :  { %12357 = vmatprep.subr.bf16.mxu1 %v14475_v45 }
 0x53b   :  { %12336 = vmatpush3.bf16.msra.mxu0 %v14476_v32 }
 0x53c   :  { %12358 = vmatpush3.bf16.msra.mxu1 %v14477_v33  ;;  %12337 = vmatprep.subr.bf16.mxu0 %v14478_v36 }
 0x53d   :  { %12359 = vmatprep.subr.bf16.mxu1 %v14479_v47 }
 0x53f   :  { %12338 = vmatpush3.bf16.msra.mxu0 %v14480_v46 }
 0x540   :  { %12360 = vmatpush3.bf16.msra.mxu1 %v14481_v5 }
 0x542   :  { %10775 = vmatmul.mubr.bf16.vlgmr.msra.gmra.mrb[36].mxu0 %v18167_v53 }
 0x543   :  { %10816 = vmatmul.mubr.bf16.vlgmr.msra.gmra.mrb[36].mxu1 %v18169_v54 }
 0x5b5   :  { %v10311_v6 = vpop.f32.mrb[24].mxu0 }
 0x5b6   :  { %10824 = vst [vmem:[#allocation2] sm:$0xff] %v10311_v6  ;;  %v10569_v37 = vpop.f32.mrb[24].mxu1  ;;  %v10313_v48 = vpop.f32.mrb[25].mxu0 }
 0x5b7   :  { %10826 = vst [vmem:[#allocation2 + $0x10] sm:$0xff] %v10569_v37  ;;  %10825 = vst [vmem:[#allocation2 + $0x8] sm:$0xff] %v10313_v48  ;;  %v10571_v38 = vpop.f32.mrb[25].mxu1  ;;  %v10315_v29 = vpop.f32.mrb[26].mxu0 }
 0x5b8   :  { %10827 = vst [vmem:[#allocation2 + $0x18] sm:$0xff] %v10571_v38  ;;  %10829 = vst [vmem:[#allocation2 + $0x28] sm:$0xff] %v10315_v29  ;;  %v10573_v7 = vpop.f32.mrb[26].mxu1  ;;  %v10317_v20 = vpop.f32.mrb[27].mxu0 }
 0x5b9   :  { %10831 = vst [vmem:[#allocation2 + $0x38] sm:$0xff] %v10573_v7  ;;  %10830 = vst [vmem:[#allocation2 + $0x30] sm:$0xff] %v10317_v20  ;;  %v10575_v21 = vpop.f32.mrb[27].mxu1 }
 0x5ba   :  { %10832 = vst [vmem:[#allocation2 + $0x40] sm:$0xff] %v10575_v21 }
 0x5d5   :  { %v12251_v15 = vpop.f32.mrb[28].mxu0 }
 0x5d6   :  { %v12273_v53 = vpop.f32.mrb[28].mxu1  ;;  %v12252_v51 = vpop.f32.mrb[29].mxu0 }
 0x5d7   :  { %v12253_v54 = vadd.f32 %v12252_v51, %v12251_v15  ;;  %v12274_v59 = vpop.f32.mrb[29].mxu1  ;;  %v12254_v8 = vpop.f32.mrb[30].mxu0 }
 0x5d8   :  { %v12275_v52 = vadd.f32 %v12274_v59, %v12273_v53  ;;  %v12276_v11 = vpop.f32.mrb[30].mxu1  ;;  %v12255_v12 = vpop.f32.mrb[31].mxu0 }
 0x5d9   :  { %v12256_v40 = vadd.f32 %v12255_v12, %v12254_v8  ;;  %v12277_v43 = vpop.f32.mrb[31].mxu1 }
 0x5da   :  { %v10654_v49 = vadd.f32 %v12275_v52, %v12253_v54  ;;  %v12278_v63 = vadd.f32 %v12277_v43, %v12276_v11 }
 0x5dc   :  { %v10657_v55 = vadd.f32 %v12278_v63, %v12256_v40 }
 0x5f5   :  { %v12295_v56 = vpop.f32.mrb[32].mxu0 }
 0x5f6   :  { %v12317_v57 = vpop.f32.mrb[32].mxu1  ;;  %v12296_v2 = vpop.f32.mrb[33].mxu0 }
 0x5f7   :  { %v12297_v34 = vadd.f32 %v12296_v2, %v12295_v56  ;;  %v12318_v35 = vpop.f32.mrb[33].mxu1  ;;  %v12298_v9 = vpop.f32.mrb[34].mxu0 }
 0x5f8   :  { %v12319_v10 = vadd.f32 %v12318_v35, %v12317_v57  ;;  %v12320_v13 = vpop.f32.mrb[34].mxu1  ;;  %v12299_v14 = vpop.f32.mrb[35].mxu0 }
 0x5f9   :  { %v10695_v39 = vadd.f32 %v12297_v34, %v10654_v49  ;;  %v12300_v16 = vadd.f32 %v12299_v14, %v12298_v9  ;;  %v12321_v0 = vpop.f32.mrb[35].mxu1 }
 0x5fa   :  { %v12322_v3 = vadd.f32 %v12321_v0, %v12320_v13 }
 0x5fb   :  { %v10736_v4 = vadd.f32 %v12319_v10, %v10695_v39  ;;  %v10698_v22 = vadd.f32 %v12300_v16, %v10657_v55 }
 0x5fd   :  { %v10739_v17 = vadd.f32 %v12322_v3, %v10698_v22 }
 0x615   :  { %v12339_v23 = vpop.f32.mrb[36].mxu0 }
 0x616   :  { %v12361_v18 = vpop.f32.mrb[36].mxu1  ;;  %v12340_v50 = vpop.f32.mrb[37].mxu0 }
 0x617   :  { %v12341_v58 = vadd.f32 %v12340_v50, %v12339_v23  ;;  %v12362_v61 = vpop.f32.mrb[37].mxu1  ;;  %v12342_v19 = vpop.f32.mrb[38].mxu0 }
 0x618   :  { %v12363_v62 = vadd.f32 %v12362_v61, %v12361_v18  ;;  %v12364_v41 = vpop.f32.mrb[38].mxu1  ;;  %v12343_v24 = vpop.f32.mrb[39].mxu0 }
 0x619   :  { %v10777_v42 = vadd.f32 %v12341_v58, %v10736_v4  ;;  %v12344_v25 = vadd.f32 %v12343_v24, %v12342_v19  ;;  %v12365_v26 = vpop.f32.mrb[39].mxu1 }
 0x61a   :  { %v12366_v27 = vadd.f32 %v12365_v26, %v12364_v41 }
 0x61b   :  { %v10818_v28 = vadd.f32 %v12363_v62, %v10777_v42  ;;  %v10780_v30 = vadd.f32 %v12344_v25, %v10739_v17 }
 0x61d   :  { %10828 = vst.msk [vmem:[#allocation2 + $0x20] sm:$0xff] %vm2642_vm0, %v10818_v28  ;;  %v10821_v31 = vadd.f32 %v12366_v27, %v10780_v30 }
 0x61f   :  { %10833 = vst.msk [vmem:[#allocation2 + $0x48] sm:$0xff] %vm2642_vm0, %v10821_v31 }
 0x620   :  { %14612 = shalt.err (!%p14609_p4)
}
 0x621   :  { %s14613_s29 = scalar_lea.hbm %s18989_s4, 1280 }
 0x622   :  { %p14614_p5 = scmp.ne.s32.totalorder %s18989_s4, %s14613_s29  ;;  %p14617_p6 = scmp.lt.u32.totalorder %s14613_s29, %s18989_s4 }
 0x624   :  { %p14619_p7 = pnand %p14617_p6, %p14614_p5 }
 0x626   :  { %14622 = shalt.err (!%p14619_p7)
}
 0x627   :  { %s14627_s8 = smov 640   ;;  %s14628_s9 = smov 40  }
 0x628   :  { %10845 = dma.vmem_to_hbm [thread:$0]  %s10840_s1, 1280, %s18989_s4, [#allocation3], %s14627_s8, %s14627_s8, %s14628_s9  }
 0x629   :  { %14623 = dma.done.wait [#allocation3], 1280  }
 0x62a   :  { %14624 = vsyncadd [#allocation3], 4294966016 }
 0x62b   :  { %10849 = vsyncpa [#allocation3], 1 }

</bundles_post_ra>
